<compile_context>
chip_gen: v5e
topology: v5e:2x2
jax: 0.10.0
libtpu: 0.0.40
codegen_flags: <defaults>
</compile_context>

<pallas_src>
import jax
import jax.numpy as jnp
from jax import lax
from jax.experimental import pallas as pl
from jax.experimental.pallas import tpu as pltpu

_ALIGN = 256  # 128-lane + 256-wide MXU fill (v6e/v7x) + int8 (32,128) sublane tiling


def _make_kernel(n_actual, tm, tn, needs_mask):
    def kernel(scale_ref, img_ref, txt_ref, pp_ref, ppt_ref, out_img_ref, out_txt_ref):
        i = pl.program_id(0)
        j = pl.program_id(1)

        # Per-i output block is resident across the (inner, "arbitrary") j axis.
        @pl.when(j == 0)
        def _init():
            out_img_ref[...] = jnp.zeros_like(out_img_ref)
            out_txt_ref[...] = jnp.zeros_like(out_txt_ref)

        scale = scale_ref[0]
        dims = (((1,), (1,)), ((), ()))      # contract the feature dim, no transpose
        # Single bf16 MXU matmul with f32 accumulation; reused by both loss directions.
        logits = lax.dot_general(img_ref[...], txt_ref[...], dims,
                                 preferred_element_type=jnp.float32) * scale

        # Stable BCE-with-logits softplus term, shared by image and text losses.
        # TODO(synk): on v6e/v7x this could run in bf16 on the EUP for ~2x.
        common = jnp.maximum(logits, 0.0) + jnp.log1p(jnp.exp(-jnp.abs(logits)))
        if needs_mask:
            # Only the softplus term needs masking: padded positive_pairs entries are 0,
            # so the logits*target products already vanish in the padded region.
            row = i * tm + lax.broadcasted_iota(jnp.int32, (tm, tn), 0)
            col = j * tn + lax.broadcasted_iota(jnp.int32, (tm, tn), 1)
            common = jnp.where((row < n_actual) & (col < n_actual), common, 0.0)

        pp = pp_ref[...].astype(jnp.float32)     # positive_pairs[i, j]   (int8 -> f32)
        ppt = ppt_ref[...].astype(jnp.float32)   # positive_pairs.T[i, j]

        # Fold (tm, tn) -> (8, tn): sublane-group vreg adds only (pure VALU, no XLU,
        # no (1,1) masked stores).  Final cross-lane reduce happens once, in XLA.
        def fold(x):
            return jnp.sum(x.reshape(tm // 8, 8, tn), axis=0)

        out_img_ref[...] += fold(common - logits * pp)[None]
        out_txt_ref[...] += fold(common - logits * ppt)[None]

    return kernel


def _pick_tile(n_pad, preferred):
    """Largest 256-aligned tile <= preferred that divides the padded extent."""
    t = max(_ALIGN, min(preferred, n_pad))
    t = (t // _ALIGN) * _ALIGN
    while n_pad % t:
        t -= _ALIGN
    return t


def single_text_feature_clip_loss(image_features, text_features, positive_pairs,
                                  logit_scale, *, block_m=512, block_n=512,
                                  feature_dtype=jnp.bfloat16, pp_dtype=jnp.int8):
    """Returns (total_loss, image_loss, text_loss); total matches the PyTorch module.

    positive_pairs is assumed binary {0, 1} (as in the SNN loss), so the int8 stream
    is exact while cutting its HBM traffic 4x vs f32.
    """
    N, D = image_features.shape
    assert text_features.shape == (N, D)
    assert positive_pairs.shape == (N, N)

    n_pad = -(-N // _ALIGN) * _ALIGN
    pad = n_pad - N
    tm = _pick_tile(n_pad, block_m)
    tn = _pick_tile(n_pad, block_n)
    grid = (n_pad // tm, n_pad // tn)   # i outer ("parallel"), j inner ("arbitrary")

    img = image_features.astype(feature_dtype)
    txt = text_features.astype(feature_dtype)
    pp8 = positive_pairs.astype(pp_dtype)
    if pad:
        img = jnp.pad(img, ((0, pad), (0, 0)))
        txt = jnp.pad(txt, ((0, pad), (0, 0)))
        pp8 = jnp.pad(pp8, ((0, pad), (0, pad)))
    # One mem-bound XLA transpose of the targets replaces a second MXU matmul per tile.
    pp_t = pp8.T

    scale_arr = jnp.asarray(logit_scale, dtype=jnp.float32).reshape((1,))

    grid_spec = pltpu.PrefetchScalarGridSpec(
        num_scalar_prefetch=1,                                   # logit_scale -> SMEM
        grid=grid,
        in_specs=[
            pl.BlockSpec((tm, D), lambda i, j, s: (i, 0)),       # image rows (bf16)
            pl.BlockSpec((tn, D), lambda i, j, s: (j, 0)),       # text rows  (bf16)
            pl.BlockSpec((tm, tn), lambda i, j, s: (i, j)),      # positive_pairs   (int8)
            pl.BlockSpec((tm, tn), lambda i, j, s: (i, j)),      # positive_pairs.T (int8)
        ],
        out_specs=[
            pl.BlockSpec((1, 8, tn), lambda i, j, s: (i, 0, 0)),  # per-i image partial
            pl.BlockSpec((1, 8, tn), lambda i, j, s: (i, 0, 0)),  # per-i text partial
        ],
    )

    out_img, out_txt = pl.pallas_call(
        _make_kernel(N, tm, tn, pad != 0),
        out_shape=(jax.ShapeDtypeStruct((grid[0], 8, tn), jnp.float32),
                   jax.ShapeDtypeStruct((grid[0], 8, tn), jnp.float32)),
        grid_spec=grid_spec,
        compiler_params=pltpu.CompilerParams(
            dimension_semantics=("parallel", "arbitrary"),   # i can shard across TCs (v7x)
            vmem_limit_bytes=48 * 1024 * 1024),
    )(scale_arr, img, txt, pp8, pp_t)

    # Tiny finalize in XLA: hierarchical sum (per-tile vector partials already in f32).
    inv_nn = 1.0 / float(N * N)
    image_loss = jnp.sum(out_img) * inv_nn
    text_loss = jnp.sum(out_txt) * inv_nn
    total = 0.5 * (image_loss + text_loss)
    return total, image_loss, text_loss


def _reference(image_features, text_features, positive_pairs, logit_scale):
    logits = jnp.dot(image_features, text_features.T,
                     precision=lax.Precision.HIGHEST) * logit_scale

    def bce(x, y):
        return jnp.mean(jnp.maximum(x, 0.0) - x * y + jnp.log1p(jnp.exp(-jnp.abs(x))))

    il = bce(logits, positive_pairs)
    tl = bce(logits.T, positive_pairs)
    return (il + tl) / 2.0, il, tl


if __name__ == "__main__":
    base_key = jax.random.PRNGKey(0)

    def _run_case(case_id, N, D, block):
        k1, k2, k3 = jax.random.split(jax.random.fold_in(base_key, case_id), 3)
        img = jax.random.normal(k1, (N, D), dtype=jnp.float32)
        txt = jax.random.normal(k2, (N, D), dtype=jnp.float32)
        img = img / jnp.linalg.norm(img, axis=-1, keepdims=True)
        txt = txt / jnp.linalg.norm(txt, axis=-1, keepdims=True)
        # asymmetric {0,1} targets (identity positives + random extras) so the
        # transposed-targets path is actually exercised
        rand_pos = (jax.random.uniform(k3, (N, N)) < 0.05).astype(jnp.float32)
        pp = jnp.clip(jnp.eye(N, dtype=jnp.float32) + rand_pos, 0.0, 1.0)
        logit_scale = jnp.float32(1.0 / 0.07)   # CLIP init: exp(log(1/0.07))

        total, il, tl = single_text_feature_clip_loss(
            img, txt, pp, logit_scale, block_m=block, block_n=block)
        jax.block_until_ready(total)

        # Tight check vs a reference using the same bf16-rounded features.
        img16 = img.astype(jnp.bfloat16).astype(jnp.float32)
        txt16 = txt.astype(jnp.bfloat16).astype(jnp.float32)
        rt, ri, rl = _reference(img16, txt16, pp, logit_scale)
        assert jnp.allclose(total, rt, rtol=5e-4, atol=1e-4), (N, total, rt)
        assert jnp.allclose(il, ri, rtol=5e-4, atol=1e-4), (N, il, ri)
        assert jnp.allclose(tl, rl, rtol=5e-4, atol=1e-4), (N, tl, rl)

        # Loose check vs the full-f32 module semantics (bf16-matmul tolerance).
        ft, fi, fl = _reference(img, txt, pp, logit_scale)
        assert jnp.allclose(total, ft, rtol=2e-2, atol=2e-3), (N, total, ft)
        assert jnp.allclose(il, fi, rtol=2e-2, atol=2e-3), (N, il, fi)
        assert jnp.allclose(tl, fl, rtol=2e-2, atol=2e-3), (N, tl, fl)

    _run_case(0, 256, 64, 256)   # tile-exact N, single i block
    _run_case(1, 384, 64, 256)   # ragged N -> padded + masked, 2x2 grid, multi-i blocks
    print("KERNEL_OK")
</pallas_src>

<mosaic_0001>
module attributes {stable_mosaic.version = 11 : i64} {
  func.func @kernel(%arg0: i32, %arg1: i32, %arg2: memref<1xf32, #tpu.memory_space<smem>>, %arg3: memref<256x64xbf16, #tpu.memory_space<vmem>>, %arg4: memref<256x64xbf16, #tpu.memory_space<vmem>>, %arg5: memref<256x256xi8, #tpu.memory_space<vmem>>, %arg6: memref<256x256xi8, #tpu.memory_space<vmem>>, %arg7: memref<1x8x256xf32, #tpu.memory_space<vmem>>, %arg8: memref<1x8x256xf32, #tpu.memory_space<vmem>>) attributes {dimension_semantics = [#tpu.dimension_semantics<parallel>, #tpu.dimension_semantics<arbitrary>], iteration_bounds = array<i64: 1, 1>, scalar_prefetch = 1 : i64, scratch_operands = 0 : i64, tpu.core_type = #tpu.core_type<tc>, window_params = [{transform_indices = @transform_0, window_bounds = array<i64: 256, 64>}, {transform_indices = @transform_1, window_bounds = array<i64: 256, 64>}, {transform_indices = @transform_2, window_bounds = array<i64: 256, 256>}, {transform_indices = @transform_3, window_bounds = array<i64: 256, 256>}, {transform_indices = @transform_4, window_bounds = array<i64: 1, 8, 256>}, {transform_indices = @transform_5, window_bounds = array<i64: 1, 8, 256>}]} {
    %c0_i32 = arith.constant 0 : i32
    %0 = arith.cmpi eq, %arg1, %c0_i32 : i32
    %1 = arith.extui %0 : i1 to i32
    %c0_i32_0 = arith.constant 0 : i32
    %2 = arith.cmpi ne, %1, %c0_i32_0 : i32
    scf.if %2 {
      %cst_25 = arith.constant 0.000000e+00 : f32
      %37 = vector.broadcast %cst_25 : f32 to vector<1x8x256xf32>
      %c0_26 = arith.constant 0 : index
      %c0_27 = arith.constant 0 : index
      %c0_28 = arith.constant 0 : index
      %38 = vector.load %arg7[%c0_26, %c0_27, %c0_28] : memref<1x8x256xf32, #tpu.memory_space<vmem>>, vector<1x8x256xf32>
      tpu.vector_store %arg7[%c0_26, %c0_27, %c0_28], %37 {strides = array<i32>} : memref<1x8x256xf32, #tpu.memory_space<vmem>>, vector<1x8x256xf32>,
      %cst_29 = arith.constant 0.000000e+00 : f32
      %39 = vector.broadcast %cst_29 : f32 to vector<1x8x256xf32>
      %c0_30 = arith.constant 0 : index
      %c0_31 = arith.constant 0 : index
      %c0_32 = arith.constant 0 : index
      %40 = vector.load %arg8[%c0_30, %c0_31, %c0_32] : memref<1x8x256xf32, #tpu.memory_space<vmem>>, vector<1x8x256xf32>
      tpu.vector_store %arg8[%c0_30, %c0_31, %c0_32], %39 {strides = array<i32>} : memref<1x8x256xf32, #tpu.memory_space<vmem>>, vector<1x8x256xf32>,
    } else {
    }
    %c0 = arith.constant 0 : index
    %3 = memref.load %arg2[%c0] : memref<1xf32, #tpu.memory_space<smem>>
    %c0_1 = arith.constant 0 : index
    %c0_2 = arith.constant 0 : index
    %4 = vector.load %arg3[%c0_1, %c0_2] : memref<256x64xbf16, #tpu.memory_space<vmem>>, vector<256x64xbf16>
    %c0_3 = arith.constant 0 : index
    %c0_4 = arith.constant 0 : index
    %5 = vector.load %arg4[%c0_3, %c0_4] : memref<256x64xbf16, #tpu.memory_space<vmem>>, vector<256x64xbf16>
    %cst = arith.constant dense<0.000000e+00> : vector<256x256xf32>
    %6 = tpu.matmul %4, %5, %cst {dimension_numbers = #tpu.dot_dimension_numbers<[1], [1], [0], [0], [0, 0, 1, 0], [], []>} : vector<256x64xbf16>, vector<256x64xbf16>, vector<256x256xf32> -> vector<256x256xf32>
    %7 = vector.broadcast %3 : f32 to vector<256x256xf32>
    %8 = arith.mulf %6, %7 : vector<256x256xf32>
    %cst_5 = arith.constant 0.000000e+00 : f32
    %9 = vector.broadcast %cst_5 : f32 to vector<256x256xf32>
    %10 = arith.maximumf %8, %9 : vector<256x256xf32>
    %11 = math.absf %8 : vector<256x256xf32>
    %cst_6 = arith.constant 0.000000e+00 : f32
    %12 = vector.broadcast %cst_6 : f32 to vector<256x256xf32>
    %13 = arith.subf %12, %11 : vector<256x256xf32>
    %14 = math.exp %13 : vector<256x256xf32>
    %15 = math.log1p %14 : vector<256x256xf32>
    %16 = arith.addf %10, %15 : vector<256x256xf32>
    %c0_7 = arith.constant 0 : index
    %c0_8 = arith.constant 0 : index
    %17 = vector.load %arg5[%c0_7, %c0_8] : memref<256x256xi8, #tpu.memory_space<vmem>>, vector<256x256xi8>
    %18 = arith.sitofp %17 : vector<256x256xi8> to vector<256x256xf32>
    %c0_9 = arith.constant 0 : index
    %c0_10 = arith.constant 0 : index
    %19 = vector.load %arg6[%c0_9, %c0_10] : memref<256x256xi8, #tpu.memory_space<vmem>>, vector<256x256xi8>
    %20 = arith.sitofp %19 : vector<256x256xi8> to vector<256x256xf32>
    %c0_11 = arith.constant 0 : index
    %c0_12 = arith.constant 0 : index
    %c0_13 = arith.constant 0 : index
    %21 = vector.load %arg7[%c0_11, %c0_12, %c0_13] : memref<1x8x256xf32, #tpu.memory_space<vmem>>, vector<1x8x256xf32>
    %22 = arith.mulf %8, %18 : vector<256x256xf32>
    %23 = arith.subf %16, %22 : vector<256x256xf32>
    %24 = vector.shape_cast %23 : vector<256x256xf32> to vector<32x8x256xf32>
    %cst_14 = arith.constant dense<0.000000e+00> : vector<8x256xf32>
    %25 = vector.multi_reduction <add>, %24, %cst_14 [0] : vector<32x8x256xf32> to vector<8x256xf32>
    %26 = vector.shape_cast %25 : vector<8x256xf32> to vector<1x8x256xf32>
    %27 = arith.addf %21, %26 : vector<1x8x256xf32>
    %c0_15 = arith.constant 0 : index
    %c0_16 = arith.constant 0 : index
    %c0_17 = arith.constant 0 : index
    %28 = vector.load %arg7[%c0_15, %c0_16, %c0_17] : memref<1x8x256xf32, #tpu.memory_space<vmem>>, vector<1x8x256xf32>
    tpu.vector_store %arg7[%c0_15, %c0_16, %c0_17], %27 {strides = array<i32>} : memref<1x8x256xf32, #tpu.memory_space<vmem>>, vector<1x8x256xf32>,
    %c0_18 = arith.constant 0 : index
    %c0_19 = arith.constant 0 : index
    %c0_20 = arith.constant 0 : index
    %29 = vector.load %arg8[%c0_18, %c0_19, %c0_20] : memref<1x8x256xf32, #tpu.memory_space<vmem>>, vector<1x8x256xf32>
    %30 = arith.mulf %8, %20 : vector<256x256xf32>
    %31 = arith.subf %16, %30 : vector<256x256xf32>
    %32 = vector.shape_cast %31 : vector<256x256xf32> to vector<32x8x256xf32>
    %cst_21 = arith.constant dense<0.000000e+00> : vector<8x256xf32>
    %33 = vector.multi_reduction <add>, %32, %cst_21 [0] : vector<32x8x256xf32> to vector<8x256xf32>
    %34 = vector.shape_cast %33 : vector<8x256xf32> to vector<1x8x256xf32>
    %35 = arith.addf %29, %34 : vector<1x8x256xf32>
    %c0_22 = arith.constant 0 : index
    %c0_23 = arith.constant 0 : index
    %c0_24 = arith.constant 0 : index
    %36 = vector.load %arg8[%c0_22, %c0_23, %c0_24] : memref<1x8x256xf32, #tpu.memory_space<vmem>>, vector<1x8x256xf32>
    tpu.vector_store %arg8[%c0_22, %c0_23, %c0_24], %35 {strides = array<i32>} : memref<1x8x256xf32, #tpu.memory_space<vmem>>, vector<1x8x256xf32>,
    return
  }
  func.func @transform_0(%arg0: i32, %arg1: i32, %arg2: memref<1xf32, #tpu.memory_space<smem>>) -> (i32, i32) {
    %c0_i32 = arith.constant 0 : i32
    %c0_i32_0 = arith.constant 0 : i32
    return %arg0, %c0_i32 : i32, i32
  }
  func.func @transform_1(%arg0: i32, %arg1: i32, %arg2: memref<1xf32, #tpu.memory_space<smem>>) -> (i32, i32) {
    %c0_i32 = arith.constant 0 : i32
    %c0_i32_0 = arith.constant 0 : i32
    return %arg1, %c0_i32 : i32, i32
  }
  func.func @transform_2(%arg0: i32, %arg1: i32, %arg2: memref<1xf32, #tpu.memory_space<smem>>) -> (i32, i32) {
    %c0_i32 = arith.constant 0 : i32
    return %arg0, %arg1 : i32, i32
  }
  func.func @transform_3(%arg0: i32, %arg1: i32, %arg2: memref<1xf32, #tpu.memory_space<smem>>) -> (i32, i32) {
    %c0_i32 = arith.constant 0 : i32
    return %arg0, %arg1 : i32, i32
  }
  func.func @transform_4(%arg0: i32, %arg1: i32, %arg2: memref<1xf32, #tpu.memory_space<smem>>) -> (i32, i32, i32) {
    %c0_i32 = arith.constant 0 : i32
    %c0_i32_0 = arith.constant 0 : i32
    %c0_i32_1 = arith.constant 0 : i32
    return %arg0, %c0_i32, %c0_i32_0 : i32, i32, i32
  }
  func.func @transform_5(%arg0: i32, %arg1: i32, %arg2: memref<1xf32, #tpu.memory_space<smem>>) -> (i32, i32, i32) {
    %c0_i32 = arith.constant 0 : i32
    %c0_i32_0 = arith.constant 0 : i32
    %c0_i32_1 = arith.constant 0 : i32
    return %arg0, %c0_i32, %c0_i32_0 : i32, i32, i32
  }
}

</mosaic_0001>

<bundles_post_ra>
// kernel: tpu_custom_call.1
= control target key start
LH: loop header
LB: loop body
LE: loop exit
PB: predicated region body
PF: predicated region fallthrough
CT: control target
= control target key end

     0   :  { %13 = vsyncpa [#allocation5], 0  ;;  %vm256_vm0 = vcmask 523264   ;;  %s5254_s0 = inlined_call_operand.<no memory space> [shape: f32[1], index: 0, kind: input, shape index: {}]   ;;  %s5255_s1 = inlined_call_operand.vmem [shape: bf16[256,64], index: 1, kind: input, shape index: {}]   ;;  %s5256_s2 = inlined_call_operand.vmem [shape: bf16[256,64], index: 2, kind: input, shape index: {}]   ;;  %s5257_s3 = inlined_call_operand.vmem [shape: s8[256,256], index: 3, kind: input, shape index: {}]   ;;  %s5258_s4 = inlined_call_operand.vmem [shape: s8[256,256], index: 4, kind: input, shape index: {}]   ;;  %s5259_s5 = inlined_call_operand.hbm [shape: f32[1,8,256], index: 5, kind: output, shape index: {0}]   ;;  %s5260_s6 = inlined_call_operand.hbm [shape: f32[1,8,256], index: 6, kind: output, shape index: {1}]  }
   0x1   :  { %v2451_v0 = vld [vmem:[%s5256_s2 + $0x38] sm:$0xff] }
   0x2   :  { %v2459_v1 = vld [vmem:[%s5256_s2 + $0x78] sm:$0xff]  ;;  %v327_v2 = vsel %vm256_vm0, %v2451_v0, 0 }
   0x3   :  { %v351_v3 = vsel %vm256_vm0, %v2459_v1, 0  ;;  %353 = vmatpush.bf16.xpose.msra.mxu0 %v327_v2  ;;  %2460 = vmatpush.bf16.xpose.msra.mxu2 %v327_v2 }
   0x4   :  { %14 = vsyncpa [#allocation7], 0  ;;  %442 = vmatpush.bf16.xpose.msra.mxu1 %v351_v3  ;;  %2468 = vmatpush.bf16.xpose.msra.mxu3 %v351_v3  ;;  %v2450_v4 = vld [vmem:[%s5256_s2 + $0x30] sm:$0xff]  ;;  %v2449_v8 = vld [vmem:[%s5256_s2 + $0x28] sm:$0xff]  ;;  %v2971_v48 = vstv %s5254_s0  ;;  %s2243_s23 = sshll.u32 %s5259_s5, 4  ;;  %s2788_s24 = smov [#allocation6]   ;;  %s2244_s23 = int_to_ptr.hbm [resolvable:$true] %s2243_s23 }
   0x5   :  { %v2458_v5 = vld [vmem:[%s5256_s2 + $0x70] sm:$0xff]  ;;  %v324_v6 = vsel %vm256_vm0, %v2450_v4, 0  ;;  %v2457_v9 = vld [vmem:[%s5256_s2 + $0x68] sm:$0xff]  ;;  %v321_v10 = vsel %vm256_vm0, %v2449_v8, 0  ;;  %v2448_v12 = vld [vmem:[%s5256_s2 + $0x20] sm:$0xff]  ;;  %s2252_s25 = sshll.u32 %s2788_s24, 4  ;;  %s2253_s25 = int_to_ptr.vmem [resolvable:$true] %s2252_s25 }
   0x6   :  { %v348_v7 = vsel %vm256_vm0, %v2458_v5, 0  ;;  %v345_v11 = vsel %vm256_vm0, %v2457_v9, 0  ;;  %v2456_v13 = vld [vmem:[%s5256_s2 + $0x60] sm:$0xff]  ;;  %v318_v14 = vsel %vm256_vm0, %v2448_v12, 0  ;;  %v2447_v16 = vld [vmem:[%s5256_s2 + $0x18] sm:$0xff]  ;;  %v2446_v20 = vld [vmem:[%s5256_s2 + $0x10] sm:$0xff] }
   0x7   :  { %v342_v15 = vsel %vm256_vm0, %v2456_v13, 0  ;;  %v2455_v17 = vld [vmem:[%s5256_s2 + $0x58] sm:$0xff]  ;;  %v315_v18 = vsel %vm256_vm0, %v2447_v16, 0  ;;  %v2454_v21 = vld [vmem:[%s5256_s2 + $0x50] sm:$0xff]  ;;  %v312_v22 = vsel %vm256_vm0, %v2446_v20, 0  ;;  %v2445_v24 = vld [vmem:[%s5256_s2 + $0x8] sm:$0xff] }
   0x8   :  { %v339_v19 = vsel %vm256_vm0, %v2455_v17, 0  ;;  %v336_v23 = vsel %vm256_vm0, %v2454_v21, 0  ;;  %v2453_v25 = vld [vmem:[%s5256_s2 + $0x48] sm:$0xff]  ;;  %v309_v26 = vsel %vm256_vm0, %v2445_v24, 0  ;;  %v2444_v28 = vld [vmem:[%s5256_s2] sm:$0xff]  ;;  %v2430_v36 = vld [vmem:[%s5255_s1 + $0x10] sm:$0xff] }
   0x9   :  { %v333_v27 = vsel %vm256_vm0, %v2453_v25, 0  ;;  %v2452_v29 = vld [vmem:[%s5256_s2 + $0x40] sm:$0xff]  ;;  %v306_v30 = vsel %vm256_vm0, %v2444_v28, 0  ;;  %v2429_v34 = vld [vmem:[%s5255_s1 + $0x8] sm:$0xff]  ;;  %v2438_v37 = vld [vmem:[%s5255_s1 + $0x50] sm:$0xff]  ;;  %s2254_s28 = sshll.u32 %s5260_s6, 4  ;;  %s2255_s28 = int_to_ptr.hbm [resolvable:$true] %s2254_s28 }
   0xa   :  { %v330_v31 = vsel %vm256_vm0, %v2452_v29, 0  ;;  %v2428_v32 = vld [vmem:[%s5255_s1] sm:$0xff]  ;;  %v2437_v35 = vld [vmem:[%s5255_s1 + $0x48] sm:$0xff]  ;;  %v2431_v38 = vld [vmem:[%s5255_s1 + $0x18] sm:$0xff] }
   0xb   :  { %354 = vmatpush.bf16.xpose.msra.mxu0 %v324_v6  ;;  %2461 = vmatpush.bf16.xpose.msra.mxu2 %v324_v6  ;;  %v2436_v33 = vld [vmem:[%s5255_s1 + $0x40] sm:$0xff]  ;;  %v2439_v39 = vld [vmem:[%s5255_s1 + $0x58] sm:$0xff]  ;;  %v2433_v42 = vld [vmem:[%s5255_s1 + $0x28] sm:$0xff] }
   0xc   :  { %443 = vmatpush.bf16.xpose.msra.mxu1 %v348_v7  ;;  %2469 = vmatpush.bf16.xpose.msra.mxu3 %v348_v7  ;;  %v2432_v40 = vld [vmem:[%s5255_s1 + $0x20] sm:$0xff]  ;;  %v2441_v43 = vld [vmem:[%s5255_s1 + $0x68] sm:$0xff]  ;;  %v2434_v44 = vld [vmem:[%s5255_s1 + $0x30] sm:$0xff] }
   0xd   :  { %v2440_v41 = vld [vmem:[%s5255_s1 + $0x60] sm:$0xff]  ;;  %v2442_v45 = vld [vmem:[%s5255_s1 + $0x70] sm:$0xff]  ;;  %v2435_v46 = vld [vmem:[%s5255_s1 + $0x38] sm:$0xff] }
   0xe   :  { %v2443_v47 = vld [vmem:[%s5255_s1 + $0x78] sm:$0xff]  ;;  %v2997_v5 = vld [vmem:[%s5257_s3] sm:$0xff] }
   0xf   :  { %v3002_v6 = vld [vmem:[%s5258_s4] sm:$0xff] }
  0x10   :  { %v1716_v16 = vunpack.c.0.s8 %v3002_v6  ;;  %v3030_v25 = vld [vmem:[%s5257_s3 + $0x40] sm:$0xff] }
  0x13   :  { %355 = vmatpush.bf16.xpose.msra.mxu0 %v321_v10  ;;  %2462 = vmatpush.bf16.xpose.msra.mxu2 %v321_v10  ;;  %v3010_v10 = vld [vmem:[%s5257_s3 + $0x8] sm:$0xff] }
  0x14   :  { %444 = vmatpush.bf16.xpose.msra.mxu1 %v345_v11  ;;  %2470 = vmatpush.bf16.xpose.msra.mxu3 %v345_v11  ;;  %v3015_v11 = vld [vmem:[%s5258_s4 + $0x8] sm:$0xff]  ;;  %v1575_v28 = vunpack.c.1.s8 %v3010_v10 }
  0x15   :  { %v1717_v20 = vunpack.c.0.s8 %v3015_v11  ;;  %v1719_v29 = vunpack.c.1.s8 %v3015_v11 }
  0x1b   :  { %356 = vmatpush.bf16.xpose.msra.mxu0 %v318_v14  ;;  %2463 = vmatpush.bf16.xpose.msra.mxu2 %v318_v14 }
  0x1c   :  { %445 = vmatpush.bf16.xpose.msra.mxu1 %v342_v15  ;;  %2471 = vmatpush.bf16.xpose.msra.mxu3 %v342_v15  ;;  %v1572_v15 = vunpack.c.0.s8 %v2997_v5 }
  0x23   :  { %357 = vmatpush.bf16.xpose.msra.mxu0 %v315_v18  ;;  %2464 = vmatpush.bf16.xpose.msra.mxu2 %v315_v18 }
  0x24   :  { %446 = vmatpush.bf16.xpose.msra.mxu1 %v339_v19  ;;  %2472 = vmatpush.bf16.xpose.msra.mxu3 %v339_v19  ;;  %v1573_v19 = vunpack.c.0.s8 %v3010_v10 }
  0x2b   :  { %358 = vmatpush.bf16.xpose.msra.mxu0 %v312_v22  ;;  %2465 = vmatpush.bf16.xpose.msra.mxu2 %v312_v22 }
  0x2c   :  { %447 = vmatpush.bf16.xpose.msra.mxu1 %v336_v23  ;;  %2473 = vmatpush.bf16.xpose.msra.mxu3 %v336_v23  ;;  %v1574_v23 = vunpack.c.1.s8 %v2997_v5 }
  0x33   :  { %359 = vmatpush.bf16.xpose.msra.mxu0 %v309_v26  ;;  %2466 = vmatpush.bf16.xpose.msra.mxu2 %v309_v26 }
  0x34   :  { %448 = vmatpush.bf16.xpose.msra.mxu1 %v333_v27  ;;  %2474 = vmatpush.bf16.xpose.msra.mxu3 %v333_v27  ;;  %v1718_v27 = vunpack.c.1.s8 %v3002_v6 }
  0x3b   :  { %360 = vmatpush.bf16.xpose.msra.mxu0 %v306_v30  ;;  %2467 = vmatpush.bf16.xpose.msra.mxu2 %v306_v30 }
  0x3c   :  { %449 = vmatpush.bf16.xpose.msra.mxu1 %v330_v31  ;;  %2475 = vmatpush.bf16.xpose.msra.mxu3 %v330_v31 }
  0x42   :  { %2396 = vmatmul.msk.bf16.vlgmr.msra.gmra.mxu0 %vm256_vm0, %v2428_v32  ;;  %2404 = vmatmul.msk.bf16.vlgmr.msra.gmra.mxu2 %vm256_vm0, %v2436_v33 }
  0x43   :  { %2412 = vmatmul.msk.bf16.vlgmr.msra.gmra.mxu1 %vm256_vm0, %v2428_v32  ;;  %2420 = vmatmul.msk.bf16.vlgmr.msra.gmra.mxu3 %vm256_vm0, %v2436_v33  ;;  %v1636_v32 = vcvt.s32.f32 %v1572_v15  ;;  %v1780_v33 = vcvt.s32.f32 %v1716_v16 }
  0x52   :  { %2397 = vmatmul.msk.bf16.gmra.mxu0 %vm256_vm0, %v2429_v34  ;;  %2405 = vmatmul.msk.bf16.gmra.mxu2 %vm256_vm0, %v2437_v35 }
  0x53   :  { %2413 = vmatmul.msk.bf16.gmra.mxu1 %vm256_vm0, %v2429_v34  ;;  %2421 = vmatmul.msk.bf16.gmra.mxu3 %vm256_vm0, %v2437_v35  ;;  %v1637_v34 = vcvt.s32.f32 %v1573_v19  ;;  %v3043_v35 = vld [vmem:[%s5258_s4 + $0x40] sm:$0xff] }
  0x62   :  { %2398 = vmatmul.msk.bf16.gmra.mxu0 %vm256_vm0, %v2430_v36  ;;  %2406 = vmatmul.msk.bf16.gmra.mxu2 %vm256_vm0, %v2438_v37 }
  0x63   :  { %2414 = vmatmul.msk.bf16.gmra.mxu1 %vm256_vm0, %v2430_v36  ;;  %2422 = vmatmul.msk.bf16.gmra.mxu3 %vm256_vm0, %v2438_v37  ;;  %v1781_v36 = vcvt.s32.f32 %v1717_v20 }
  0x72   :  { %2399 = vmatmul.msk.bf16.gmra.mxu0 %vm256_vm0, %v2431_v38  ;;  %2407 = vmatmul.msk.bf16.gmra.mxu2 %vm256_vm0, %v2439_v39 }
  0x73   :  { %2415 = vmatmul.msk.bf16.gmra.mxu1 %vm256_vm0, %v2431_v38  ;;  %2423 = vmatmul.msk.bf16.gmra.mxu3 %vm256_vm0, %v2439_v39  ;;  %v1604_v38 = vunpack.c.0.s8 %v3030_v25  ;;  %v3049_v39 = vld [vmem:[%s5257_s3 + $0x48] sm:$0xff] }
  0x82   :  { %2400 = vmatmul.msk.bf16.gmra.mxu0 %vm256_vm0, %v2432_v40  ;;  %2408 = vmatmul.msk.bf16.gmra.mxu2 %vm256_vm0, %v2440_v41 }
  0x83   :  { %2416 = vmatmul.msk.bf16.gmra.mxu1 %vm256_vm0, %v2432_v40  ;;  %2424 = vmatmul.msk.bf16.gmra.mxu3 %vm256_vm0, %v2440_v41  ;;  %v3054_v40 = vld [vmem:[%s5258_s4 + $0x48] sm:$0xff]  ;;  %v1638_v41 = vcvt.s32.f32 %v1574_v23 }
  0x92   :  { %2401 = vmatmul.msk.bf16.gmra.mxu0 %vm256_vm0, %v2433_v42  ;;  %2409 = vmatmul.msk.bf16.gmra.mxu2 %vm256_vm0, %v2441_v43 }
  0x93   :  { %2417 = vmatmul.msk.bf16.gmra.mxu1 %vm256_vm0, %v2433_v42  ;;  %2425 = vmatmul.msk.bf16.gmra.mxu3 %vm256_vm0, %v2441_v43 }
  0xa2   :  { %2402 = vmatmul.msk.bf16.gmra.mxu0 %vm256_vm0, %v2434_v44  ;;  %2410 = vmatmul.msk.bf16.gmra.mxu2 %vm256_vm0, %v2442_v45 }
  0xa3   :  { %2418 = vmatmul.msk.bf16.gmra.mxu1 %vm256_vm0, %v2434_v44  ;;  %2426 = vmatmul.msk.bf16.gmra.mxu3 %vm256_vm0, %v2442_v45  ;;  %v1782_v44 = vcvt.s32.f32 %v1718_v27  ;;  %v1639_v45 = vcvt.s32.f32 %v1575_v28 }
  0xb2   :  { %2403 = vmatmul.msk.bf16.gmra.mxu0 %vm256_vm0, %v2435_v46  ;;  %2411 = vmatmul.msk.bf16.gmra.mxu2 %vm256_vm0, %v2443_v47 }
  0xb3   :  { %2419 = vmatmul.msk.bf16.gmra.mxu1 %vm256_vm0, %v2435_v46  ;;  %2427 = vmatmul.msk.bf16.gmra.mxu3 %vm256_vm0, %v2443_v47  ;;  %v1783_v46 = vcvt.s32.f32 %v1719_v29 }
  0xbf   :  { %v362_v49 = vpop.f32.mrf.mxu0 }
  0xc0   :  { %v2974_v50 = vmul.f32 %v2971_v48, %v362_v49  ;;  %v451_v51 = vpop.f32.mrf.mxu1 }
  0xc1   :  { %v2977_v52 = vmul.f32 %v2971_v48, %v451_v51 }
  0xc2   :  { %v660_v53 = vand.u32 2147483647, %v2974_v50 }
  0xc3   :  { %v661_v54 = vand.u32 2147483647, %v2977_v52 }
  0xc4   :  { %v724_v55 = vsub.f32 0.0, %v660_v53  ;;  %v1748_v53 = vunpack.c.0.s8 %v3043_v35 }
  0xc5   :  { %v725_v56 = vsub.f32 0.0, %v661_v54  ;;  %v402_v60 = vpop.f32.mrf.mxu2 }
  0xc6   :  { %v788_v57 = vmul.f32 1.442695, %v724_v55  ;;  %v2985_v63 = vmul.f32 %v2971_v48, %v402_v60  ;;  %v491_v2 = vpop.f32.mrf.mxu3 }
  0xc7   :  { %v790_v58 = vmul.f32 1.442695, %v725_v56  ;;  %v364_v59 = vpop.f32.mrf.mxu0  ;;  %v3019_v13 = vmul.f32 %v2971_v48, %v491_v2  ;;  %v1605_v56 = vunpack.c.0.s8 %v3049_v39 }
  0xc8   :  { %2479 = vpow2.f32 %v788_v57  ;;  %v453_v61 = vpop.f32.mrf.mxu1  ;;  %v2982_v62 = vmul.f32 %v2971_v48, %v364_v59  ;;  %v692_v12 = vand.u32 2147483647, %v2985_v63  ;;  %v1749_v57 = vunpack.c.0.s8 %v3054_v40 }
  0xc9   :  { %2481 = vpow2.f32 %v790_v58  ;;  %v2988_v0 = vmul.f32 %v2971_v48, %v453_v61  ;;  %v693_v26 = vand.u32 2147483647, %v3019_v13  ;;  %v3062_v61 = vcvt.s32.f32 %v1604_v38 }
  0xca   :  { %v662_v1 = vand.u32 2147483647, %v2982_v62  ;;  %v756_v22 = vsub.f32 0.0, %v692_v12  ;;  %v598_v29 = vmax.f32 %v2982_v62, 0.0  ;;  %v1848_v38 = vmul.f32 %v1638_v41, %v2982_v62 }
  0xcb   :  { %v663_v3 = vand.u32 2147483647, %v2988_v0  ;;  %v757_v43 = vsub.f32 0.0, %v693_v26  ;;  %v2045_v41 = vmul.f32 %v1783_v46, %v2988_v0 }
  0xcc   :  { %v726_v7 = vsub.f32 0.0, %v662_v1  ;;  %v852_v37 = vmul.f32 1.442695, %v756_v22 }
  0xcd   :  { %v727_v17 = vsub.f32 0.0, %v663_v3  ;;  %v404_v21 = vpop.f32.mrf.mxu2  ;;  %v596_v3 = vmax.f32 %v2974_v50, 0.0 }
  0xce   :  { %v2992_v4 = vpop.eup %2479  ;;  %v792_v14 = vmul.f32 1.442695, %v726_v7  ;;  %v3038_v31 = vmul.f32 %v2971_v48, %v404_v21  ;;  %v854_v7 = vmul.f32 1.442695, %v757_v43 }
  0xcf   :  { %v3004_v8 = vpop.eup %2481  ;;  %v916_v9 = vadd.f32 1.0, %v2992_v4  ;;  %v794_v24 = vmul.f32 1.442695, %v727_v17  ;;  %v919_v30 = vmul.f32 -0.5, %v2992_v4  ;;  %v922_v55 = vand.u32 2147483647, %v2992_v4 }
  0xd0   :  { %v925_v18 = vadd.f32 1.0, %v3004_v8  ;;  %v928_v51 = vmul.f32 -0.5, %v3004_v8  ;;  %v694_v54 = vand.u32 2147483647, %v3038_v31  ;;  %v931_v19 = vand.u32 2147483647, %v3004_v8 }
  0xd1   :  { %2483 = vlog2.f32 %v916_v9  ;;  %v920_v49 = vadd.f32 1.0, %v919_v30  ;;  %vm3067_vm1 = vcmp.lt.f32.partialorder %v922_v55, 0.0004427343 }
  0xd2   :  { %2485 = vpow2.f32 %v792_v14  ;;  %v1846_v14 = vmul.f32 %v1636_v32, %v2974_v50  ;;  %v929_v15 = vadd.f32 1.0, %v928_v51  ;;  %v758_v16 = vsub.f32 0.0, %v694_v54  ;;  %v367_v54 = vpop.f32.mrf.mxu0 }
  0xd3   :  { %2487 = vpow2.f32 %v794_v24  ;;  %v921_v12 = vmul.f32 %v2992_v4, %v920_v49  ;;  %v597_v4 = vmax.f32 %v2977_v52, 0.0  ;;  %v1847_v24 = vmul.f32 %v1637_v34, %v2977_v52 }
  0xd4   :  { %2489 = vlog2.f32 %v925_v18  ;;  %v2042_v18 = vmul.f32 %v1780_v33, %v2974_v50  ;;  %v930_v28 = vmul.f32 %v3004_v8, %v929_v15  ;;  %v2043_v50 = vmul.f32 %v1781_v36, %v2977_v52 }
  0xd5   :  { %2491 = vpow2.f32 %v852_v37  ;;  %v856_v30 = vmul.f32 1.442695, %v758_v16  ;;  %vm3082_vm2 = vcmp.lt.f32.partialorder %v931_v19, 0.0004427343  ;;  %v2044_v52 = vmul.f32 %v1782_v44, %v2982_v62  ;;  %v493_v62 = vpop.f32.mrf.mxu3 }
  0xd6   :  { %v599_v36 = vmax.f32 %v2988_v0, 0.0  ;;  %v1849_v51 = vmul.f32 %v1639_v45, %v2988_v0  ;;  %v3097_v45 = vmul.f32 %v2971_v48, %v367_v54 }
  0xd7   :  { %v2484_v42 = vpop.eup %2483 }
  0xd8   :  { %v2486_v47 = vpop.eup %2485  ;;  %v918_v60 = vmul.f32 0.6931472, %v2484_v42 }
  0xd9   :  { %v934_v58 = vadd.f32 1.0, %v2486_v47  ;;  %v2488_v59 = vpop.eup %2487  ;;  %v937_v1 = vmul.f32 -0.5, %v2486_v47  ;;  %v940_v26 = vand.u32 2147483647, %v2486_v47 }
  0xda   :  { %v2490_v2 = vpop.eup %2489  ;;  %v943_v9 = vadd.f32 1.0, %v2488_v59  ;;  %v946_v20 = vmul.f32 -0.5, %v2488_v59  ;;  %v924_v21 = vsel %vm3067_vm1, %v921_v12, %v918_v60  ;;  %v949_v8 = vand.u32 2147483647, %v2488_v59 }
  0xdb   :  { %2493 = vlog2.f32 %v934_v58  ;;  %v927_v22 = vmul.f32 0.6931472, %v2490_v2  ;;  %v938_v23 = vadd.f32 1.0, %v937_v1  ;;  %v3077_v27 = vpop.eup %2491  ;;  %v1492_v33 = vadd.f32 %v924_v21, %v596_v3  ;;  %v456_v1 = vpop.f32.mrf.mxu1 }
  0xdc   :  { %2495 = vlog2.f32 %v943_v9  ;;  %v947_v34 = vadd.f32 1.0, %v946_v20  ;;  %vm941_vm3 = vcmp.lt.f32.partialorder %v940_v26, 0.0004427343  ;;  %v1204_v58 = vadd.f32 1.0, %v3077_v27 }
  0xdd   :  { %2497 = vpow2.f32 %v854_v7  ;;  %v933_v42 = vsel %vm3082_vm2, %v930_v28, %v927_v22  ;;  %v939_v49 = vmul.f32 %v2486_v47, %v938_v23  ;;  %v1910_v44 = vsub.f32 %v1492_v33, %v1846_v14 }
  0xde   :  { %2499 = vpow2.f32 %v856_v30  ;;  %v1493_v47 = vadd.f32 %v933_v42, %v597_v4  ;;  %v948_v9 = vmul.f32 %v2488_v59, %v947_v34  ;;  %v2106_v12 = vsub.f32 %v1492_v33, %v2042_v18 }
  0xdf   :  { %vm950_vm4 = vcmp.lt.f32.partialorder %v949_v8, 0.0004427343  ;;  %v3100_v0 = vmul.f32 %v2971_v48, %v456_v1  ;;  %v3104_v20 = vmul.f32 %v2971_v48, %v493_v62  ;;  %v664_v59 = vand.u32 2147483647, %v3097_v45 }
  0xe0   :  { %v1911_v14 = vsub.f32 %v1493_v47, %v1847_v24  ;;  %2501 = vlog2.f32 %v1204_v58  ;;  %v2107_v23 = vsub.f32 %v1493_v47, %v2043_v50  ;;  %v1576_v30 = vunpack.c.2.s8 %v2997_v5 }
  0xe1   :  { %v2494_v32 = vpop.eup %2493  ;;  %v728_v28 = vsub.f32 0.0, %v664_v59  ;;  %v665_v33 = vand.u32 2147483647, %v3100_v0  ;;  %v1812_v24 = vcvt.s32.f32 %v1748_v53  ;;  %v1669_v50 = vcvt.s32.f32 %v1605_v56 }
  0xe2   :  { %v936_v43 = vmul.f32 0.6931472, %v2494_v32  ;;  %v2496_v55 = vpop.eup %2495  ;;  %v1720_v32 = vunpack.c.2.s8 %v3002_v6  ;;  %v1606_v42 = vunpack.c.1.s8 %v3030_v25  ;;  %v1750_v8 = vunpack.c.1.s8 %v3043_v35 }
  0xe3   :  { %v3094_v2 = vpop.eup %2497  ;;  %v945_v7 = vmul.f32 0.6931472, %v2496_v55  ;;  %v796_v34 = vmul.f32 1.442695, %v728_v28  ;;  %v3131_v54 = vcvt.s32.f32 %v1576_v30  ;;  %v628_v56 = vmax.f32 %v2985_v63, 0.0 }
  0xe4   :  { %v942_v60 = vsel %vm941_vm3, %v939_v49, %v936_v43  ;;  %v1213_v46 = vadd.f32 1.0, %v3094_v2  ;;  %v3111_v22 = vpop.eup %2499  ;;  %v695_v43 = vand.u32 2147483647, %v3104_v20  ;;  %v1216_v49 = vmul.f32 -0.5, %v3094_v2 }
  0xe5   :  { %v1494_v3 = vadd.f32 %v942_v60, %v598_v29  ;;  %v951_v17 = vsel %vm950_vm4, %v948_v9, %v945_v7  ;;  %v1207_v29 = vmul.f32 -0.5, %v3077_v27  ;;  %v3133_v55 = vcvt.s32.f32 %v1720_v32 }
  0xe6   :  { %v1495_v19 = vadd.f32 %v951_v17, %v599_v36  ;;  %2503 = vlog2.f32 %v1213_v46  ;;  %v2502_v53 = vpop.eup %2501  ;;  %v1210_v58 = vand.u32 2147483647, %v3077_v27  ;;  %v1222_v60 = vadd.f32 1.0, %v3111_v22 }
  0xe7   :  { %v1912_v15 = vsub.f32 %v1494_v3, %v1848_v38  ;;  %v2108_v16 = vsub.f32 %v1494_v3, %v2044_v52  ;;  %2505 = vpow2.f32 %v796_v34  ;;  %v729_v52 = vsub.f32 0.0, %v665_v33  ;;  %v496_v33 = vpop.f32.mrf.mxu3 }
  0xe8   :  { %v1913_v4 = vsub.f32 %v1495_v19, %v1849_v51  ;;  %v2109_v26 = vsub.f32 %v1495_v19, %v2045_v41  ;;  %v1208_v36 = vadd.f32 1.0, %v1207_v29  ;;  %v1813_v51 = vcvt.s32.f32 %v1749_v57 }
  0xe9   :  { %v3107_v18 = vadd.f32 %v1912_v15, %v1910_v44  ;;  %v3109_v21 = vadd.f32 %v2108_v16, %v2106_v12  ;;  %v798_v41 = vmul.f32 1.442695, %v729_v52  ;;  %v3140_v1 = vmul.f32 %v3062_v61, %v2985_v63 }
  0xea   :  { %v3119_v37 = vadd.f32 %v1913_v4, %v1911_v14  ;;  %v3121_v38 = vadd.f32 %v2109_v26, %v2107_v23  ;;  %v3143_v47 = vmul.f32 %v1812_v24, %v2985_v63  ;;  %v1670_v3 = vcvt.s32.f32 %v1606_v42  ;;  %v407_v4 = vpop.f32.mrf.mxu2  ;;  %v369_v26 = vpop.f32.mrf.mxu0 }
  0xeb   :  { %v759_v57 = vsub.f32 0.0, %v695_v43  ;;  %v629_v7 = vmax.f32 %v3019_v13, 0.0  ;;  %v1217_v9 = vadd.f32 1.0, %v1216_v49  ;;  %v1814_v62 = vcvt.s32.f32 %v1750_v8 }
  0xec   :  { %2507 = vpow2.f32 %v798_v41  ;;  %v2504_v44 = vpop.eup %2503  ;;  %v1206_v12 = vmul.f32 0.6931472, %v2502_v53  ;;  %v1209_v15 = vmul.f32 %v3077_v27, %v1208_v36  ;;  %v1219_v16 = vand.u32 2147483647, %v3094_v2 }
  0xed   :  { %v3149_v17 = vmul.f32 %v1669_v50, %v3019_v13  ;;  %v2506_v61 = vpop.eup %2505  ;;  %vm3151_vm5 = vcmp.lt.f32.partialorder %v1210_v58, 0.0004427343  ;;  %v3156_v46 = vmul.f32 %v1813_v51, %v3019_v13  ;;  %2509 = vlog2.f32 %v1222_v60 }
  0xee   :  { %v1225_v19 = vmul.f32 -0.5, %v3111_v22  ;;  %v630_v59 = vmax.f32 %v3038_v31, 0.0  ;;  %v3161_v27 = vmul.f32 %v1670_v3, %v3038_v31  ;;  %v858_v14 = vmul.f32 1.442695, %v759_v57 }
  0xef   :  { %5361 = vst [vmem:[#allocation10_spill] sm:$0xff] %v3149_v17  ;;  %v952_v23 = vadd.f32 1.0, %v2506_v61  ;;  %v3163_v28 = vmul.f32 0.6931472, %v2504_v44  ;;  %v3166_v29 = vmul.f32 %v3094_v2, %v1217_v9  ;;  %v3169_v30 = vmul.f32 %v1814_v62, %v3038_v31 }
  0xf0   :  { %5364 = vst [vmem:[#allocation11_spill] sm:$0xff] %v3156_v46  ;;  %v955_v32 = vmul.f32 -0.5, %v2506_v61  ;;  %v1212_v24 = vsel %vm3151_vm5, %v1209_v15, %v1206_v12  ;;  %vm3173_vm6 = vcmp.lt.f32.partialorder %v1219_v16, 0.0004427343  ;;  %v1228_v50 = vand.u32 2147483647, %v3111_v22 }
  0xf1   :  { %5365 = vst [vmem:[#allocation12_spill] sm:$0xff] %v3169_v30  ;;  %2511 = vlog2.f32 %v952_v23  ;;  %v1226_v43 = vadd.f32 1.0, %v1225_v19  ;;  %v1607_v2 = vunpack.c.1.s8 %v3049_v39  ;;  %v3180_v49 = vmul.f32 %v2971_v48, %v407_v4 }
  0xf2   :  { %v2508_v42 = vpop.eup %2507  ;;  %v3183_v8 = vmul.f32 %v2971_v48, %v369_v26  ;;  %2513 = vpow2.f32 %v858_v14  ;;  %v1751_v52 = vunpack.c.1.s8 %v3054_v40  ;;  %v3187_v36 = vmul.f32 %v2971_v48, %v496_v33 }
  0xf3   :  { %v961_v53 = vadd.f32 1.0, %v2508_v42  ;;  %v2510_v51 = vpop.eup %2509  ;;  %v3189_v58 = vadd.f32 %v1212_v24, %v628_v56  ;;  %v1221_v60 = vsel %vm3173_vm6, %v3166_v29, %v3163_v28  ;;  %v956_v41 = vadd.f32 1.0, %v955_v32 }
  0xf4   :  { %v964_v3 = vmul.f32 -0.5, %v2508_v42  ;;  %vm3195_vm7 = vcmp.lt.f32.partialorder %v1228_v50, 0.0004427343  ;;  %v958_v9 = vand.u32 2147483647, %v2506_v61  ;;  %v1577_v62 = vunpack.c.2.s8 %v3010_v10 }
  0xf5   :  { %2515 = vlog2.f32 %v961_v53  ;;  %v1227_v44 = vmul.f32 %v3111_v22, %v1226_v43  ;;  %v1721_v56 = vunpack.c.2.s8 %v3015_v11  ;;  %v696_v12 = vand.u32 2147483647, %v3180_v49  ;;  %v458_v22 = vpop.f32.mrf.mxu1 }
  0xf6   :  { %v666_v15 = vand.u32 2147483647, %v3183_v8  ;;  %v1224_v63 = vmul.f32 0.6931472, %v2510_v51  ;;  %v600_v19 = vmax.f32 %v3097_v45, 0.0  ;;  %v1850_v14 = vmul.f32 %v3131_v54, %v3097_v45 }
  0xf7   :  { %v2512_v16 = vpop.eup %2511  ;;  %v697_v23 = vand.u32 2147483647, %v3187_v36  ;;  %v957_v26 = vmul.f32 %v2506_v61, %v956_v41  ;;  %v965_v28 = vadd.f32 1.0, %v964_v3  ;;  %vm959_vm8 = vcmp.lt.f32.partialorder %v958_v9, 0.0004427343 }
  0xf8   :  { %v954_v4 = vmul.f32 0.6931472, %v2512_v16  ;;  %v730_v29 = vsub.f32 0.0, %v666_v15  ;;  %v3208_v32 = vpop.eup %2513  ;;  %v2046_v33 = vmul.f32 %v3133_v55, %v3097_v45  ;;  %v967_v24 = vand.u32 2147483647, %v2508_v42 }
  0xf9   :  { %v1641_v34 = vcvt.s32.f32 %v1577_v62  ;;  %v1785_v43 = vcvt.s32.f32 %v1721_v56  ;;  %v760_v53 = vsub.f32 0.0, %v696_v12  ;;  %v1230_v16 = vsel %vm3195_vm7, %v1227_v44, %v1224_v63 }
  0xfa   :  { %v960_v50 = vsel %vm959_vm8, %v957_v26, %v954_v4  ;;  %v800_v51 = vmul.f32 1.442695, %v730_v29  ;;  %v601_v41 = vmax.f32 %v3100_v0, 0.0  ;;  %v3216_v3 = vmul.f32 %v2971_v48, %v458_v22 }
  0xfb   :  { %v2516_v54 = vpop.eup %2515  ;;  %v1496_v61 = vadd.f32 %v960_v50, %v600_v19  ;;  %v1231_v9 = vadd.f32 1.0, %v3208_v32  ;;  %v966_v45 = vmul.f32 %v2508_v42, %v965_v28  ;;  %v761_v55 = vsub.f32 0.0, %v697_v23 }
  0xfc   :  { %v963_v15 = vmul.f32 0.6931472, %v2516_v54  ;;  %vm968_vm9 = vcmp.lt.f32.partialorder %v967_v24, 0.0004427343  ;;  %2517 = vpow2.f32 %v800_v51  ;;  %v1851_v12 = vmul.f32 %v1641_v34, %v3100_v0 }
  0xfd   :  { %v1914_v62 = vsub.f32 %v1496_v61, %v1850_v14  ;;  %v2110_v4 = vsub.f32 %v1496_v61, %v2046_v33  ;;  %v2047_v57 = vmul.f32 %v1785_v43, %v3100_v0  ;;  %v860_v44 = vmul.f32 1.442695, %v760_v53 }
  0xfe   :  { %v969_v56 = vsel %vm968_vm9, %v966_v45, %v963_v15  ;;  %v667_v42 = vand.u32 2147483647, %v3216_v3  ;;  %v3230_v14 = vadd.f32 %v1221_v60, %v629_v7  ;;  %v1234_v28 = vmul.f32 -0.5, %v3208_v32 }
  0xff   :  { %v3222_v63 = vadd.f32 %v3107_v18, %v1914_v62  ;;  %v3225_v19 = vadd.f32 %v3109_v21, %v2110_v4  ;;  %v1497_v26 = vadd.f32 %v969_v56, %v601_v41  ;;  %v862_v29 = vmul.f32 1.442695, %v761_v55  ;;  %v372_v56 = vpop.f32.mrf.mxu0 }
 0x100   :  { %5370 = vst [vmem:[#allocation13_spill] sm:$0xff] %v3230_v14  ;;  %v731_v33 = vsub.f32 0.0, %v667_v42  ;;  %v3238_v21 = vadd.f32 %v1230_v16, %v630_v59  ;;  %2519 = vlog2.f32 %v1231_v9  ;;  %v1671_v13 = vcvt.s32.f32 %v1607_v2 }
 0x101   :  { %v1915_v18 = vsub.f32 %v1497_v26, %v1851_v12  ;;  %v2111_v22 = vsub.f32 %v1497_v26, %v2047_v57  ;;  %v1815_v7 = vcvt.s32.f32 %v1751_v52  ;;  %2521 = vpow2.f32 %v860_v44 }
 0x102   :  { %v2518_v60 = vpop.eup %2517  ;;  %v802_v50 = vmul.f32 1.442695, %v731_v33  ;;  %v1235_v59 = vadd.f32 1.0, %v1234_v28  ;;  %2523 = vpow2.f32 %v862_v29  ;;  %v1608_v52 = vunpack.c.2.s8 %v3030_v25 }
 0x103   :  { %v3245_v24 = vadd.f32 %v3119_v37, %v1915_v18  ;;  %v3248_v34 = vadd.f32 %v3121_v38, %v2111_v22  ;;  %v970_v43 = vadd.f32 1.0, %v2518_v60  ;;  %v973_v53 = vmul.f32 -0.5, %v2518_v60  ;;  %v409_v37 = vpop.f32.mrf.mxu2 }
 0x104   :  { %2525 = vpow2.f32 %v802_v50  ;;  %v3258_v51 = vmul.f32 %v1671_v13, %v3104_v20  ;;  %v1752_v54 = vunpack.c.2.s8 %v3043_v35  ;;  %v1237_v61 = vand.u32 2147483647, %v3208_v32 }
 0x105   :  { %2527 = vlog2.f32 %v970_v43  ;;  %v3265_v41 = vmul.f32 %v1815_v7, %v3104_v20  ;;  %v1578_v9 = vunpack.c.3.s8 %v2997_v5  ;;  %v3271_v55 = vmul.f32 %v3208_v32, %v1235_v59  ;;  %v498_v7 = vpop.f32.mrf.mxu3  ;;  %v461_v32 = vpop.f32.mrf.mxu1 }
 0x106   :  { %5371 = vst [vmem:[#allocation14_spill] sm:$0xff] %v3258_v51  ;;  %v2520_v15 = vpop.eup %2519  ;;  %v1722_v62 = vunpack.c.3.s8 %v3002_v6  ;;  %v3275_v4 = vmul.f32 %v2971_v48, %v409_v37  ;;  %v3280_v44 = vcvt.s32.f32 %v1608_v52  ;;  %v1609_v5 = vunpack.c.2.s8 %v3049_v39 }
 0x107   :  { %5372 = vst [vmem:[#allocation15_spill] sm:$0xff] %v3265_v41  ;;  %v3277_v12 = vpop.eup %2521  ;;  %v974_v26 = vadd.f32 1.0, %v973_v53  ;;  %v3285_v28 = vcvt.s32.f32 %v1752_v54  ;;  %v976_v29 = vand.u32 2147483647, %v2518_v60  ;;  %v3289_v22 = vmul.f32 0.6931472, %v2520_v15 }
 0x108   :  { %v3283_v42 = vpop.eup %2523  ;;  %v602_v33 = vmax.f32 %v3183_v8, 0.0  ;;  %v1642_v13 = vcvt.s32.f32 %v1578_v9  ;;  %v3293_v50 = vmul.f32 %v2971_v48, %v372_v56  ;;  %v1240_v43 = vadd.f32 1.0, %v3277_v12 }
 0x109   :  { %v1786_v52 = vcvt.s32.f32 %v1722_v62  ;;  %v698_v37 = vand.u32 2147483647, %v3275_v4  ;;  %v1243_v54 = vmul.f32 -0.5, %v3277_v12  ;;  %v975_v2 = vmul.f32 %v2518_v60, %v974_v26 }
 0x10a   :  { %v2526_v18 = vpop.eup %2525  ;;  %vm3298_vm10 = vcmp.lt.f32.partialorder %v1237_v61, 0.0004427343  ;;  %vm977_vm11 = vcmp.lt.f32.partialorder %v976_v29, 0.0004427343  ;;  %v1579_v9 = vunpack.c.3.s8 %v3010_v10  ;;  %v3304_v56 = vmul.f32 %v2971_v48, %v498_v7 }
 0x10b   :  { %v2528_v59 = vpop.eup %2527  ;;  %v979_v53 = vadd.f32 1.0, %v2526_v18  ;;  %v982_v15 = vmul.f32 -0.5, %v2526_v18  ;;  %v1249_v62 = vadd.f32 1.0, %v3283_v42  ;;  %v1723_v31 = vunpack.c.3.s8 %v3015_v11 }
 0x10c   :  { %v972_v38 = vmul.f32 0.6931472, %v2528_v59  ;;  %v668_v59 = vand.u32 2147483647, %v3293_v50  ;;  %v1852_v61 = vmul.f32 %v1642_v13, %v3183_v8  ;;  %v2048_v26 = vmul.f32 %v1786_v52, %v3183_v8 }
 0x10d   :  { %2529 = vlog2.f32 %v979_v53  ;;  %v762_v0 = vsub.f32 0.0, %v698_v37  ;;  %v1244_v29 = vadd.f32 1.0, %v1243_v54  ;;  %v983_v53 = vadd.f32 1.0, %v982_v15  ;;  %v463_v46 = vpop.f32.mrf.mxu1 }
 0x10e   :  { %v978_v16 = vsel %vm977_vm11, %v975_v2, %v972_v38  ;;  %2531 = vlog2.f32 %v1240_v43  ;;  %v732_v10 = vsub.f32 0.0, %v668_v59  ;;  %v985_v23 = vand.u32 2147483647, %v2526_v18 }
 0x10f   :  { %v1498_v60 = vadd.f32 %v978_v16, %v602_v33  ;;  %v699_v2 = vand.u32 2147483647, %v3304_v56  ;;  %2533 = vlog2.f32 %v1249_v62  ;;  %v1643_v11 = vcvt.s32.f32 %v1579_v9 }
 0x110   :  { %v1787_v38 = vcvt.s32.f32 %v1723_v31  ;;  %v804_v6 = vmul.f32 1.442695, %v732_v10  ;;  %v864_v13 = vmul.f32 1.442695, %v762_v0  ;;  %v3319_v43 = vmul.f32 %v2971_v48, %v461_v32 }
 0x111   :  { %v1916_v7 = vsub.f32 %v1498_v60, %v1852_v61  ;;  %v2112_v57 = vsub.f32 %v1498_v60, %v2048_v26  ;;  %v1252_v52 = vmul.f32 -0.5, %v3283_v42  ;;  %v984_v54 = vmul.f32 %v2526_v18, %v983_v53 }
 0x112   :  { %2535 = vpow2.f32 %v804_v6  ;;  %v603_v15 = vmax.f32 %v3216_v3, 0.0  ;;  %vm986_vm12 = vcmp.lt.f32.partialorder %v985_v23, 0.0004427343  ;;  %v763_v31 = vsub.f32 0.0, %v699_v2 }
 0x113   :  { %v2530_v16 = vpop.eup %2529  ;;  %v3313_v33 = vadd.f32 %v3222_v63, %v1916_v7  ;;  %v3316_v8 = vadd.f32 %v3225_v19, %v2112_v57  ;;  %v669_v9 = vand.u32 2147483647, %v3319_v43  ;;  %v1246_v62 = vand.u32 2147483647, %v3277_v12 }
 0x114   :  { %v981_v37 = vmul.f32 0.6931472, %v2530_v16  ;;  %v2532_v63 = vpop.eup %2531  ;;  %v3327_v19 = vmul.f32 %v3280_v44, %v3180_v49  ;;  %v1673_v0 = vcvt.s32.f32 %v1609_v5  ;;  %v1853_v6 = vmul.f32 %v1643_v11, %v3216_v3 }
 0x115   :  { %v2049_v18 = vmul.f32 %v1787_v38, %v3216_v3  ;;  %2537 = vpow2.f32 %v864_v13  ;;  %v2534_v23 = vpop.eup %2533  ;;  %v1239_v59 = vsel %vm3298_vm10, %v3271_v55, %v3289_v22  ;;  %v1245_v60 = vmul.f32 %v3277_v12, %v1244_v29 }
 0x116   :  { %5375 = vst [vmem:[#allocation16_spill] sm:$0xff] %v3327_v19  ;;  %v987_v57 = vsel %vm986_vm12, %v984_v54, %v981_v37  ;;  %v1253_v44 = vadd.f32 1.0, %v1252_v52  ;;  %v733_v61 = vsub.f32 0.0, %v669_v9  ;;  %v1242_v26 = vmul.f32 0.6931472, %v2532_v63  ;;  %v501_v63 = vpop.f32.mrf.mxu3 }
 0x117   :  { %v1499_v32 = vadd.f32 %v987_v57, %v603_v15  ;;  %v866_v10 = vmul.f32 1.442695, %v763_v31  ;;  %vm3338_vm13 = vcmp.lt.f32.partialorder %v1246_v62, 0.0004427343  ;;  %v1255_v3 = vand.u32 2147483647, %v3283_v42 }
 0x118   :  { %v2536_v7 = vpop.eup %2535  ;;  %v5378_v11 = vunpack.c.2.s8 %v3054_v40  ;;  %v806_v45 = vmul.f32 1.442695, %v733_v61  ;;  %v5379_v55 = vmax.f32 %v3104_v20, 0.0  ;;  %v3351_v22 = vmul.f32 %v3285_v28, %v3180_v49  ;;  %v3366_v20 = vld [vmem:[%s5257_s3 + $0x10] sm:$0xff]  ;;  %v412_v28 = vpop.f32.mrf.mxu2 }
 0x119   :  { %v1917_v53 = vsub.f32 %v1499_v32, %v1853_v6  ;;  %v2113_v5 = vsub.f32 %v1499_v32, %v2049_v18  ;;  %v3360_v13 = vmul.f32 %v3283_v42, %v1253_v44  ;;  %v1610_v52 = vunpack.c.3.s8 %v3030_v25  ;;  %v3377_v25 = vld [vmem:[%s5258_s4 + $0x10] sm:$0xff] }
 0x11a   :  { %v1817_v38 = vcvt.s32.f32 %v5378_v11  ;;  %v3347_v12 = vadd.f32 %v1239_v59, %v5379_v55  ;;  %5381 = vst [vmem:[#allocation18_spill] sm:$0xff] %v3351_v22  ;;  %v988_v37 = vadd.f32 1.0, %v2536_v7  ;;  %2539 = vpow2.f32 %v806_v45 }
 0x11b   :  { %v3354_v29 = vadd.f32 %v3245_v24, %v1917_v53  ;;  %v3357_v16 = vadd.f32 %v3248_v34, %v2113_v5  ;;  %v3368_v54 = vpop.eup %2537  ;;  %v1248_v24 = vsel %vm3338_vm13, %v1245_v60, %v1242_v26  ;;  %v3372_v34 = vmul.f32 0.6931472, %v2534_v23  ;;  %v374_v5 = vpop.f32.mrf.mxu0 }
 0x11c   :  { %5380 = vst [vmem:[#allocation17_spill] sm:$0xff] %v3347_v12  ;;  %2541 = vpow2.f32 %v866_v10  ;;  %v991_v42 = vmul.f32 -0.5, %v2536_v7  ;;  %vm3379_vm14 = vcmp.lt.f32.partialorder %v1255_v3, 0.0004427343  ;;  %v3384_v31 = vmul.f32 %v1673_v0, %v3187_v36 }
 0x11d   :  { %v3387_v9 = vmul.f32 %v1817_v38, %v3187_v36  ;;  %2543 = vlog2.f32 %v988_v37  ;;  %v1580_v32 = vunpack.c.0.s8 %v3366_v20  ;;  %v3395_v6 = vmul.f32 %v2971_v48, %v412_v28  ;;  %v3426_v28 = vld [vmem:[%s5258_s4 + $0x18] sm:$0xff] }
 0x11e   :  { %5384 = vst [vmem:[#allocation19_spill] sm:$0xff] %v3384_v31  ;;  %v5386_v18 = vmax.f32 %v3180_v49, 0.0  ;;  %v1258_v59 = vadd.f32 1.0, %v3368_v54  ;;  %v1724_v60 = vunpack.c.0.s8 %v3377_v25  ;;  %v3408_v61 = vcvt.s32.f32 %v1610_v52  ;;  %v3413_v49 = vld [vmem:[%s5257_s3 + $0x18] sm:$0xff] }
 0x11f   :  { %5385 = vst [vmem:[#allocation20_spill] sm:$0xff] %v3387_v9  ;;  %v992_v26 = vadd.f32 1.0, %v991_v42  ;;  %v3416_v53 = vmul.f32 %v2971_v48, %v501_v63  ;;  %v1261_v2 = vmul.f32 -0.5, %v3368_v54  ;;  %v1264_v3 = vand.u32 2147483647, %v3368_v54 }
 0x120   :  { %v3399_v0 = vadd.f32 %v1248_v24, %v5386_v18  ;;  %v2540_v10 = vpop.eup %2539  ;;  %v994_v38 = vand.u32 2147483647, %v2536_v7  ;;  %v1644_v55 = vcvt.s32.f32 %v1580_v32  ;;  %v700_v24 = vand.u32 2147483647, %v3395_v6 }
 0x121   :  { %v997_v52 = vadd.f32 1.0, %v2540_v10  ;;  %v1000_v37 = vmul.f32 -0.5, %v2540_v10  ;;  %2545 = vlog2.f32 %v1258_v59  ;;  %v1788_v63 = vcvt.s32.f32 %v1724_v60 }
 0x122   :  { %v3421_v45 = vpop.eup %2541  ;;  %v1581_v18 = vunpack.c.0.s8 %v3413_v49  ;;  %v3431_v57 = vmul.f32 %v2971_v48, %v374_v5  ;;  %v993_v23 = vmul.f32 %v2536_v7, %v992_v26  ;;  %v701_v32 = vand.u32 2147483647, %v3416_v53 }
 0x123   :  { %v2544_v42 = vpop.eup %2543  ;;  %2547 = vlog2.f32 %v997_v52  ;;  %v1262_v11 = vadd.f32 1.0, %v1261_v2  ;;  %v604_v44 = vmax.f32 %v3293_v50, 0.0  ;;  %vm995_vm15 = vcmp.lt.f32.partialorder %v994_v38, 0.0004427343  ;;  %v414_v2 = vpop.f32.mrf.mxu2 }
 0x124   :  { %v990_v62 = vmul.f32 0.6931472, %v2544_v42  ;;  %v1725_v41 = vunpack.c.0.s8 %v3426_v28  ;;  %v1267_v51 = vadd.f32 1.0, %v3421_v45  ;;  %v1001_v60 = vadd.f32 1.0, %v1000_v37 }
 0x125   :  { %v764_v12 = vsub.f32 0.0, %v700_v24  ;;  %v1854_v5 = vmul.f32 %v1644_v55, %v3293_v50  ;;  %v2050_v7 = vmul.f32 %v1788_v63, %v3293_v50  ;;  %v670_v26 = vand.u32 2147483647, %v3431_v57 }
 0x126   :  { %v996_v59 = vsel %vm995_vm15, %v993_v23, %v990_v62  ;;  %vm3440_vm0 = vcmp.lt.f32.partialorder %v1264_v3, 0.0004427343  ;;  %v1003_v38 = vand.u32 2147483647, %v2540_v10  ;;  %v1645_v52 = vcvt.s32.f32 %v1581_v18 }
 0x127   :  { %v1500_v17 = vadd.f32 %v996_v59, %v604_v44  ;;  %v765_v42 = vsub.f32 0.0, %v701_v32  ;;  %v2546_v14 = vpop.eup %2545  ;;  %v1270_v62 = vmul.f32 -0.5, %v3421_v45  ;;  %v3446_v44 = vmul.f32 %v2971_v48, %v463_v46 }
 0x128   :  { %2549 = vlog2.f32 %v1267_v51  ;;  %v1002_v50 = vmul.f32 %v2540_v10, %v1001_v60  ;;  %v1789_v24 = vcvt.s32.f32 %v1725_v41  ;;  %v868_v63 = vmul.f32 1.442695, %v764_v12 }
 0x129   :  { %v1918_v23 = vsub.f32 %v1500_v17, %v1854_v5  ;;  %v2114_v37 = vsub.f32 %v1500_v17, %v2050_v7  ;;  %v2548_v55 = vpop.eup %2547  ;;  %v734_v32 = vsub.f32 0.0, %v670_v26  ;;  %v1611_v30 = vunpack.c.3.s8 %v3049_v39 }
 0x12a   :  { %v999_v18 = vmul.f32 0.6931472, %v2548_v55  ;;  %v605_v17 = vmax.f32 %v3319_v43, 0.0  ;;  %vm1004_vm1 = vcmp.lt.f32.partialorder %v1003_v38, 0.0004427343  ;;  %v1263_v51 = vmul.f32 %v3368_v54, %v1262_v11 }
 0x12b   :  { %v3449_v3 = vadd.f32 %v3313_v33, %v1918_v23  ;;  %v3452_v59 = vadd.f32 %v3316_v8, %v2114_v37  ;;  %v870_v46 = vmul.f32 1.442695, %v765_v42  ;;  %v1260_v5 = vmul.f32 0.6931472, %v2546_v14  ;;  %v3467_v42 = vld [vmem:[%s5257_s3 + $0x50] sm:$0xff] }
 0x12c   :  { %v1005_v10 = vsel %vm1004_vm1, %v1002_v50, %v999_v18  ;;  %v671_v41 = vand.u32 2147483647, %v3446_v44  ;;  %v1855_v33 = vmul.f32 %v1645_v52, %v3319_v43  ;;  %v2051_v8 = vmul.f32 %v1789_v24, %v3319_v43  ;;  %v3485_v37 = vld [vmem:[%s5258_s4 + $0x50] sm:$0xff] }
 0x12d   :  { %v1501_v12 = vadd.f32 %v1005_v10, %v605_v17  ;;  %2551 = vpow2.f32 %v868_v63  ;;  %v1271_v39 = vadd.f32 1.0, %v1270_v62  ;;  %v1755_v7 = vunpack.c.3.s8 %v3054_v40 }
 0x12e   :  { %v808_v26 = vmul.f32 1.442695, %v734_v32  ;;  %v2550_v38 = vpop.eup %2549  ;;  %v1273_v14 = vand.u32 2147483647, %v3421_v45  ;;  %2553 = vpow2.f32 %v870_v46  ;;  %v5389_v52 = vmax.f32 %v3187_v36, 0.0 }
 0x12f   :  { %v1919_v54 = vsub.f32 %v1501_v12, %v1855_v33  ;;  %v2115_v11 = vsub.f32 %v1501_v12, %v2051_v8  ;;  %v5390_v40 = vsel %vm3379_vm14, %v3360_v13, %v3372_v34  ;;  %v1266_v23 = vsel %vm3440_vm0, %v1263_v51, %v1260_v5  ;;  %v3498_v34 = vld [vmem:[%s5257_s3 + $0x58] sm:$0xff] }
 0x130   :  { %v3478_v62 = vadd.f32 %v5390_v40, %v5389_v52  ;;  %v735_v55 = vsub.f32 0.0, %v671_v41  ;;  %v5392_v50 = vunpack.c.3.s8 %v3043_v35  ;;  %v1675_v36 = vcvt.s32.f32 %v1611_v30  ;;  %v503_v40 = vpop.f32.mrf.mxu3 }
 0x131   :  { %v3490_v15 = vadd.f32 %v3354_v29, %v1919_v54  ;;  %v3493_v13 = vadd.f32 %v3357_v16, %v2115_v11  ;;  %v1269_v63 = vmul.f32 0.6931472, %v2550_v38  ;;  %v1272_v18 = vmul.f32 %v3421_v45, %v1271_v39  ;;  %v3516_v45 = vld [vmem:[%s5258_s4 + $0x58] sm:$0xff]  ;;  %v377_v16 = vpop.f32.mrf.mxu0 }
 0x132   :  { %5391 = vst [vmem:[#allocation21_spill] sm:$0xff] %v3478_v62  ;;  %v1818_v24 = vcvt.s32.f32 %v5392_v50  ;;  %v1612_v32 = vunpack.c.0.s8 %v3467_v42  ;;  %2555 = vpow2.f32 %v808_v26  ;;  %v5393_v30 = vmax.f32 %v3275_v4, 0.0 }
 0x133   :  { %v3502_v35 = vpop.eup %2551  ;;  %vm3508_vm2 = vcmp.lt.f32.partialorder %v1273_v14, 0.0004427343  ;;  %v1819_v17 = vcvt.s32.f32 %v1755_v7  ;;  %v1756_v46 = vunpack.c.0.s8 %v3485_v37  ;;  %v3520_v5 = vmul.f32 %v3408_v61, %v3275_v4 }
 0x134   :  { %v3506_v29 = vadd.f32 %v1266_v23, %v5393_v30  ;;  %v1613_v51 = vunpack.c.0.s8 %v3498_v34  ;;  %v810_v10 = vmul.f32 1.442695, %v735_v55  ;;  %v3524_v41 = vmul.f32 %v2971_v48, %v414_v2  ;;  %v3526_v12 = vpop.eup %2553 }
 0x135   :  { %5397 = vst [vmem:[#allocation23_spill] sm:$0xff] %v3520_v5  ;;  %v3533_v39 = vmul.f32 %v1818_v24, %v3275_v4  ;;  %v635_v61 = vmax.f32 %v3304_v56, 0.0  ;;  %v1275_v7 = vsel %vm3508_vm2, %v1272_v18, %v1269_v63  ;;  %v1276_v26 = vadd.f32 1.0, %v3502_v35 }
 0x136   :  { %5394 = vst [vmem:[#allocation22_spill] sm:$0xff] %v3506_v29  ;;  %v1676_v38 = vcvt.s32.f32 %v1612_v32  ;;  %v1757_v14 = vunpack.c.0.s8 %v3516_v45  ;;  %v3543_v11 = vmul.f32 %v1675_v36, %v3304_v56  ;;  %v3546_v52 = vmul.f32 %v1819_v17, %v3304_v56 }
 0x137   :  { %5398 = vst [vmem:[#allocation24_spill] sm:$0xff] %v3533_v39  ;;  %v1820_v4 = vcvt.s32.f32 %v1756_v46  ;;  %v1285_v55 = vadd.f32 1.0, %v3526_v12  ;;  %v1677_v50 = vcvt.s32.f32 %v1613_v51  ;;  %2557 = vpow2.f32 %v810_v10 }
 0x138   :  { %5399 = vst [vmem:[#allocation25_spill] sm:$0xff] %v3543_v11  ;;  %v3548_v23 = vpop.eup %2555  ;;  %v702_v24 = vand.u32 2147483647, %v3524_v41  ;;  %v3554_v63 = vadd.f32 %v1275_v7, %v635_v61  ;;  %v1582_v56 = vunpack.c.1.s8 %v3366_v20  ;;  %2559 = vlog2.f32 %v1276_v26 }
 0x139   :  { %5400 = vst [vmem:[#allocation26_spill] sm:$0xff] %v3546_v52  ;;  %v3559_v18 = vmul.f32 %v1676_v38, %v3395_v6  ;;  %v1821_v32 = vcvt.s32.f32 %v1757_v14  ;;  %v3562_v30 = vmul.f32 %v2971_v48, %v503_v40  ;;  %v1279_v17 = vmul.f32 -0.5, %v3502_v35 }
 0x13a   :  { %5401 = vst [vmem:[#allocation27_spill] sm:$0xff] %v3554_v63  ;;  %v3566_v46 = vmul.f32 %v1820_v4, %v3395_v6  ;;  %v1006_v10 = vadd.f32 1.0, %v3548_v23  ;;  %2561 = vlog2.f32 %v1285_v55  ;;  %v1288_v61 = vmul.f32 -0.5, %v3526_v12 }
 0x13b   :  { %5402 = vst [vmem:[#allocation28_spill] sm:$0xff] %v3559_v18  ;;  %v3572_v7 = vmul.f32 %v1677_v50, %v3416_v53  ;;  %v766_v26 = vsub.f32 0.0, %v702_v24  ;;  %v1646_v14 = vcvt.s32.f32 %v1582_v56  ;;  %v1726_v40 = vunpack.c.1.s8 %v3377_v25 }
 0x13c   :  { %5403 = vst [vmem:[#allocation29_spill] sm:$0xff] %v3566_v46  ;;  %v3578_v4 = vmul.f32 %v2971_v48, %v377_v16  ;;  %v1282_v33 = vand.u32 2147483647, %v3502_v35  ;;  %v3586_v50 = vmul.f32 %v1821_v32, %v3416_v53  ;;  %v703_v24 = vand.u32 2147483647, %v3562_v30  ;;  %v466_v16 = vpop.f32.mrf.mxu1 }
 0x13d   :  { %5404 = vst [vmem:[#allocation30_spill] sm:$0xff] %v3572_v7  ;;  %v3580_v8 = vpop.eup %2557  ;;  %v1280_v2 = vadd.f32 1.0, %v1279_v17  ;;  %2563 = vlog2.f32 %v1006_v10  ;;  %v1583_v38 = vunpack.c.1.s8 %v3413_v49  ;;  %v1289_v43 = vadd.f32 1.0, %v1288_v61 }
 0x13e   :  { %5405 = vst [vmem:[#allocation31_spill] sm:$0xff] %v3586_v50  ;;  %v2560_v54 = vpop.eup %2559  ;;  %v1291_v60 = vand.u32 2147483647, %v3526_v12  ;;  %v1727_v55 = vunpack.c.1.s8 %v3426_v28  ;;  %v872_v51 = vmul.f32 1.442695, %v766_v26  ;;  %v1790_v36 = vcvt.s32.f32 %v1726_v40 }
 0x13f   :  { %v3594_v32 = vmul.f32 %v1646_v14, %v3431_v57  ;;  %v1015_v52 = vadd.f32 1.0, %v3580_v8  ;;  %v672_v17 = vand.u32 2147483647, %v3578_v4  ;;  %vm3598_vm3 = vcmp.lt.f32.partialorder %v1282_v33, 0.0004427343 }
 0x140   :  { %v2562_v56 = vpop.eup %2561  ;;  %v1009_v61 = vmul.f32 -0.5, %v3548_v23  ;;  %v767_v11 = vsub.f32 0.0, %v703_v24  ;;  %v3604_v63 = vmul.f32 %v2971_v48, %v466_v16  ;;  %v1278_v26 = vmul.f32 0.6931472, %v2560_v54 }
 0x141   :  { %v1281_v40 = vmul.f32 %v3502_v35, %v1280_v2  ;;  %v1647_v14 = vcvt.s32.f32 %v1583_v38  ;;  %v1614_v9 = vunpack.c.1.s8 %v3467_v42  ;;  %v1290_v31 = vmul.f32 %v3526_v12, %v1289_v43 }
 0x142   :  { %vm3609_vm4 = vcmp.lt.f32.partialorder %v1291_v60, 0.0004427343  ;;  %v1791_v33 = vcvt.s32.f32 %v1727_v55  ;;  %2565 = vpow2.f32 %v872_v51  ;;  %v1287_v5 = vmul.f32 0.6931472, %v2562_v56 }
 0x143   :  { %v2564_v39 = vpop.eup %2563  ;;  %2567 = vlog2.f32 %v1015_v52  ;;  %v1758_v24 = vunpack.c.1.s8 %v3485_v37  ;;  %v736_v16 = vsub.f32 0.0, %v672_v17  ;;  %v1010_v54 = vadd.f32 1.0, %v1009_v61 }
 0x144   :  { %v3615_v35 = vmul.f32 %v1790_v36, %v3431_v57  ;;  %v874_v2 = vmul.f32 1.442695, %v767_v11  ;;  %v673_v38 = vand.u32 2147483647, %v3604_v63  ;;  %v1284_v60 = vsel %vm3598_vm3, %v1281_v40, %v1278_v26  ;;  %v417_v26 = vpop.f32.mrf.mxu2  ;;  %v468_v50 = vpop.f32.mrf.mxu1 }
 0x145   :  { %v1012_v43 = vand.u32 2147483647, %v3548_v23  ;;  %v607_v12 = vmax.f32 %v3446_v44, 0.0  ;;  %v1678_v51 = vcvt.s32.f32 %v1614_v9  ;;  %v1008_v55 = vmul.f32 0.6931472, %v2564_v39 }
 0x146   :  { %v1018_v52 = vmul.f32 -0.5, %v3580_v8  ;;  %v3624_v56 = vmul.f32 %v1647_v14, %v3446_v44  ;;  %v3627_v36 = vmul.f32 %v1791_v33, %v3446_v44  ;;  %v1293_v11 = vsel %vm3609_vm4, %v1290_v31, %v1287_v5  ;;  %v506_v33 = vpop.f32.mrf.mxu3 }
 0x147   :  { %v1822_v10 = vcvt.s32.f32 %v1758_v24  ;;  %v812_v61 = vmul.f32 1.442695, %v736_v16  ;;  %v5410_v9 = vmax.f32 %v3395_v6, 0.0  ;;  %v1011_v14 = vmul.f32 %v3548_v23, %v1010_v54 }
 0x148   :  { %v3632_v40 = vpop.eup %2565  ;;  %2569 = vpow2.f32 %v874_v2  ;;  %v737_v29 = vsub.f32 0.0, %v673_v38  ;;  %vm3639_vm5 = vcmp.lt.f32.partialorder %v1012_v43, 0.0004427343  ;;  %v3644_v31 = vmul.f32 %v1678_v51, %v3524_v41 }
 0x149   :  { %v3636_v39 = vadd.f32 %v1284_v60, %v5410_v9  ;;  %v2568_v44 = vpop.eup %2567  ;;  %v1615_v62 = vunpack.c.1.s8 %v3498_v34  ;;  %v1759_v5 = vunpack.c.1.s8 %v3516_v45  ;;  %v5415_v6 = vmax.f32 %v3416_v53, 0.0 }
 0x14a   :  { %5414 = vst [vmem:[#allocation33_spill] sm:$0xff] %v3644_v31  ;;  %v1014_v23 = vsel %vm3639_vm5, %v1011_v14, %v1008_v55  ;;  %v1019_v16 = vadd.f32 1.0, %v1018_v52  ;;  %v3655_v54 = vmul.f32 %v2971_v48, %v417_v26  ;;  %v1021_v2 = vand.u32 2147483647, %v3580_v8 }
 0x14b   :  { %5411 = vst [vmem:[#allocation32_spill] sm:$0xff] %v3636_v39  ;;  %v3650_v24 = vadd.f32 %v1293_v11, %v5415_v6  ;;  %v1294_v38 = vadd.f32 1.0, %v3632_v40  ;;  %v3660_v60 = vmul.f32 %v1822_v10, %v3524_v41  ;;  %2571 = vpow2.f32 %v812_v61 }
 0x14c   :  { %v1017_v51 = vmul.f32 0.6931472, %v2568_v44  ;;  %v814_v55 = vmul.f32 1.442695, %v737_v29  ;;  %v5418_v52 = vmax.f32 %v3431_v57, 0.0  ;;  %v1679_v9 = vcvt.s32.f32 %v1615_v62 }
 0x14d   :  { %5416 = vst [vmem:[#allocation34_spill] sm:$0xff] %v3650_v24  ;;  %v1584_v14 = vunpack.c.2.s8 %v3366_v20  ;;  %v1020_v6 = vmul.f32 %v3580_v8, %v1019_v16  ;;  %v1823_v53 = vcvt.s32.f32 %v1759_v5  ;;  %v704_v44 = vand.u32 2147483647, %v3655_v54 }
 0x14e   :  { %5417 = vst [vmem:[#allocation35_spill] sm:$0xff] %v3660_v60  ;;  %v1502_v11 = vadd.f32 %v1014_v23, %v5418_v52  ;;  %v3670_v10 = vpop.eup %2569  ;;  %vm3678_vm6 = vcmp.lt.f32.partialorder %v1021_v2, 0.0004427343  ;;  %2573 = vlog2.f32 %v1294_v38  ;;  %v1728_v62 = vunpack.c.2.s8 %v3377_v25  ;;  %v379_v23 = vpop.f32.mrf.mxu0 }
 0x14f   :  { %v1023_v52 = vsel %vm3678_vm6, %v1020_v6, %v1017_v51  ;;  %v1297_v61 = vmul.f32 -0.5, %v3632_v40  ;;  %2575 = vpow2.f32 %v814_v55  ;;  %v3687_v8 = vmul.f32 %v2971_v48, %v506_v33 }
 0x150   :  { %v1920_v16 = vsub.f32 %v1502_v11, %v3594_v32  ;;  %v2116_v2 = vsub.f32 %v1502_v11, %v3615_v35  ;;  %v1303_v38 = vadd.f32 1.0, %v3670_v10  ;;  %v1648_v57 = vcvt.s32.f32 %v1584_v14 }
 0x151   :  { %v3689_v5 = vpop.eup %2571  ;;  %v3695_v43 = vmul.f32 %v1679_v9, %v3562_v30  ;;  %v3698_v51 = vmul.f32 %v1823_v53, %v3562_v30  ;;  %v768_v6 = vsub.f32 0.0, %v704_v44  ;;  %v3701_v55 = vmul.f32 %v2971_v48, %v379_v23 }
 0x152   :  { %v1503_v33 = vadd.f32 %v1023_v52, %v607_v12  ;;  %v1300_v29 = vand.u32 2147483647, %v3632_v40  ;;  %v1792_v26 = vcvt.s32.f32 %v1728_v62  ;;  %v1585_v32 = vunpack.c.2.s8 %v3413_v49 }
 0x153   :  { %5421 = vst [vmem:[#allocation36_spill] sm:$0xff] %v3695_v43  ;;  %v1298_v35 = vadd.f32 1.0, %v1297_v61  ;;  %v1024_v14 = vadd.f32 1.0, %v3689_v5  ;;  %v705_v9 = vand.u32 2147483647, %v3687_v8  ;;  %v3709_v53 = vadd.f32 %v3449_v3, %v1920_v16 }
 0x154   :  { %5422 = vst [vmem:[#allocation37_spill] sm:$0xff] %v3698_v51  ;;  %v2574_v17 = vpop.eup %2573  ;;  %v3712_v44 = vadd.f32 %v3452_v59, %v2116_v2  ;;  %2577 = vlog2.f32 %v1303_v38  ;;  %v3715_v12 = vmul.f32 %v1648_v57, %v3578_v4  ;;  %v1306_v61 = vmul.f32 -0.5, %v3670_v10 }
 0x155   :  { %v3717_v62 = vpop.eup %2575  ;;  %v1729_v23 = vunpack.c.2.s8 %v3426_v28  ;;  %v876_v52 = vmul.f32 1.442695, %v768_v6  ;;  %v674_v11 = vand.u32 2147483647, %v3701_v55  ;;  %v1921_v3 = vsub.f32 %v1503_v33, %v3624_v56 }
 0x156   :  { %vm3723_vm7 = vcmp.lt.f32.partialorder %v1300_v29, 0.0004427343  ;;  %v3728_v59 = vmul.f32 %v1792_v26, %v3578_v4  ;;  %v1649_v57 = vcvt.s32.f32 %v1585_v32  ;;  %v1296_v2 = vmul.f32 0.6931472, %v2574_v17 }
 0x157   :  { %v1299_v38 = vmul.f32 %v3632_v40, %v1298_v35  ;;  %2579 = vlog2.f32 %v1024_v14  ;;  %v769_v7 = vsub.f32 0.0, %v705_v9  ;;  %v2117_v6 = vsub.f32 %v1503_v33, %v3627_v36 }
 0x158   :  { %v1309_v24 = vand.u32 2147483647, %v3670_v10  ;;  %v1033_v46 = vadd.f32 1.0, %v3717_v62  ;;  %v3735_v56 = vmul.f32 %v2971_v48, %v468_v50  ;;  %v1307_v29 = vadd.f32 1.0, %v1306_v61 }
 0x159   :  { %v1793_v18 = vcvt.s32.f32 %v1729_v23  ;;  %2581 = vpow2.f32 %v876_v52  ;;  %v738_v26 = vsub.f32 0.0, %v674_v11  ;;  %v3738_v17 = vadd.f32 %v3490_v15, %v1921_v3 }
 0x15a   :  { %v2578_v39 = vpop.eup %2577  ;;  %v1027_v40 = vmul.f32 -0.5, %v3689_v5  ;;  %v3743_v36 = vmul.f32 %v1649_v57, %v3604_v63  ;;  %v1302_v33 = vsel %vm3723_vm7, %v1299_v38, %v1296_v2  ;;  %v1616_v50 = vunpack.c.2.s8 %v3467_v42 }
 0x15b   :  { %v1760_v35 = vunpack.c.2.s8 %v3485_v37  ;;  %v878_v14 = vmul.f32 1.442695, %v769_v7  ;;  %v3750_v11 = vadd.f32 %v3493_v13, %v2117_v6  ;;  %vm3752_vm8 = vcmp.lt.f32.partialorder %v1309_v24, 0.0004427343 }
 0x15c   :  { %2583 = vlog2.f32 %v1033_v46  ;;  %v675_v9 = vand.u32 2147483647, %v3735_v56  ;;  %v1305_v23 = vmul.f32 0.6931472, %v2578_v39  ;;  %v1308_v52 = vmul.f32 %v3670_v10, %v1307_v29  ;;  %v419_v46 = vpop.f32.mrf.mxu2 }
 0x15d   :  { %v2580_v61 = vpop.eup %2579  ;;  %v3759_v3 = vmul.f32 %v1793_v18, %v3604_v63  ;;  %v816_v16 = vmul.f32 1.442695, %v738_v26  ;;  %v5427_v7 = vmax.f32 %v3524_v41, 0.0  ;;  %v1028_v13 = vadd.f32 1.0, %v1027_v40 }
 0x15e   :  { %v1030_v24 = vand.u32 2147483647, %v3689_v5  ;;  %v1036_v39 = vmul.f32 -0.5, %v3717_v62  ;;  %v1680_v6 = vcvt.s32.f32 %v1616_v50  ;;  %v1824_v10 = vcvt.s32.f32 %v1760_v35 }
 0x15f   :  { %v3763_v57 = vadd.f32 %v1302_v33, %v5427_v7  ;;  %v3767_v38 = vpop.eup %2581  ;;  %2585 = vpow2.f32 %v878_v14  ;;  %v1026_v18 = vmul.f32 0.6931472, %v2580_v61  ;;  %v1617_v41 = vunpack.c.2.s8 %v3498_v34 }
 0x160   :  { %v739_v26 = vsub.f32 0.0, %v675_v9  ;;  %v1311_v40 = vsel %vm3752_vm8, %v1308_v52, %v1305_v23  ;;  %v1761_v33 = vunpack.c.2.s8 %v3516_v45  ;;  %2587 = vpow2.f32 %v816_v16  ;;  %v508_v16 = vpop.f32.mrf.mxu3 }
 0x161   :  { %5428 = vst [vmem:[#allocation38_spill] sm:$0xff] %v3763_v57  ;;  %v3776_v7 = vmul.f32 %v2971_v48, %v419_v46  ;;  %v1029_v14 = vmul.f32 %v3689_v5, %v1028_v13  ;;  %v1312_v9 = vadd.f32 1.0, %v3767_v38  ;;  %vm3784_vm9 = vcmp.lt.f32.partialorder %v1030_v24, 0.0004427343 }
 0x162   :  { %v2584_v2 = vpop.eup %2583  ;;  %v1037_v61 = vadd.f32 1.0, %v1036_v39  ;;  %v3789_v23 = vmul.f32 %v1680_v6, %v3655_v54  ;;  %v3792_v52 = vmul.f32 %v1824_v10, %v3655_v54  ;;  %v5433_v46 = vmax.f32 %v3562_v30, 0.0 }
 0x163   :  { %v1032_v5 = vsel %vm3784_vm9, %v1029_v14, %v1026_v18  ;;  %v1039_v13 = vand.u32 2147483647, %v3717_v62  ;;  %v818_v24 = vmul.f32 1.442695, %v739_v26  ;;  %v1035_v39 = vmul.f32 0.6931472, %v2584_v2 }
 0x164   :  { %5431 = vst [vmem:[#allocation39_spill] sm:$0xff] %v3789_v23  ;;  %v3796_v50 = vadd.f32 %v1311_v40, %v5433_v46  ;;  %v1681_v29 = vcvt.s32.f32 %v1617_v41  ;;  %v1825_v6 = vcvt.s32.f32 %v1761_v33  ;;  %v706_v32 = vand.u32 2147483647, %v3776_v7 }
 0x165   :  { %5432 = vst [vmem:[#allocation40_spill] sm:$0xff] %v3792_v52  ;;  %v3801_v35 = vpop.eup %2585  ;;  %2589 = vlog2.f32 %v1312_v9  ;;  %v1315_v10 = vmul.f32 -0.5, %v3767_v38  ;;  %v1586_v30 = vunpack.c.3.s8 %v3366_v20  ;;  %v3807_v40 = vmul.f32 %v2971_v48, %v508_v16 }
 0x166   :  { %5434 = vst [vmem:[#allocation41_spill] sm:$0xff] %v3796_v50  ;;  %v3809_v15 = vpop.eup %2587  ;;  %v5435_v18 = vmax.f32 %v3578_v4, 0.0  ;;  %v1038_v14 = vmul.f32 %v3717_v62, %v1037_v61  ;;  %v1730_v41 = vunpack.c.3.s8 %v3377_v25  ;;  %vm3818_vm10 = vcmp.lt.f32.partialorder %v1039_v13, 0.0004427343  ;;  %v382_v25 = vpop.f32.mrf.mxu0 }
 0x167   :  { %v1321_v20 = vadd.f32 1.0, %v3801_v35  ;;  %2591 = vpow2.f32 %v818_v24  ;;  %v1318_v61 = vand.u32 2147483647, %v3767_v38  ;;  %v770_v16 = vsub.f32 0.0, %v706_v32 }
 0x168   :  { %v1504_v26 = vadd.f32 %v1032_v5, %v5435_v18  ;;  %v1041_v62 = vsel %vm3818_vm10, %v1038_v14, %v1035_v39  ;;  %v1316_v46 = vadd.f32 1.0, %v1315_v10  ;;  %v1042_v5 = vadd.f32 1.0, %v3809_v15 }
 0x169   :  { %v1650_v13 = vcvt.s32.f32 %v1586_v30  ;;  %v707_v18 = vand.u32 2147483647, %v3807_v40  ;;  %v3832_v24 = vmul.f32 %v1681_v29, %v3687_v8  ;;  %v3835_v4 = vmul.f32 %v1825_v6, %v3687_v8 }
 0x16a   :  { %v1922_v33 = vsub.f32 %v1504_v26, %v3715_v12  ;;  %v1794_v9 = vcvt.s32.f32 %v1730_v41  ;;  %v5440_v14 = vmax.f32 %v3604_v63, 0.0  ;;  %2593 = vlog2.f32 %v1321_v20 }
 0x16b   :  { %5438 = vst [vmem:[#allocation42_spill] sm:$0xff] %v3832_v24  ;;  %v2590_v39 = vpop.eup %2589  ;;  %v1324_v10 = vmul.f32 -0.5, %v3801_v35  ;;  %v3841_v30 = vmul.f32 %v2971_v48, %v382_v25  ;;  %v2118_v2 = vsub.f32 %v1504_v26, %v3728_v59  ;;  %vm3844_vm11 = vcmp.lt.f32.partialorder %v1318_v61, 0.0004427343  ;;  %v471_v25 = vpop.f32.mrf.mxu1 }
 0x16c   :  { %5439 = vst [vmem:[#allocation43_spill] sm:$0xff] %v3835_v4  ;;  %v1505_v32 = vadd.f32 %v1041_v62, %v5440_v14  ;;  %v880_v6 = vmul.f32 1.442695, %v770_v16  ;;  %v1317_v63 = vmul.f32 %v3767_v38, %v1316_v46  ;;  %2595 = vlog2.f32 %v1042_v5 }
 0x16d   :  { %v3849_v41 = vpop.eup %2591  ;;  %v3853_v20 = vmul.f32 %v1650_v13, %v3701_v55  ;;  %v771_v62 = vsub.f32 0.0, %v707_v18  ;;  %v1314_v14 = vmul.f32 0.6931472, %v2590_v39  ;;  %v1327_v59 = vand.u32 2147483647, %v3801_v35 }
 0x16e   :  { %v1587_v26 = vunpack.c.3.s8 %v3413_v49  ;;  %v1731_v61 = vunpack.c.3.s8 %v3426_v28  ;;  %v3859_v29 = vadd.f32 %v3709_v53, %v1922_v33  ;;  %v1923_v16 = vsub.f32 %v1505_v32, %v3743_v36 }
 0x16f   :  { %v1325_v51 = vadd.f32 1.0, %v1324_v10  ;;  %v676_v38 = vand.u32 2147483647, %v3841_v30  ;;  %v1045_v46 = vmul.f32 -0.5, %v3809_v15  ;;  %v1051_v5 = vadd.f32 1.0, %v3849_v41 }
 0x170   :  { %2597 = vpow2.f32 %v880_v6  ;;  %v3866_v13 = vmul.f32 %v2971_v48, %v471_v25  ;;  %v2594_v18 = vpop.eup %2593  ;;  %v3869_v49 = vadd.f32 %v3712_v44, %v2118_v2  ;;  %v2119_v28 = vsub.f32 %v1505_v32, %v3759_v3 }
 0x171   :  { %v3873_v53 = vmul.f32 %v1794_v9, %v3701_v55  ;;  %v882_v36 = vmul.f32 1.442695, %v771_v62  ;;  %v1320_v33 = vsel %vm3844_vm11, %v1317_v63, %v1314_v14  ;;  %vm3877_vm12 = vcmp.lt.f32.partialorder %v1327_v59, 0.0004427343 }
 0x172   :  { %v1651_v10 = vcvt.s32.f32 %v1587_v26  ;;  %v1795_v6 = vcvt.s32.f32 %v1731_v61  ;;  %v2596_v25 = vpop.eup %2595  ;;  %v3882_v43 = vadd.f32 %v3738_v17, %v1923_v16  ;;  %v1326_v44 = vmul.f32 %v3801_v35, %v1325_v51 }
 0x173   :  { %v1618_v3 = vunpack.c.3.s8 %v3467_v42  ;;  %v740_v2 = vsub.f32 0.0, %v676_v38  ;;  %v1323_v9 = vmul.f32 0.6931472, %v2594_v18  ;;  %v1046_v32 = vadd.f32 1.0, %v1045_v46  ;;  %v422_v38 = vpop.f32.mrf.mxu2 }
 0x174   :  { %2599 = vlog2.f32 %v1051_v5  ;;  %v677_v12 = vand.u32 2147483647, %v3866_v13  ;;  %v3888_v63 = vadd.f32 %v3750_v11, %v2119_v28  ;;  %v5445_v62 = vmax.f32 %v3655_v54, 0.0 }
 0x175   :  { %v1048_v17 = vand.u32 2147483647, %v3809_v15  ;;  %2601 = vpow2.f32 %v882_v36  ;;  %v1044_v51 = vmul.f32 0.6931472, %v2596_v25  ;;  %v3898_v42 = vmul.f32 %v1651_v10, %v3735_v56  ;;  %v3925_v25 = vld [vmem:[%s5257_s3 + $0x20] sm:$0xff] }
 0x176   :  { %v3892_v14 = vadd.f32 %v1320_v33, %v5445_v62  ;;  %v3895_v59 = vpop.eup %2597  ;;  %v3901_v35 = vmul.f32 %v1795_v6, %v3735_v56  ;;  %v1762_v26 = vunpack.c.3.s8 %v3485_v37  ;;  %v1054_v11 = vmul.f32 -0.5, %v3849_v41  ;;  %v3942_v62 = vld [vmem:[%s5258_s4 + $0x20] sm:$0xff] }
 0x177   :  { %v1682_v61 = vcvt.s32.f32 %v1618_v3  ;;  %v820_v16 = vmul.f32 1.442695, %v740_v2  ;;  %v1329_v46 = vsel %vm3877_vm12, %v1326_v44, %v1323_v9  ;;  %v1047_v5 = vmul.f32 %v3809_v15, %v1046_v32 }
 0x178   :  { %5446 = vst [vmem:[#allocation44_spill] sm:$0xff] %v3892_v14  ;;  %v1619_v18 = vunpack.c.3.s8 %v3498_v34  ;;  %v741_v28 = vsub.f32 0.0, %v677_v12  ;;  %vm3914_vm13 = vcmp.lt.f32.partialorder %v1048_v17, 0.0004427343  ;;  %v1330_v10 = vadd.f32 1.0, %v3895_v59 }
 0x179   :  { %v1050_v39 = vsel %vm3914_vm13, %v1047_v5, %v1044_v51  ;;  %v1826_v15 = vcvt.s32.f32 %v1762_v26  ;;  %v3928_v44 = vmul.f32 %v2971_v48, %v422_v38  ;;  %v5449_v2 = vmax.f32 %v3687_v8, 0.0 }
 0x17a   :  { %v2600_v6 = vpop.eup %2599  ;;  %v1055_v32 = vadd.f32 1.0, %v1054_v11  ;;  %v3937_v12 = vmul.f32 %v1682_v61, %v3776_v7  ;;  %2603 = vpow2.f32 %v820_v16  ;;  %v1057_v17 = vand.u32 2147483647, %v3849_v41  ;;  %v511_v61 = vpop.f32.mrf.mxu3 }
 0x17b   :  { %v3930_v3 = vpop.eup %2601  ;;  %v3934_v9 = vadd.f32 %v1329_v46, %v5449_v2  ;;  %v1683_v51 = vcvt.s32.f32 %v1619_v18  ;;  %v1763_v26 = vunpack.c.3.s8 %v3516_v45  ;;  %v822_v38 = vmul.f32 1.442695, %v741_v28 }
 0x17c   :  { %5451 = vst [vmem:[#allocation46_spill] sm:$0xff] %v3937_v12  ;;  %v5452_v8 = vmax.f32 %v3701_v55, 0.0  ;;  %v1053_v5 = vmul.f32 0.6931472, %v2600_v6  ;;  %2605 = vlog2.f32 %v1330_v10  ;;  %v1588_v11 = vunpack.c.0.s8 %v3925_v25 }
 0x17d   :  { %5450 = vst [vmem:[#allocation45_spill] sm:$0xff] %v3934_v9  ;;  %v1333_v16 = vmul.f32 -0.5, %v3895_v59  ;;  %v1339_v33 = vadd.f32 1.0, %v3930_v3  ;;  %v1732_v2 = vunpack.c.0.s8 %v3942_v62  ;;  %v708_v37 = vand.u32 2147483647, %v3928_v44 }
 0x17e   :  { %v1506_v46 = vadd.f32 %v1050_v39, %v5452_v8  ;;  %v1056_v18 = vmul.f32 %v3849_v41, %v1055_v32  ;;  %v3959_v28 = vmul.f32 %v1826_v15, %v3776_v7  ;;  %vm3961_vm14 = vcmp.lt.f32.partialorder %v1057_v17, 0.0004427343  ;;  %v384_v8 = vpop.f32.mrf.mxu0 }
 0x17f   :  { %v3966_v6 = vmul.f32 %v1683_v51, %v3807_v40  ;;  %2607 = vpow2.f32 %v822_v38  ;;  %v3969_v39 = vmul.f32 %v2971_v48, %v511_v61  ;;  %v1827_v15 = vcvt.s32.f32 %v1763_v26  ;;  %v3979_v51 = vld [vmem:[%s5257_s3 + $0x28] sm:$0xff] }
 0x180   :  { %5453 = vst [vmem:[#allocation47_spill] sm:$0xff] %v3959_v28  ;;  %v3971_v45 = vpop.eup %2603  ;;  %v1924_v55 = vsub.f32 %v1506_v46, %v3853_v20  ;;  %v1059_v41 = vsel %vm3961_vm14, %v1056_v18, %v1053_v5  ;;  %v1652_v32 = vcvt.s32.f32 %v1588_v11  ;;  %v1334_v17 = vadd.f32 1.0, %v1333_v16 }
 0x181   :  { %5456 = vst [vmem:[#allocation48_spill] sm:$0xff] %v3966_v6  ;;  %2609 = vlog2.f32 %v1339_v33  ;;  %v1796_v36 = vcvt.s32.f32 %v1732_v2  ;;  %v772_v38 = vsub.f32 0.0, %v708_v37  ;;  %v2120_v34 = vsub.f32 %v1506_v46, %v3873_v53 }
 0x182   :  { %v2606_v61 = vpop.eup %2605  ;;  %v1336_v54 = vand.u32 2147483647, %v3895_v59  ;;  %v1342_v20 = vmul.f32 -0.5, %v3930_v3  ;;  %v3985_v5 = vmul.f32 %v2971_v48, %v384_v8  ;;  %v5457_v26 = vmax.f32 %v3735_v56, 0.0  ;;  %v4005_v56 = vld [vmem:[%s5258_s4 + $0x28] sm:$0xff] }
 0x183   :  { %v1060_v33 = vadd.f32 1.0, %v3971_v45  ;;  %v709_v2 = vand.u32 2147483647, %v3969_v39  ;;  %v3993_v37 = vadd.f32 %v3859_v29, %v1924_v55  ;;  %v3996_v53 = vmul.f32 %v1827_v15, %v3807_v40  ;;  %v473_v15 = vpop.f32.mrf.mxu1 }
 0x184   :  { %v1507_v11 = vadd.f32 %v1059_v41, %v5457_v26  ;;  %v3999_v46 = vmul.f32 %v1652_v32, %v3841_v30  ;;  %v1589_v18 = vunpack.c.0.s8 %v3979_v51  ;;  %v1332_v8 = vmul.f32 0.6931472, %v2606_v61 }
 0x185   :  { %5458 = vst [vmem:[#allocation49_spill] sm:$0xff] %v3996_v53  ;;  %v4007_v10 = vpop.eup %2607  ;;  %v1335_v41 = vmul.f32 %v3895_v59, %v1334_v17  ;;  %v884_v29 = vmul.f32 1.442695, %v772_v38  ;;  %v678_v55 = vand.u32 2147483647, %v3985_v5  ;;  %v4012_v26 = vadd.f32 %v3869_v49, %v2120_v34  ;;  %v4026_v17 = vld [vmem:[%s5257_s3 + $0x60] sm:$0xff] }
 0x186   :  { %vm4014_vm15 = vcmp.lt.f32.partialorder %v1336_v54, 0.0004427343  ;;  %v1343_v16 = vadd.f32 1.0, %v1342_v20  ;;  %v4019_v4 = vmul.f32 %v1796_v36, %v3841_v30  ;;  %v1925_v61 = vsub.f32 %v1507_v11, %v3898_v42  ;;  %v4034_v36 = vld [vmem:[%s5258_s4 + $0x60] sm:$0xff] }
 0x187   :  { %v2610_v24 = vpop.eup %2609  ;;  %v1345_v59 = vand.u32 2147483647, %v3930_v3  ;;  %2611 = vlog2.f32 %v1060_v33  ;;  %v773_v49 = vsub.f32 0.0, %v709_v2  ;;  %v2121_v54 = vsub.f32 %v1507_v11, %v3901_v35 }
 0x188   :  { %v1069_v34 = vadd.f32 1.0, %v4007_v10  ;;  %v1733_v38 = vunpack.c.0.s8 %v4005_v56  ;;  %v4037_v42 = vmul.f32 %v2971_v48, %v473_v15  ;;  %v1338_v20 = vsel %vm4014_vm15, %v1335_v41, %v1332_v8 }
 0x189   :  { %v1653_v33 = vcvt.s32.f32 %v1589_v18  ;;  %2613 = vpow2.f32 %v884_v29  ;;  %v742_v2 = vsub.f32 0.0, %v678_v55  ;;  %v1341_v9 = vmul.f32 0.6931472, %v2610_v24 }
 0x18a   :  { %v1344_v35 = vmul.f32 %v3930_v3, %v1343_v16  ;;  %v1063_v11 = vmul.f32 -0.5, %v3971_v45  ;;  %v1620_v50 = vunpack.c.0.s8 %v4026_v17  ;;  %vm4044_vm0 = vcmp.lt.f32.partialorder %v1345_v59, 0.0004427343 }
 0x18b   :  { %v1764_v23 = vunpack.c.0.s8 %v4034_v36  ;;  %v886_v32 = vmul.f32 1.442695, %v773_v49  ;;  %v5463_v18 = vmax.f32 %v3776_v7, 0.0  ;;  %2615 = vlog2.f32 %v1069_v34 }
 0x18c   :  { %v1797_v24 = vcvt.s32.f32 %v1733_v38  ;;  %v679_v3 = vand.u32 2147483647, %v4037_v42  ;;  %v4056_v41 = vadd.f32 %v3882_v43, %v1925_v61  ;;  %v4059_v29 = vadd.f32 %v3888_v63, %v2121_v54 }
 0x18d   :  { %v4052_v8 = vadd.f32 %v1338_v20, %v5463_v18  ;;  %v2612_v16 = vpop.eup %2611  ;;  %v4062_v55 = vmul.f32 %v1653_v33, %v3866_v13  ;;  %v824_v59 = vmul.f32 1.442695, %v742_v2  ;;  %v1347_v7 = vsel %vm4044_vm0, %v1344_v35, %v1341_v9  ;;  %v424_v20 = vpop.f32.mrf.mxu2  ;;  %v4084_v9 = vld [vmem:[%s5258_s4 + $0x68] sm:$0xff] }
 0x18e   :  { %v1064_v49 = vadd.f32 1.0, %v1063_v11  ;;  %v1066_v34 = vand.u32 2147483647, %v3971_v45  ;;  %v1684_v38 = vcvt.s32.f32 %v1620_v50  ;;  %v1072_v43 = vmul.f32 -0.5, %v4007_v10  ;;  %v4079_v50 = vld [vmem:[%s5257_s3 + $0x68] sm:$0xff] }
 0x18f   :  { %5464 = vst [vmem:[#allocation50_spill] sm:$0xff] %v4052_v8  ;;  %v4067_v18 = vpop.eup %2613  ;;  %v1828_v63 = vcvt.s32.f32 %v1764_v23  ;;  %2617 = vpow2.f32 %v886_v32  ;;  %v1062_v33 = vmul.f32 0.6931472, %v2612_v16  ;;  %v4074_v52 = vmul.f32 %v1797_v24, %v3866_v13 }
 0x190   :  { %v743_v2 = vsub.f32 0.0, %v679_v3  ;;  %v5465_v35 = vmax.f32 %v3807_v40, 0.0  ;;  %2619 = vpow2.f32 %v824_v59  ;;  %v4093_v32 = vmul.f32 %v2971_v48, %v424_v20  ;;  %v513_v20 = vpop.f32.mrf.mxu3 }
 0x191   :  { %v2616_v24 = vpop.eup %2615  ;;  %v1065_v16 = vmul.f32 %v3971_v45, %v1064_v49  ;;  %vm4096_vm1 = vcmp.lt.f32.partialorder %v1066_v34, 0.0004427343  ;;  %v1348_v3 = vadd.f32 1.0, %v4067_v18  ;;  %v4102_v61 = vmul.f32 %v1684_v38, %v3928_v44 }
 0x192   :  { %v4090_v11 = vadd.f32 %v1347_v7, %v5465_v35  ;;  %v1073_v23 = vadd.f32 1.0, %v1072_v43  ;;  %v4105_v40 = vmul.f32 %v1828_v63, %v3928_v44  ;;  %v1621_v59 = vunpack.c.0.s8 %v4079_v50 }
 0x193   :  { %5469 = vst [vmem:[#allocation52_spill] sm:$0xff] %v4102_v61  ;;  %v1765_v7 = vunpack.c.0.s8 %v4084_v9  ;;  %v1068_v45 = vsel %vm4096_vm1, %v1065_v16, %v1062_v33  ;;  %v1075_v49 = vand.u32 2147483647, %v4007_v10  ;;  %v826_v35 = vmul.f32 1.442695, %v743_v2 }
 0x194   :  { %5466 = vst [vmem:[#allocation51_spill] sm:$0xff] %v4090_v11  ;;  %v1071_v43 = vmul.f32 0.6931472, %v2616_v24  ;;  %v1590_v63 = vunpack.c.1.s8 %v3925_v25  ;;  %v710_v28 = vand.u32 2147483647, %v4093_v32  ;;  %2621 = vlog2.f32 %v1348_v3 }
 0x195   :  { %5470 = vst [vmem:[#allocation53_spill] sm:$0xff] %v4105_v40  ;;  %v4113_v15 = vpop.eup %2617  ;;  %v1351_v12 = vmul.f32 -0.5, %v4067_v18  ;;  %v1734_v54 = vunpack.c.1.s8 %v3942_v62  ;;  %v4122_v33 = vmul.f32 %v2971_v48, %v513_v20  ;;  %v5471_v2 = vmax.f32 %v3841_v30, 0.0 }
 0x196   :  { %v4124_v16 = vpop.eup %2619  ;;  %v1074_v38 = vmul.f32 %v4007_v10, %v1073_v23  ;;  %v1685_v24 = vcvt.s32.f32 %v1621_v59  ;;  %v1829_v6 = vcvt.s32.f32 %v1765_v7  ;;  %vm4131_vm2 = vcmp.lt.f32.partialorder %v1075_v49, 0.0004427343  ;;  %v387_v10 = vpop.f32.mrf.mxu0 }
 0x197   :  { %v1508_v34 = vadd.f32 %v1068_v45, %v5471_v2  ;;  %v1357_v14 = vadd.f32 1.0, %v4113_v15  ;;  %2623 = vpow2.f32 %v826_v35  ;;  %v1354_v30 = vand.u32 2147483647, %v4067_v18 }
 0x198   :  { %v1077_v20 = vsel %vm4131_vm2, %v1074_v38, %v1071_v43  ;;  %v1654_v45 = vcvt.s32.f32 %v1590_v63  ;;  %v774_v2 = vsub.f32 0.0, %v710_v28  ;;  %v1352_v23 = vadd.f32 1.0, %v1351_v12 }
 0x199   :  { %v1078_v59 = vadd.f32 1.0, %v4124_v16  ;;  %v1798_v7 = vcvt.s32.f32 %v1734_v54  ;;  %v711_v49 = vand.u32 2147483647, %v4122_v33  ;;  %v1926_v8 = vsub.f32 %v1508_v34, %v3999_v46 }
 0x19a   :  { %v4143_v53 = vmul.f32 %v1685_v24, %v3969_v39  ;;  %v4146_v35 = vmul.f32 %v1829_v6, %v3969_v39  ;;  %v2622_v43 = vpop.eup %2621  ;;  %v5476_v28 = vmax.f32 %v3866_v13, 0.0  ;;  %2625 = vlog2.f32 %v1357_v14 }
 0x19b   :  { %v1360_v12 = vmul.f32 -0.5, %v4113_v15  ;;  %v4153_v54 = vmul.f32 %v2971_v48, %v387_v10  ;;  %v2122_v46 = vsub.f32 %v1508_v34, %v4019_v4  ;;  %vm4156_vm3 = vcmp.lt.f32.partialorder %v1354_v30, 0.0004427343  ;;  %v476_v10 = vpop.f32.mrf.mxu1 }
 0x19c   :  { %5474 = vst [vmem:[#allocation54_spill] sm:$0xff] %v4143_v53  ;;  %v1509_v63 = vadd.f32 %v1077_v20, %v5476_v28  ;;  %v4161_v6 = vmul.f32 %v1654_v45, %v3985_v5  ;;  %v888_v3 = vmul.f32 1.442695, %v774_v2  ;;  %v1353_v13 = vmul.f32 %v4067_v18, %v1352_v23 }
 0x19d   :  { %5475 = vst [vmem:[#allocation55_spill] sm:$0xff] %v4146_v35  ;;  %v4163_v38 = vpop.eup %2623  ;;  %2627 = vlog2.f32 %v1078_v59  ;;  %v4167_v14 = vmul.f32 %v1798_v7, %v3985_v5  ;;  %v775_v20 = vsub.f32 0.0, %v711_v49  ;;  %v1350_v28 = vmul.f32 0.6931472, %v2622_v43 }
 0x19e   :  { %v1363_v4 = vand.u32 2147483647, %v4113_v15  ;;  %v1591_v34 = vunpack.c.1.s8 %v3979_v51  ;;  %v1735_v30 = vunpack.c.1.s8 %v4005_v56  ;;  %v4173_v45 = vadd.f32 %v3993_v37, %v1926_v8 }
 0x19f   :  { %v1927_v2 = vsub.f32 %v1509_v63, %v4062_v55  ;;  %v1361_v11 = vadd.f32 1.0, %v1360_v12  ;;  %v680_v18 = vand.u32 2147483647, %v4153_v54  ;;  %v1081_v23 = vmul.f32 -0.5, %v4124_v16 }
 0x1a0   :  { %v1087_v59 = vadd.f32 1.0, %v4163_v38  ;;  %2629 = vpow2.f32 %v888_v3  ;;  %v4180_v7 = vmul.f32 %v2971_v48, %v476_v10  ;;  %v2626_v49 = vpop.eup %2625  ;;  %v4183_v43 = vadd.f32 %v4012_v26, %v2122_v46 }
 0x1a1   :  { %v2123_v37 = vsub.f32 %v1509_v63, %v4074_v52  ;;  %v890_v55 = vmul.f32 1.442695, %v775_v20  ;;  %v1356_v12 = vsel %vm4156_vm3, %v1353_v13, %v1350_v28  ;;  %vm4189_vm4 = vcmp.lt.f32.partialorder %v1363_v4, 0.0004427343 }
 0x1a2   :  { %v1655_v3 = vcvt.s32.f32 %v1591_v34  ;;  %v1799_v31 = vcvt.s32.f32 %v1735_v30  ;;  %v4194_v57 = vadd.f32 %v4056_v41, %v1927_v2  ;;  %v1362_v26 = vmul.f32 %v4113_v15, %v1361_v11 }
 0x1a3   :  { %v2628_v10 = vpop.eup %2627  ;;  %v1622_v52 = vunpack.c.1.s8 %v4026_v17  ;;  %v744_v63 = vsub.f32 0.0, %v680_v18  ;;  %v1359_v46 = vmul.f32 0.6931472, %v2626_v49  ;;  %v1082_v20 = vadd.f32 1.0, %v1081_v23 }
 0x1a4   :  { %2631 = vlog2.f32 %v1087_v59  ;;  %v681_v24 = vand.u32 2147483647, %v4180_v7  ;;  %v4200_v13 = vadd.f32 %v4059_v29, %v2123_v37  ;;  %v5481_v28 = vmax.f32 %v3928_v44, 0.0  ;;  %v427_v59 = vpop.f32.mrf.mxu2 }
 0x1a5   :  { %v1084_v41 = vand.u32 2147483647, %v4124_v16  ;;  %2633 = vpow2.f32 %v890_v55  ;;  %v1080_v15 = vmul.f32 0.6931472, %v2628_v10  ;;  %v4210_v11 = vmul.f32 %v1655_v3, %v4037_v42 }
 0x1a6   :  { %v4204_v4 = vadd.f32 %v1356_v12, %v5481_v28  ;;  %v4207_v34 = vpop.eup %2629  ;;  %v4213_v30 = vmul.f32 %v1799_v31, %v4037_v42  ;;  %v1766_v2 = vunpack.c.1.s8 %v4034_v36  ;;  %v1686_v18 = vcvt.s32.f32 %v1622_v52 }
 0x1a7   :  { %v828_v44 = vmul.f32 1.442695, %v744_v63  ;;  %v745_v23 = vsub.f32 0.0, %v681_v24  ;;  %v1365_v49 = vsel %vm4189_vm4, %v1362_v26, %v1359_v46  ;;  %v1083_v37 = vmul.f32 %v4124_v16, %v1082_v20  ;;  %v516_v20 = vpop.f32.mrf.mxu3 }
 0x1a8   :  { %5482 = vst [vmem:[#allocation56_spill] sm:$0xff] %v4204_v4  ;;  %v1090_v55 = vmul.f32 -0.5, %v4163_v38  ;;  %v1623_v12 = vunpack.c.1.s8 %v4079_v50  ;;  %vm4226_vm5 = vcmp.lt.f32.partialorder %v1084_v41, 0.0004427343  ;;  %v1366_v52 = vadd.f32 1.0, %v4207_v34 }
 0x1a9   :  { %v1086_v16 = vsel %vm4226_vm5, %v1083_v37, %v1080_v15  ;;  %v1830_v26 = vcvt.s32.f32 %v1766_v2  ;;  %v4235_v46 = vmul.f32 %v2971_v48, %v427_v59  ;;  %v5485_v28 = vmax.f32 %v3969_v39, 0.0 }
 0x1aa   :  { %v2632_v60 = vpop.eup %2631  ;;  %v4244_v3 = vmul.f32 %v1686_v18, %v4093_v32  ;;  %2635 = vpow2.f32 %v828_v44  ;;  %v830_v31 = vmul.f32 1.442695, %v745_v23  ;;  %v1091_v10 = vadd.f32 1.0, %v1090_v55 }
 0x1ab   :  { %v4237_v24 = vpop.eup %2633  ;;  %v4241_v41 = vadd.f32 %v1365_v49, %v5485_v28  ;;  %v1093_v15 = vand.u32 2147483647, %v4163_v38  ;;  %v1687_v2 = vcvt.s32.f32 %v1623_v12  ;;  %v1767_v37 = vunpack.c.1.s8 %v4084_v9  ;;  %v389_v28 = vpop.f32.mrf.mxu0 }
 0x1ac   :  { %5487 = vst [vmem:[#allocation58_spill] sm:$0xff] %v4244_v3  ;;  %v5488_v59 = vmax.f32 %v3985_v5, 0.0  ;;  %2637 = vlog2.f32 %v1366_v52  ;;  %v1592_v29 = vunpack.c.2.s8 %v3925_v25  ;;  %v4252_v39 = vmul.f32 %v2971_v48, %v516_v20 }
 0x1ad   :  { %5486 = vst [vmem:[#allocation57_spill] sm:$0xff] %v4241_v41  ;;  %v1089_v49 = vmul.f32 0.6931472, %v2632_v60  ;;  %v1369_v18 = vmul.f32 -0.5, %v4207_v34  ;;  %v1375_v44 = vadd.f32 1.0, %v4237_v24  ;;  %v4262_v12 = vmul.f32 %v1830_v26, %v4093_v32 }
 0x1ae   :  { %v1510_v63 = vadd.f32 %v1086_v16, %v5488_v59  ;;  %v712_v23 = vand.u32 2147483647, %v4235_v46  ;;  %2639 = vpow2.f32 %v830_v31  ;;  %v1092_v52 = vmul.f32 %v4163_v38, %v1091_v10 }
 0x1af   :  { %5489 = vst [vmem:[#allocation59_spill] sm:$0xff] %v4262_v12  ;;  %vm4265_vm6 = vcmp.lt.f32.partialorder %v1093_v15, 0.0004427343  ;;  %v1831_v16 = vcvt.s32.f32 %v1767_v37  ;;  %v1736_v20 = vunpack.c.2.s8 %v3942_v62  ;;  %v4274_v5 = vmul.f32 %v1687_v2, %v4122_v33 }
 0x1b0   :  { %v4270_v59 = vpop.eup %2635  ;;  %v1928_v55 = vsub.f32 %v1510_v63, %v4161_v6  ;;  %v1656_v26 = vcvt.s32.f32 %v1592_v29  ;;  %v713_v31 = vand.u32 2147483647, %v4252_v39  ;;  %v1095_v38 = vsel %vm4265_vm6, %v1092_v52, %v1089_v49 }
 0x1b1   :  { %5492 = vst [vmem:[#allocation60_spill] sm:$0xff] %v4274_v5  ;;  %v1370_v10 = vadd.f32 1.0, %v1369_v18  ;;  %2641 = vlog2.f32 %v1375_v44  ;;  %v776_v15 = vsub.f32 0.0, %v712_v23  ;;  %v2124_v8 = vsub.f32 %v1510_v63, %v4167_v14 }
 0x1b2   :  { %v2638_v37 = vpop.eup %2637  ;;  %v1372_v35 = vand.u32 2147483647, %v4207_v34  ;;  %v1378_v53 = vmul.f32 -0.5, %v4237_v24  ;;  %v4283_v6 = vmul.f32 %v2971_v48, %v389_v28  ;;  %v4286_v29 = vmul.f32 %v1831_v16, %v4122_v33 }
 0x1b3   :  { %v1096_v49 = vadd.f32 1.0, %v4270_v59  ;;  %v1800_v18 = vcvt.s32.f32 %v1736_v20  ;;  %v5494_v23 = vmax.f32 %v4037_v42, 0.0  ;;  %v4295_v63 = vmul.f32 %v1656_v26, %v4153_v54 }
 0x1b4   :  { %5493 = vst [vmem:[#allocation61_spill] sm:$0xff] %v4286_v29  ;;  %v4290_v44 = vpop.eup %2639  ;;  %v1593_v52 = vunpack.c.2.s8 %v3979_v51  ;;  %v777_v60 = vsub.f32 0.0, %v713_v31  ;;  %v1368_v28 = vmul.f32 0.6931472, %v2638_v37  ;;  %v1371_v16 = vmul.f32 %v4207_v34, %v1370_v10 }
 0x1b5   :  { %v1511_v14 = vadd.f32 %v1095_v38, %v5494_v23  ;;  %v892_v41 = vmul.f32 1.442695, %v776_v15  ;;  %v682_v2 = vand.u32 2147483647, %v4283_v6  ;;  %v4301_v40 = vadd.f32 %v4173_v45, %v1928_v55  ;;  %v478_v15 = vpop.f32.mrf.mxu1 }
 0x1b6   :  { %v4304_v20 = vadd.f32 %v4183_v43, %v2124_v8  ;;  %vm4306_vm7 = vcmp.lt.f32.partialorder %v1372_v35, 0.0004427343  ;;  %v1379_v26 = vadd.f32 1.0, %v1378_v53  ;;  %v1381_v31 = vand.u32 2147483647, %v4237_v24 }
 0x1b7   :  { %v2642_v38 = vpop.eup %2641  ;;  %2643 = vlog2.f32 %v1096_v49  ;;  %v4312_v34 = vmul.f32 %v1800_v18, %v4153_v54  ;;  %v1105_v10 = vadd.f32 1.0, %v4290_v44  ;;  %v1929_v45 = vsub.f32 %v1511_v14, %v4210_v11 }
 0x1b8   :  { %v2125_v43 = vsub.f32 %v1511_v14, %v4213_v30  ;;  %v1737_v35 = vunpack.c.2.s8 %v4005_v56  ;;  %v894_v8 = vmul.f32 1.442695, %v777_v60  ;;  %v1374_v53 = vsel %vm4306_vm7, %v1371_v16, %v1368_v28 }
 0x1b9   :  { %2645 = vpow2.f32 %v892_v41  ;;  %v1624_v55 = vunpack.c.2.s8 %v4026_v17  ;;  %v746_v37 = vsub.f32 0.0, %v682_v2  ;;  %v1377_v49 = vmul.f32 0.6931472, %v2642_v38 }
 0x1ba   :  { %v1380_v18 = vmul.f32 %v4237_v24, %v1379_v26  ;;  %v1099_v23 = vmul.f32 -0.5, %v4270_v59  ;;  %v4324_v61 = vmul.f32 %v2971_v48, %v478_v15  ;;  %vm4326_vm8 = vcmp.lt.f32.partialorder %v1381_v31, 0.0004427343 }
 0x1bb   :  { %2647 = vlog2.f32 %v1105_v10  ;;  %v1657_v30 = vcvt.s32.f32 %v1593_v52  ;;  %v1768_v14 = vunpack.c.2.s8 %v4034_v36  ;;  %v5499_v41 = vmax.f32 %v4093_v32, 0.0 }
 0x1bc   :  { %v1801_v24 = vcvt.s32.f32 %v1737_v35  ;;  %2649 = vpow2.f32 %v894_v8  ;;  %v4337_v16 = vadd.f32 %v4194_v57, %v1929_v45  ;;  %v1102_v42 = vand.u32 2147483647, %v4270_v59 }
 0x1bd   :  { %v4333_v60 = vadd.f32 %v1374_v53, %v5499_v41  ;;  %v2644_v28 = vpop.eup %2643  ;;  %v1688_v26 = vcvt.s32.f32 %v1624_v55  ;;  %v832_v38 = vmul.f32 1.442695, %v746_v37  ;;  %v4341_v52 = vadd.f32 %v4200_v13, %v2125_v43  ;;  %v429_v53 = vpop.f32.mrf.mxu2 }
 0x1be   :  { %v1383_v32 = vsel %vm4326_vm8, %v1380_v18, %v1377_v49  ;;  %v1100_v31 = vadd.f32 1.0, %v1099_v23  ;;  %v683_v10 = vand.u32 2147483647, %v4324_v61  ;;  %v1108_v35 = vmul.f32 -0.5, %v4290_v44 }
 0x1bf   :  { %5500 = vst [vmem:[#allocation62_spill] sm:$0xff] %v4333_v60  ;;  %v4346_v15 = vpop.eup %2645  ;;  %v4350_v57 = vmul.f32 %v1657_v30, %v4180_v7  ;;  %v1832_v8 = vcvt.s32.f32 %v1768_v14  ;;  %v1098_v55 = vmul.f32 0.6931472, %v2644_v28  ;;  %v4358_v37 = vmul.f32 %v1801_v24, %v4180_v7 }
 0x1c0   :  { %v5501_v18 = vmax.f32 %v4122_v33, 0.0  ;;  %vm4364_vm9 = vcmp.lt.f32.partialorder %v1102_v42, 0.0004427343  ;;  %v4369_v30 = vmul.f32 %v1688_v26, %v4235_v46  ;;  %2651 = vpow2.f32 %v832_v38 }
 0x1c1   :  { %v2648_v49 = vpop.eup %2647  ;;  %v1101_v41 = vmul.f32 %v4270_v59, %v1100_v31  ;;  %v1384_v24 = vadd.f32 1.0, %v4346_v15  ;;  %v747_v28 = vsub.f32 0.0, %v683_v10  ;;  %v4376_v43 = vmul.f32 %v2971_v48, %v429_v53 }
 0x1c2   :  { %v4362_v23 = vadd.f32 %v1383_v32, %v5501_v18  ;;  %5505 = vst [vmem:[#allocation64_spill] sm:$0xff] %v4369_v30  ;;  %v4371_v14 = vpop.eup %2649  ;;  %v1109_v33 = vadd.f32 1.0, %v1108_v35  ;;  %v4379_v42 = vmul.f32 %v1832_v8, %v4235_v46  ;;  %v1625_v26 = vunpack.c.2.s8 %v4079_v50  ;;  %v518_v18 = vpop.f32.mrf.mxu3 }
 0x1c3   :  { %v1104_v38 = vsel %vm4364_vm9, %v1101_v41, %v1098_v55  ;;  %v1111_v59 = vand.u32 2147483647, %v4290_v44  ;;  %v1769_v31 = vunpack.c.2.s8 %v4084_v9  ;;  %v1594_v10 = vunpack.c.3.s8 %v3925_v25 }
 0x1c4   :  { %5502 = vst [vmem:[#allocation63_spill] sm:$0xff] %v4362_v23  ;;  %v1107_v53 = vmul.f32 0.6931472, %v2648_v49  ;;  %v1393_v8 = vadd.f32 1.0, %v4371_v14  ;;  %v1738_v13 = vunpack.c.3.s8 %v3942_v62  ;;  %2653 = vlog2.f32 %v1384_v24 }
 0x1c5   :  { %5506 = vst [vmem:[#allocation65_spill] sm:$0xff] %v4379_v42  ;;  %v834_v32 = vmul.f32 1.442695, %v747_v28  ;;  %v714_v45 = vand.u32 2147483647, %v4376_v43  ;;  %v4394_v55 = vmul.f32 %v2971_v48, %v518_v18  ;;  %v5507_v41 = vmax.f32 %v4153_v54, 0.0 }
 0x1c6   :  { %v4396_v11 = vpop.eup %2651  ;;  %v1110_v2 = vmul.f32 %v4290_v44, %v1109_v33  ;;  %v1387_v49 = vmul.f32 -0.5, %v4346_v15  ;;  %v1689_v35 = vcvt.s32.f32 %v1625_v26  ;;  %vm4402_vm10 = vcmp.lt.f32.partialorder %v1111_v59, 0.0004427343 }
 0x1c7   :  { %v1512_v25 = vadd.f32 %v1104_v38, %v5507_v41  ;;  %v1390_v62 = vand.u32 2147483647, %v4346_v15  ;;  %v1833_v24 = vcvt.s32.f32 %v1769_v31  ;;  %v1658_v28 = vcvt.s32.f32 %v1594_v10  ;;  %v392_v41 = vpop.f32.mrf.mxu0 }
 0x1c8   :  { %v1113_v18 = vsel %vm4402_vm10, %v1110_v2, %v1107_v53  ;;  %2655 = vlog2.f32 %v1393_v8  ;;  %v1396_v54 = vmul.f32 -0.5, %v4371_v14  ;;  %v1802_v38 = vcvt.s32.f32 %v1738_v13 }
 0x1c9   :  { %v1114_v44 = vadd.f32 1.0, %v4396_v11  ;;  %2657 = vpow2.f32 %v834_v32  ;;  %v778_v33 = vsub.f32 0.0, %v714_v45  ;;  %v715_v26 = vand.u32 2147483647, %v4394_v55 }
 0x1ca   :  { %v1930_v31 = vsub.f32 %v1512_v25, %v4295_v63  ;;  %v1388_v10 = vadd.f32 1.0, %v1387_v49  ;;  %v4416_v5 = vmul.f32 %v1689_v35, %v4252_v39  ;;  %v2654_v2 = vpop.eup %2653  ;;  %v5511_v53 = vmax.f32 %v4180_v7, 0.0 }
 0x1cb   :  { %v4421_v8 = vmul.f32 %v1833_v24, %v4252_v39  ;;  %v4425_v32 = vmul.f32 %v2971_v48, %v392_v41  ;;  %v2126_v59 = vsub.f32 %v1512_v25, %v4312_v34  ;;  %vm4428_vm11 = vcmp.lt.f32.partialorder %v1390_v62, 0.0004427343 }
 0x1cc   :  { %5510 = vst [vmem:[#allocation66_spill] sm:$0xff] %v4416_v5  ;;  %v1513_v13 = vadd.f32 %v1113_v18, %v5511_v53  ;;  %v4433_v35 = vmul.f32 %v1658_v28, %v4283_v6  ;;  %v4436_v7 = vmul.f32 %v1802_v38, %v4283_v6  ;;  %v1397_v49 = vadd.f32 1.0, %v1396_v54  ;;  %v481_v53 = vpop.f32.mrf.mxu1 }
 0x1cd   :  { %5512 = vst [vmem:[#allocation67_spill] sm:$0xff] %v4421_v8  ;;  %2659 = vlog2.f32 %v1114_v44  ;;  %v896_v24 = vmul.f32 1.442695, %v778_v33  ;;  %v779_v18 = vsub.f32 0.0, %v715_v26  ;;  %v4439_v41 = vadd.f32 %v4301_v40, %v1930_v31 }
 0x1ce   :  { %v2656_v45 = vpop.eup %2655  ;;  %v1386_v34 = vmul.f32 0.6931472, %v2654_v2  ;;  %v1389_v25 = vmul.f32 %v4346_v15, %v1388_v10  ;;  %v684_v62 = vand.u32 2147483647, %v4425_v32  ;;  %v1931_v28 = vsub.f32 %v1513_v13, %v4350_v57 }
 0x1cf   :  { %v4443_v29 = vpop.eup %2657  ;;  %v1399_v38 = vand.u32 2147483647, %v4371_v14  ;;  %v1595_v54 = vunpack.c.3.s8 %v3979_v51  ;;  %v1739_v44 = vunpack.c.3.s8 %v4005_v56  ;;  %v4450_v33 = vadd.f32 %v4304_v20, %v2126_v59 }
 0x1d0   :  { %v1117_v40 = vmul.f32 -0.5, %v4396_v11  ;;  %v619_v26 = vmax.f32 %v4324_v61, 0.0  ;;  %v4455_v15 = vmul.f32 %v2971_v48, %v481_v53  ;;  %v2127_v31 = vsub.f32 %v1513_v13, %v4358_v37 }
 0x1d1   :  { %v1398_v57 = vmul.f32 %v4371_v14, %v1397_v49  ;;  %2661 = vpow2.f32 %v896_v24  ;;  %v898_v10 = vmul.f32 1.442695, %v779_v18  ;;  %v1392_v51 = vsel %vm4428_vm11, %v1389_v25, %v1386_v34 }
 0x1d2   :  { %v1395_v56 = vmul.f32 0.6931472, %v2656_v45  ;;  %v1123_v20 = vadd.f32 1.0, %v4443_v29  ;;  %v748_v59 = vsub.f32 0.0, %v684_v62  ;;  %v4463_v23 = vadd.f32 %v4337_v16, %v1931_v28 }
 0x1d3   :  { %v2660_v2 = vpop.eup %2659  ;;  %vm4465_vm12 = vcmp.lt.f32.partialorder %v1399_v38, 0.0004427343  ;;  %v1659_v37 = vcvt.s32.f32 %v1595_v54  ;;  %v1803_v13 = vcvt.s32.f32 %v1739_v44  ;;  %v1118_v14 = vadd.f32 1.0, %v1117_v40 }
 0x1d4   :  { %v1626_v49 = vunpack.c.3.s8 %v4026_v17  ;;  %v1770_v63 = vunpack.c.3.s8 %v4034_v36  ;;  %v685_v45 = vand.u32 2147483647, %v4455_v15  ;;  %v4473_v24 = vadd.f32 %v4341_v52, %v2127_v31 }
 0x1d5   :  { %v5517_v18 = vmax.f32 %v4235_v46, 0.0  ;;  %v1120_v34 = vand.u32 2147483647, %v4396_v11  ;;  %2663 = vpow2.f32 %v898_v10  ;;  %v1401_v25 = vsel %vm4465_vm12, %v1398_v57, %v1395_v56 }
 0x1d6   :  { %v1116_v62 = vmul.f32 0.6931472, %v2660_v2  ;;  %2665 = vlog2.f32 %v1123_v20  ;;  %v836_v17 = vmul.f32 1.442695, %v748_v59  ;;  %v1126_v36 = vmul.f32 -0.5, %v4443_v29  ;;  %v432_v59 = vpop.f32.mrf.mxu2 }
 0x1d7   :  { %v4477_v16 = vadd.f32 %v1392_v51, %v5517_v18  ;;  %v4482_v28 = vpop.eup %2661  ;;  %v4486_v52 = vmul.f32 %v1659_v37, %v4324_v61  ;;  %v4489_v46 = vmul.f32 %v1803_v13, %v4324_v61  ;;  %v1119_v54 = vmul.f32 %v4396_v11, %v1118_v14  ;;  %v394_v11 = vpop.f32.mrf.mxu0 }
 0x1d8   :  { %v1690_v44 = vcvt.s32.f32 %v1626_v49  ;;  %v1834_v40 = vcvt.s32.f32 %v1770_v63  ;;  %v749_v31 = vsub.f32 0.0, %v685_v45  ;;  %v5519_v10 = vmax.f32 %v4252_v39, 0.0  ;;  %v4512_v39 = vld [vmem:[%s5257_s3 + $0x30] sm:$0xff] }
 0x1d9   :  { %5518 = vst [vmem:[#allocation68_spill] sm:$0xff] %v4477_v16  ;;  %vm4499_vm13 = vcmp.lt.f32.partialorder %v1120_v34, 0.0004427343  ;;  %v1627_v20 = vunpack.c.3.s8 %v4079_v50  ;;  %v1402_v53 = vadd.f32 1.0, %v4482_v28  ;;  %2667 = vpow2.f32 %v836_v17 }
 0x1da   :  { %v4497_v51 = vadd.f32 %v1401_v25, %v5519_v10  ;;  %v1122_v2 = vsel %vm4499_vm13, %v1119_v54, %v1116_v62  ;;  %v1127_v13 = vadd.f32 1.0, %v1126_v36  ;;  %v1129_v50 = vand.u32 2147483647, %v4443_v29 }
 0x1db   :  { %v4514_v37 = vpop.eup %2663  ;;  %v1771_v49 = vunpack.c.3.s8 %v4084_v9  ;;  %v4520_v45 = vmul.f32 %v1690_v44, %v4376_v43  ;;  %v4523_v18 = vmul.f32 %v1834_v40, %v4376_v43  ;;  %v838_v34 = vmul.f32 1.442695, %v749_v31  ;;  %v4536_v44 = vld [vmem:[%s5258_s4 + $0x30] sm:$0xff]  ;;  %v521_v40 = vpop.f32.mrf.mxu3 }
 0x1dc   :  { %5520 = vst [vmem:[#allocation69_spill] sm:$0xff] %v4497_v51  ;;  %v2666_v63 = vpop.eup %2665  ;;  %v4526_v25 = vmul.f32 %v2971_v48, %v432_v59  ;;  %v5525_v17 = vmax.f32 %v4283_v6, 0.0  ;;  %v1691_v54 = vcvt.s32.f32 %v1627_v20  ;;  %v1596_v9 = vunpack.c.0.s8 %v4512_v39 }
 0x1dd   :  { %5523 = vst [vmem:[#allocation70_spill] sm:$0xff] %v4520_v45  ;;  %2669 = vlog2.f32 %v1402_v53  ;;  %v1405_v10 = vmul.f32 -0.5, %v4482_v28  ;;  %v1411_v56 = vadd.f32 1.0, %v4514_v37  ;;  %v1125_v59 = vmul.f32 0.6931472, %v2666_v63 }
 0x1de   :  { %5524 = vst [vmem:[#allocation71_spill] sm:$0xff] %v4523_v18  ;;  %v1514_v36 = vadd.f32 %v1122_v2, %v5525_v17  ;;  %v1128_v6 = vmul.f32 %v4443_v29, %v1127_v13  ;;  %vm4543_vm14 = vcmp.lt.f32.partialorder %v1129_v50, 0.0004427343  ;;  %v1835_v2 = vcvt.s32.f32 %v1771_v49 }
 0x1df   :  { %v4547_v17 = vpop.eup %2667  ;;  %v1740_v62 = vunpack.c.0.s8 %v4536_v44  ;;  %2671 = vpow2.f32 %v838_v34  ;;  %v716_v31 = vand.u32 2147483647, %v4526_v25  ;;  %v4552_v53 = vmul.f32 %v2971_v48, %v521_v40  ;;  %v4564_v34 = vld [vmem:[%s5257_s3 + $0x38] sm:$0xff] }
 0x1e0   :  { %v1932_v63 = vsub.f32 %v1514_v36, %v4433_v35  ;;  %v4556_v29 = vmul.f32 %v1691_v54, %v4394_v55  ;;  %v1660_v50 = vcvt.s32.f32 %v1596_v9  ;;  %v2128_v49 = vsub.f32 %v1514_v36, %v4436_v7 }
 0x1e1   :  { %v1406_v57 = vadd.f32 1.0, %v1405_v10  ;;  %v1408_v14 = vand.u32 2147483647, %v4482_v28  ;;  %2673 = vlog2.f32 %v1411_v56  ;;  %v1131_v35 = vsel %vm4543_vm14, %v1128_v6, %v1125_v59 }
 0x1e2   :  { %5528 = vst [vmem:[#allocation72_spill] sm:$0xff] %v4556_v29  ;;  %v1414_v54 = vmul.f32 -0.5, %v4514_v37  ;;  %v1132_v40 = vadd.f32 1.0, %v4547_v17  ;;  %v4571_v9 = vmul.f32 %v2971_v48, %v394_v11  ;;  %v4574_v36 = vmul.f32 %v1835_v2, %v4394_v55  ;;  %v4587_v11 = vld [vmem:[%s5258_s4 + $0x38] sm:$0xff]  ;;  %v483_v2 = vpop.f32.mrf.mxu1 }
 0x1e3   :  { %v2670_v7 = vpop.eup %2669  ;;  %v1804_v10 = vcvt.s32.f32 %v1740_v62  ;;  %v780_v56 = vsub.f32 0.0, %v716_v31  ;;  %v717_v13 = vand.u32 2147483647, %v4552_v53  ;;  %v4578_v38 = vadd.f32 %v4439_v41, %v1932_v63  ;;  %v434_v63 = vpop.f32.mrf.mxu2 }
 0x1e4   :  { %5529 = vst [vmem:[#allocation73_spill] sm:$0xff] %v4574_v36  ;;  %v4581_v59 = vmul.f32 %v1660_v50, %v4425_v32  ;;  %v1597_v6 = vunpack.c.0.s8 %v4564_v34  ;;  %v686_v20 = vand.u32 2147483647, %v4571_v9  ;;  %v4593_v31 = vadd.f32 %v4450_v33, %v2128_v49 }
 0x1e5   :  { %v4590_v62 = vpop.eup %2671  ;;  %v1515_v41 = vadd.f32 %v1131_v35, %v619_v26  ;;  %vm4597_vm15 = vcmp.lt.f32.partialorder %v1408_v14, 0.0004427343  ;;  %v1417_v50 = vand.u32 2147483647, %v4514_v37  ;;  %v1404_v8 = vmul.f32 0.6931472, %v2670_v7 }
 0x1e6   :  { %v1407_v5 = vmul.f32 %v4482_v28, %v1406_v57  ;;  %v1415_v51 = vadd.f32 1.0, %v1414_v54  ;;  %2675 = vlog2.f32 %v1132_v40  ;;  %v1741_v30 = vunpack.c.0.s8 %v4587_v11  ;;  %v4622_v40 = vld [vmem:[%s5257_s3 + $0x70] sm:$0xff] }
 0x1e7   :  { %v2674_v42 = vpop.eup %2673  ;;  %v900_v16 = vmul.f32 1.442695, %v780_v56  ;;  %v781_v33 = vsub.f32 0.0, %v717_v13  ;;  %v4605_v49 = vmul.f32 %v2971_v48, %v483_v2  ;;  %v4608_v61 = vmul.f32 %v1804_v10, %v4425_v32  ;;  %v4627_v7 = vld [vmem:[%s5258_s4 + $0x70] sm:$0xff] }
 0x1e8   :  { %v1141_v14 = vadd.f32 1.0, %v4590_v62  ;;  %v750_v35 = vsub.f32 0.0, %v686_v20  ;;  %v1933_v28 = vsub.f32 %v1515_v41, %v4486_v52  ;;  %v2129_v57 = vsub.f32 %v1515_v41, %v4489_v46 }
 0x1e9   :  { %vm4614_vm0 = vcmp.lt.f32.partialorder %v1417_v50, 0.0004427343  ;;  %v1135_v13 = vmul.f32 -0.5, %v4547_v17  ;;  %v1410_v52 = vsel %vm4597_vm15, %v1407_v5, %v1404_v8  ;;  %v1413_v46 = vmul.f32 0.6931472, %v2674_v42 }
 0x1ea   :  { %v1416_v10 = vmul.f32 %v4514_v37, %v1415_v51  ;;  %v1661_v56 = vcvt.s32.f32 %v1597_v6  ;;  %v1805_v20 = vcvt.s32.f32 %v1741_v30  ;;  %2677 = vpow2.f32 %v900_v16 }
 0x1eb   :  { %v902_v2 = vmul.f32 1.442695, %v781_v33  ;;  %v687_v41 = vand.u32 2147483647, %v4605_v49  ;;  %2679 = vlog2.f32 %v1141_v14  ;;  %v1628_v26 = vunpack.c.0.s8 %v4622_v40 }
 0x1ec   :  { %v2676_v50 = vpop.eup %2675  ;;  %v1772_v12 = vunpack.c.0.s8 %v4627_v7  ;;  %v840_v3 = vmul.f32 1.442695, %v750_v35  ;;  %v4636_v60 = vadd.f32 %v4463_v23, %v1933_v28  ;;  %v4639_v42 = vadd.f32 %v4473_v24, %v2129_v57  ;;  %v4664_v57 = vld [vmem:[%s5258_s4 + $0x78] sm:$0xff] }
 0x1ed   :  { %v5534_v5 = vmax.f32 %v4376_v43, 0.0  ;;  %v1136_v8 = vadd.f32 1.0, %v1135_v13  ;;  %v1419_v16 = vsel %vm4614_vm0, %v1416_v10, %v1413_v46  ;;  %v1138_v51 = vand.u32 2147483647, %v4547_v17  ;;  %v4656_v43 = vld [vmem:[%s5257_s3 + $0x78] sm:$0xff]  ;;  %s2787_s3 = smov [#allocation4]  }
 0x1ee   :  { %v4649_v37 = vmul.f32 %v1661_v56, %v4455_v15  ;;  %v751_v6 = vsub.f32 0.0, %v687_v41  ;;  %v1134_v23 = vmul.f32 0.6931472, %v2676_v50  ;;  %v1144_v33 = vmul.f32 -0.5, %v4590_v62  ;;  %s2241_s4 = sshll.u32 %s2787_s3, 4  ;;  %s2242_s4 = int_to_ptr.vmem [resolvable:$true] %s2241_s4 }
 0x1ef   :  { %v4643_v30 = vadd.f32 %v1410_v52, %v5534_v5  ;;  %2681 = vpow2.f32 %v902_v2  ;;  %v4659_v14 = vmul.f32 %v1805_v20, %v4455_v15  ;;  %v1692_v35 = vcvt.s32.f32 %v1628_v26 }
 0x1f0   :  { %v1836_v28 = vcvt.s32.f32 %v1772_v12  ;;  %2683 = vpow2.f32 %v840_v3  ;;  %v4666_v54 = vpop.eup %2677  ;;  %v5536_v52 = vmax.f32 %v4394_v55, 0.0  ;;  %v1137_v10 = vmul.f32 %v4547_v17, %v1136_v8 }
 0x1f1   :  { %5535 = vst [vmem:[#allocation74_spill] sm:$0xff] %v4643_v30  ;;  %v4676_v26 = vmul.f32 %v2971_v48, %v434_v63  ;;  %v2680_v12 = vpop.eup %2679  ;;  %vm4680_vm1 = vcmp.lt.f32.partialorder %v1138_v51, 0.0004427343  ;;  %v1629_v20 = vunpack.c.0.s8 %v4656_v43  ;;  %v842_v2 = vmul.f32 1.442695, %v751_v6 }
 0x1f2   :  { %v4672_v46 = vadd.f32 %v1419_v16, %v5536_v52  ;;  %v1140_v55 = vsel %vm4680_vm1, %v1137_v10, %v1134_v23  ;;  %v1145_v41 = vadd.f32 1.0, %v1144_v33  ;;  %v1773_v17 = vunpack.c.0.s8 %v4664_v57 }
 0x1f3   :  { %v1598_v50 = vunpack.c.1.s8 %v4512_v39  ;;  %v1147_v5 = vand.u32 2147483647, %v4590_v62  ;;  %v1420_v8 = vadd.f32 1.0, %v4666_v54  ;;  %v4692_v16 = vmul.f32 %v1692_v35, %v4526_v25 }
 0x1f4   :  { %5537 = vst [vmem:[#allocation75_spill] sm:$0xff] %v4672_v46  ;;  %v4695_v51 = vmul.f32 %v1836_v28, %v4526_v25  ;;  %v1143_v23 = vmul.f32 0.6931472, %v2680_v12  ;;  %v718_v52 = vand.u32 2147483647, %v4676_v26  ;;  %v5541_v3 = vmax.f32 %v4425_v32, 0.0  ;;  %v523_v28 = vpop.f32.mrf.mxu3 }
 0x1f5   :  { %v4697_v63 = vpop.eup %2681  ;;  %v1693_v35 = vcvt.s32.f32 %v1629_v20  ;;  %v1742_v13 = vunpack.c.1.s8 %v4536_v44  ;;  %2685 = vpow2.f32 %v842_v2  ;;  %v1146_v6 = vmul.f32 %v4590_v62, %v1145_v41  ;;  %v397_v62 = vpop.f32.mrf.mxu0 }
 0x1f6   :  { %5540 = vst [vmem:[#allocation76_spill] sm:$0xff] %v4695_v51  ;;  %v4703_v10 = vpop.eup %2683  ;;  %v1516_v56 = vadd.f32 %v1140_v55, %v5541_v3  ;;  %v1837_v12 = vcvt.s32.f32 %v1773_v17  ;;  %v1662_v29 = vcvt.s32.f32 %v1598_v50  ;;  %vm4711_vm2 = vcmp.lt.f32.partialorder %v1147_v5, 0.0004427343 }
 0x1f7   :  { %2687 = vlog2.f32 %v1420_v8  ;;  %v1423_v32 = vmul.f32 -0.5, %v4666_v54  ;;  %v1429_v20 = vadd.f32 1.0, %v4697_v63  ;;  %v1149_v2 = vsel %vm4711_vm2, %v1146_v6, %v1143_v23 }
 0x1f8   :  { %v1150_v55 = vadd.f32 1.0, %v4703_v10  ;;  %v782_v3 = vsub.f32 0.0, %v718_v52  ;;  %v4721_v24 = vmul.f32 %v2971_v48, %v523_v28  ;;  %v1934_v41 = vsub.f32 %v1516_v56, %v4581_v59 }
 0x1f9   :  { %v1426_v17 = vand.u32 2147483647, %v4666_v54  ;;  %v4726_v50 = vmul.f32 %v1693_v35, %v4552_v53  ;;  %v1806_v5 = vcvt.s32.f32 %v1742_v13  ;;  %v2130_v8 = vsub.f32 %v1516_v56, %v4608_v61 }
 0x1fa   :  { %v4730_v33 = vmul.f32 %v1837_v12, %v4552_v53  ;;  %v4734_v23 = vmul.f32 %v1662_v29, %v4571_v9  ;;  %v5546_v59 = vmax.f32 %v4455_v15, 0.0  ;;  %2689 = vlog2.f32 %v1429_v20 }
 0x1fb   :  { %5544 = vst [vmem:[#allocation77_spill] sm:$0xff] %v4726_v50  ;;  %v4736_v52 = vpop.eup %2685  ;;  %v1432_v35 = vmul.f32 -0.5, %v4697_v63  ;;  %v4742_v13 = vmul.f32 %v2971_v48, %v397_v62  ;;  %v1424_v61 = vadd.f32 1.0, %v1423_v32  ;;  %2691 = vlog2.f32 %v1150_v55  ;;  %v486_v62 = vpop.f32.mrf.mxu1 }
 0x1fc   :  { %5545 = vst [vmem:[#allocation78_spill] sm:$0xff] %v4730_v33  ;;  %v1517_v28 = vadd.f32 %v1149_v2, %v5546_v59  ;;  %v904_v56 = vmul.f32 1.442695, %v782_v3  ;;  %v719_v12 = vand.u32 2147483647, %v4721_v24  ;;  %v4746_v29 = vadd.f32 %v4578_v38, %v1934_v41 }
 0x1fd   :  { %v2688_v6 = vpop.eup %2687  ;;  %vm4748_vm3 = vcmp.lt.f32.partialorder %v1426_v17, 0.0004427343  ;;  %v4753_v15 = vmul.f32 %v1806_v5, %v4571_v9  ;;  %v1599_v20 = vunpack.c.1.s8 %v4564_v34  ;;  %v1435_v2 = vand.u32 2147483647, %v4697_v63 }
 0x1fe   :  { %v1159_v32 = vadd.f32 1.0, %v4736_v52  ;;  %v1743_v55 = vunpack.c.1.s8 %v4587_v11  ;;  %v688_v3 = vand.u32 2147483647, %v4742_v13  ;;  %v4761_v38 = vadd.f32 %v4593_v31, %v2130_v8 }
 0x1ff   :  { %v1935_v41 = vsub.f32 %v1517_v28, %v4649_v37  ;;  %v1433_v17 = vadd.f32 1.0, %v1432_v35  ;;  %v1153_v5 = vmul.f32 -0.5, %v4703_v10  ;;  %v1422_v59 = vmul.f32 0.6931472, %v2688_v6 }
 0x200   :  { %v1425_v46 = vmul.f32 %v4666_v54, %v1424_v61  ;;  %2693 = vpow2.f32 %v904_v56  ;;  %v783_v18 = vsub.f32 0.0, %v719_v12  ;;  %v2690_v45 = vpop.eup %2689  ;;  %v2131_v30 = vsub.f32 %v1517_v28, %v4659_v14 }
 0x201   :  { %v623_v4 = vmax.f32 %v4605_v49, 0.0  ;;  %v1663_v22 = vcvt.s32.f32 %v1599_v20  ;;  %v4769_v19 = vmul.f32 %v2971_v48, %v486_v62  ;;  %v2692_v31 = vpop.eup %2691  ;;  %vm4771_vm4 = vcmp.lt.f32.partialorder %v1435_v2, 0.0004427343 }
 0x202   :  { %2695 = vlog2.f32 %v1159_v32  ;;  %v1807_v8 = vcvt.s32.f32 %v1743_v55  ;;  %v752_v6 = vsub.f32 0.0, %v688_v3  ;;  %v4776_v54 = vadd.f32 %v4636_v60, %v1935_v41 }
 0x203   :  { %v1434_v35 = vmul.f32 %v4697_v63, %v1433_v17  ;;  %v1154_v14 = vadd.f32 1.0, %v1153_v5  ;;  %v1156_v28 = vand.u32 2147483647, %v4703_v10  ;;  %v1428_v61 = vsel %vm4748_vm3, %v1425_v46, %v1422_v59 }
 0x204   :  { %v1431_v56 = vmul.f32 0.6931472, %v2690_v45  ;;  %v1630_v12 = vunpack.c.1.s8 %v4622_v40  ;;  %v906_v20 = vmul.f32 1.442695, %v783_v18  ;;  %v4784_v2 = vadd.f32 %v4639_v42, %v2131_v30 }
 0x205   :  { %v1152_v32 = vmul.f32 0.6931472, %v2692_v31  ;;  %v1162_v55 = vmul.f32 -0.5, %v4736_v52  ;;  %v689_v60 = vand.u32 2147483647, %v4769_v19  ;;  %v4791_v63 = vmul.f32 %v1663_v22, %v4605_v49 }
 0x206   :  { %v4788_v3 = vpop.eup %2693  ;;  %v4794_v36 = vmul.f32 %v1807_v8, %v4605_v49  ;;  %v1774_v45 = vunpack.c.1.s8 %v4627_v7  ;;  %v844_v46 = vmul.f32 1.442695, %v752_v6  ;;  %v5551_v18 = vmax.f32 %v4526_v25, 0.0 }
 0x207   :  { %v1155_v30 = vmul.f32 %v4703_v10, %v1154_v14  ;;  %vm4802_vm5 = vcmp.lt.f32.partialorder %v1156_v28, 0.0004427343  ;;  %v1437_v17 = vsel %vm4771_vm4, %v1434_v35, %v1431_v56  ;;  %v1694_v5 = vcvt.s32.f32 %v1630_v12  ;;  %v488_v35 = vpop.f32.mrf.mxu1 }
 0x208   :  { %v4799_v42 = vadd.f32 %v1428_v61, %v5551_v18  ;;  %v2696_v22 = vpop.eup %2695  ;;  %2697 = vpow2.f32 %v906_v20  ;;  %v1631_v59 = vunpack.c.1.s8 %v4656_v43  ;;  %v1163_v31 = vadd.f32 1.0, %v1162_v55 }
 0x209   :  { %v1158_v25 = vsel %vm4802_vm5, %v1155_v30, %v1152_v32  ;;  %v1438_v10 = vadd.f32 1.0, %v4788_v3  ;;  %v753_v8 = vsub.f32 0.0, %v689_v60  ;;  %v1165_v6 = vand.u32 2147483647, %v4736_v52 }
 0x20a   :  { %v1838_v14 = vcvt.s32.f32 %v1774_v45  ;;  %v1775_v28 = vunpack.c.1.s8 %v4664_v57  ;;  %2699 = vpow2.f32 %v844_v46  ;;  %v5554_v61 = vmax.f32 %v4552_v53, 0.0 }
 0x20b   :  { %v1161_v12 = vmul.f32 0.6931472, %v2696_v22  ;;  %v5556_v20 = vmax.f32 %v4571_v9, 0.0  ;;  %v1695_v60 = vcvt.s32.f32 %v1631_v59  ;;  %v1600_v45 = vunpack.c.2.s8 %v4512_v39  ;;  %v437_v59 = vpop.f32.mrf.mxu2 }
 0x20c   :  { %v4821_v56 = vadd.f32 %v1437_v17, %v5554_v61  ;;  %v1164_v46 = vmul.f32 %v4736_v52, %v1163_v31  ;;  %2701 = vlog2.f32 %v1438_v10  ;;  %v4829_v18 = vmul.f32 %v1694_v5, %v4676_v26  ;;  %v399_v61 = vpop.f32.mrf.mxu0 }
 0x20d   :  { %v1518_v32 = vadd.f32 %v1158_v25, %v5556_v20  ;;  %v846_v30 = vmul.f32 1.442695, %v753_v8  ;;  %vm4833_vm6 = vcmp.lt.f32.partialorder %v1165_v6, 0.0004427343  ;;  %v1441_v9 = vmul.f32 -0.5, %v4788_v3 }
 0x20e   :  { %5555 = vst [vmem:[#allocation79_spill] sm:$0xff] %v4821_v56  ;;  %v4831_v62 = vpop.eup %2697  ;;  %v4839_v22 = vmul.f32 %v1838_v14, %v4676_v26  ;;  %v1839_v17 = vcvt.s32.f32 %v1775_v28  ;;  %v1167_v25 = vsel %vm4833_vm6, %v1164_v46, %v1161_v12  ;;  %v1744_v31 = vunpack.c.2.s8 %v4536_v44 }
 0x20f   :  { %5557 = vst [vmem:[#allocation80_spill] sm:$0xff] %v4829_v18  ;;  %v1936_v8 = vsub.f32 %v1518_v32, %v4734_v23  ;;  %v2132_v6 = vsub.f32 %v1518_v32, %v4753_v15  ;;  %v4853_v14 = vmul.f32 %v1695_v60, %v4721_v24  ;;  %v1664_v28 = vcvt.s32.f32 %v1600_v45 }
 0x210   :  { %5560 = vst [vmem:[#allocation81_spill] sm:$0xff] %v4839_v22  ;;  %v4848_v10 = vpop.eup %2699  ;;  %v1447_v20 = vadd.f32 1.0, %v4831_v62  ;;  %2703 = vpow2.f32 %v846_v30  ;;  %v4858_v12 = vmul.f32 %v2971_v48, %v437_v59  ;;  %v1519_v46 = vadd.f32 %v1167_v25, %v623_v4 }
 0x211   :  { %v1442_v53 = vadd.f32 1.0, %v1441_v9  ;;  %v1444_v23 = vand.u32 2147483647, %v4788_v3  ;;  %v4864_v15 = vmul.f32 %v1839_v17, %v4721_v24  ;;  %v1450_v60 = vmul.f32 -0.5, %v4831_v62 }
 0x212   :  { %v2702_v32 = vpop.eup %2701  ;;  %v1168_v45 = vadd.f32 1.0, %v4848_v10  ;;  %v1808_v52 = vcvt.s32.f32 %v1744_v31  ;;  %v4869_v30 = vmul.f32 %v2971_v48, %v399_v61  ;;  %v4872_v59 = vadd.f32 %v4746_v29, %v1936_v8  ;;  %v526_v31 = vpop.f32.mrf.mxu3 }
 0x213   :  { %v4875_v4 = vadd.f32 %v4761_v38, %v2132_v6  ;;  %v4878_v49 = vmul.f32 %v1664_v28, %v4742_v13  ;;  %v1601_v9 = vunpack.c.2.s8 %v4564_v34  ;;  %2705 = vlog2.f32 %v1447_v20 }
 0x214   :  { %v1453_v17 = vand.u32 2147483647, %v4831_v62  ;;  %v720_v25 = vand.u32 2147483647, %v4858_v12  ;;  %v690_v61 = vand.u32 2147483647, %v4869_v30  ;;  %v1937_v29 = vsub.f32 %v1519_v46, %v4791_v63 }
 0x215   :  { %v1440_v8 = vmul.f32 0.6931472, %v2702_v32  ;;  %v1443_v38 = vmul.f32 %v4788_v3, %v1442_v53  ;;  %vm4886_vm7 = vcmp.lt.f32.partialorder %v1444_v23, 0.0004427343  ;;  %v2133_v20 = vsub.f32 %v1519_v46, %v4794_v36 }
 0x216   :  { %v4890_v28 = vpop.eup %2703  ;;  %v1451_v37 = vadd.f32 1.0, %v1450_v60  ;;  %2707 = vlog2.f32 %v1168_v45  ;;  %v1745_v5 = vunpack.c.2.s8 %v4587_v11  ;;  %v4895_v55 = vmul.f32 %v1808_v52, %v4742_v13 }
 0x217   :  { %v4898_v63 = vmul.f32 %v2971_v48, %v526_v31  ;;  %v754_v32 = vsub.f32 0.0, %v690_v61  ;;  %v4901_v3 = vmul.f32 %v2971_v48, %v488_v35  ;;  %vm4903_vm8 = vcmp.lt.f32.partialorder %v1453_v17, 0.0004427343 }
 0x218   :  { %v1665_v46 = vcvt.s32.f32 %v1601_v9  ;;  %v784_v23 = vsub.f32 0.0, %v720_v25  ;;  %v1446_v60 = vsel %vm4886_vm7, %v1443_v38, %v1440_v8  ;;  %v1171_v52 = vmul.f32 -0.5, %v4848_v10 }
 0x219   :  { %v1177_v45 = vadd.f32 1.0, %v4890_v28  ;;  %v848_v31 = vmul.f32 1.442695, %v754_v32  ;;  %v2706_v61 = vpop.eup %2705  ;;  %v4913_v35 = vadd.f32 %v4776_v54, %v1937_v29  ;;  %v4916_v17 = vadd.f32 %v4784_v2, %v2133_v20  ;;  %v439_v20 = vpop.f32.mrf.mxu2 }
 0x21a   :  { %v1452_v41 = vmul.f32 %v4831_v62, %v1451_v37  ;;  %v1809_v36 = vcvt.s32.f32 %v1745_v5  ;;  %v1632_v9 = vunpack.c.2.s8 %v4622_v40  ;;  %v721_v25 = vand.u32 2147483647, %v4898_v63 }
 0x21b   :  { %2709 = vpow2.f32 %v848_v31  ;;  %v691_v8 = vand.u32 2147483647, %v4901_v3  ;;  %v5565_v6 = vmax.f32 %v4676_v26, 0.0  ;;  %v4927_v54 = vmul.f32 %v1665_v46, %v4769_v19 }
 0x21c   :  { %v2708_v38 = vpop.eup %2707  ;;  %v908_v2 = vmul.f32 1.442695, %v784_v23  ;;  %v1776_v29 = vunpack.c.2.s8 %v4627_v7  ;;  %v1449_v37 = vmul.f32 0.6931472, %v2706_v61  ;;  %v1172_v62 = vadd.f32 1.0, %v1171_v52 }
 0x21d   :  { %v4924_v32 = vadd.f32 %v1446_v60, %v5565_v6  ;;  %2711 = vlog2.f32 %v1177_v45  ;;  %v755_v5 = vsub.f32 0.0, %v691_v8  ;;  %v1174_v31 = vand.u32 2147483647, %v4848_v10 }
 0x21e   :  { %v1180_v33 = vmul.f32 -0.5, %v4890_v28  ;;  %v4933_v50 = vmul.f32 %v1809_v36, %v4769_v19  ;;  %v1170_v60 = vmul.f32 0.6931472, %v2708_v38  ;;  %v1696_v46 = vcvt.s32.f32 %v1632_v9  ;;  %v528_v9 = vpop.f32.mrf.mxu3 }
 0x21f   :  { %5566 = vst [vmem:[#allocation82_spill] sm:$0xff] %v4924_v32  ;;  %v785_v6 = vsub.f32 0.0, %v721_v25  ;;  %v850_v23 = vmul.f32 1.442695, %v755_v5  ;;  %2713 = vpow2.f32 %v908_v2  ;;  %v1840_v52 = vcvt.s32.f32 %v1776_v29 }
 0x220   :  { %v4939_v45 = vmul.f32 %v2971_v48, %v439_v20  ;;  %v1455_v36 = vsel %vm4903_vm8, %v1452_v41, %v1449_v37  ;;  %v1173_v38 = vmul.f32 %v4848_v10, %v1172_v62  ;;  %vm4946_vm9 = vcmp.lt.f32.partialorder %v1174_v31, 0.0004427343 }
 0x221   :  { %v2710_v8 = vpop.eup %2709  ;;  %2715 = vpow2.f32 %v850_v23  ;;  %v1181_v2 = vadd.f32 1.0, %v1180_v33  ;;  %v1183_v29 = vand.u32 2147483647, %v4890_v28  ;;  %v910_v56 = vmul.f32 1.442695, %v785_v6 }
 0x222   :  { %v1186_v5 = vadd.f32 1.0, %v2710_v8  ;;  %v1176_v61 = vsel %vm4946_vm9, %v1173_v38, %v1170_v60  ;;  %v1189_v26 = vmul.f32 -0.5, %v2710_v8  ;;  %v1602_v41 = vunpack.c.3.s8 %v4512_v39 }
 0x223   :  { %v2712_v20 = vpop.eup %2711  ;;  %v4955_v10 = vmul.f32 %v1696_v46, %v4858_v12  ;;  %v722_v53 = vand.u32 2147483647, %v4939_v45  ;;  %v4959_v37 = vmul.f32 %v2971_v48, %v528_v9  ;;  %v5569_v33 = vmax.f32 %v4721_v24, 0.0 }
 0x224   :  { %2717 = vlog2.f32 %v1186_v5  ;;  %v4966_v31 = vmul.f32 %v1840_v52, %v4858_v12  ;;  %v1746_v39 = vunpack.c.3.s8 %v4536_v44  ;;  %v5570_v46 = vmax.f32 %v4742_v13, 0.0 }
 0x225   :  { %v4963_v62 = vadd.f32 %v1455_v36, %v5569_v33  ;;  %v4970_v6 = vpop.eup %2713  ;;  %v1179_v38 = vmul.f32 0.6931472, %v2712_v20  ;;  %v1182_v48 = vmul.f32 %v4890_v28, %v1181_v2  ;;  %vm4975_vm10 = vcmp.lt.f32.partialorder %v1183_v29, 0.0004427343 }
 0x226   :  { %v1520_v23 = vadd.f32 %v1176_v61, %v5570_v46  ;;  %2719 = vpow2.f32 %v910_v56  ;;  %v626_v52 = vmax.f32 %v4869_v30, 0.0  ;;  %v1190_v36 = vadd.f32 1.0, %v1189_v26 }
 0x227   :  { %v2716_v24 = vpop.eup %2715  ;;  %v1666_v25 = vcvt.s32.f32 %v1602_v41  ;;  %v1192_v5 = vand.u32 2147483647, %v2710_v8  ;;  %v786_v33 = vsub.f32 0.0, %v722_v53  ;;  %v723_v60 = vand.u32 2147483647, %v4959_v37 }
 0x228   :  { %v1195_v44 = vadd.f32 1.0, %v2716_v24  ;;  %v1456_v13 = vadd.f32 1.0, %v4970_v6  ;;  %v1462_v61 = vand.u32 2147483647, %v4970_v6  ;;  %v1810_v28 = vcvt.s32.f32 %v1746_v39 }
 0x229   :  { %v1198_v2 = vmul.f32 -0.5, %v2716_v24  ;;  %v1938_v20 = vsub.f32 %v1520_v23, %v4878_v49  ;;  %v2134_v56 = vsub.f32 %v1520_v23, %v4895_v55  ;;  %v1185_v26 = vsel %vm4975_vm10, %v1182_v48, %v1179_v38 }
 0x22a   :  { %v2718_v29 = vpop.eup %2717  ;;  %2721 = vlog2.f32 %v1195_v44  ;;  %v1191_v46 = vmul.f32 %v2710_v8, %v1190_v36  ;;  %v1603_v53 = vunpack.c.3.s8 %v4564_v34  ;;  %v1747_v22 = vunpack.c.3.s8 %v4587_v11 }
 0x22b   :  { %v1188_v41 = vmul.f32 0.6931472, %v2718_v29  ;;  %v1459_v18 = vmul.f32 -0.5, %v4970_v6  ;;  %vm1193_vm11 = vcmp.lt.f32.partialorder %v1192_v5, 0.0004427343  ;;  %v787_v32 = vsub.f32 0.0, %v723_v60 }
 0x22c   :  { %v912_v39 = vmul.f32 1.442695, %v786_v33  ;;  %v4990_v51 = vpop.eup %2719  ;;  %v5573_v49 = vmax.f32 %v4769_v19, 0.0  ;;  %v1876_v38 = vmul.f32 %v1666_v25, %v4869_v30  ;;  %v1199_v48 = vadd.f32 1.0, %v1198_v2 }
 0x22d   :  { %v1194_v23 = vsel %vm1193_vm11, %v1191_v46, %v1188_v41  ;;  %2723 = vlog2.f32 %v1456_v13  ;;  %v2072_v34 = vmul.f32 %v1810_v28, %v4869_v30  ;;  %v1201_v9 = vand.u32 2147483647, %v2716_v24 }
 0x22e   :  { %v1521_v55 = vadd.f32 %v1185_v26, %v5573_v49  ;;  %v1522_v8 = vadd.f32 %v1194_v23, %v626_v52  ;;  %v1987_v11 = vadd.f32 %v4872_v59, %v1938_v20  ;;  %v2183_v36 = vadd.f32 %v4875_v4, %v2134_v56 }
 0x22f   :  { %v1667_v5 = vcvt.s32.f32 %v1603_v53  ;;  %v1811_v60 = vcvt.s32.f32 %v1747_v22  ;;  %2725 = vpow2.f32 %v912_v39  ;;  %v914_v19 = vmul.f32 1.442695, %v787_v32 }
 0x230   :  { %v2722_v44 = vpop.eup %2721  ;;  %v1940_v33 = vsub.f32 %v1522_v8, %v1876_v38  ;;  %v2136_v29 = vsub.f32 %v1522_v8, %v2072_v34  ;;  %v1939_v26 = vsub.f32 %v1521_v55, %v4927_v54  ;;  %v2135_v25 = vsub.f32 %v1521_v55, %v4933_v50  ;;  %v5577_v55 = vld [vmem:[#allocation12_spill] sm:$0xff] }
 0x231   :  { %v1197_v13 = vmul.f32 0.6931472, %v2722_v44  ;;  %v1200_v52 = vmul.f32 %v2716_v24, %v1199_v48  ;;  %v627_v28 = vmax.f32 %v4901_v3, 0.0  ;;  %vm1202_vm12 = vcmp.lt.f32.partialorder %v1201_v9, 0.0004427343  ;;  %v5581_v34 = vld [vmem:[#allocation16_spill] sm:$0xff] }
 0x232   :  { %v1988_v2 = vadd.f32 %v1987_v11, %v1940_v33  ;;  %v2184_v30 = vadd.f32 %v2183_v36, %v2136_v29  ;;  %v1460_v59 = vadd.f32 1.0, %v1459_v18  ;;  %v1877_v22 = vmul.f32 %v1667_v5, %v4901_v3  ;;  %v5583_v11 = vld [vmem:[#allocation18_spill] sm:$0xff] }
 0x233   :  { %v1203_v4 = vsel %vm1202_vm12, %v1200_v52, %v1197_v13  ;;  %v2073_v20 = vmul.f32 %v1811_v60, %v4901_v3  ;;  %v2724_v56 = vpop.eup %2723  ;;  %v5574_v32 = vsub.f32 %v3189_v58, %v3140_v1  ;;  %v5575_v50 = vsub.f32 %v3189_v58, %v3143_v47  ;;  %v5588_v52 = vld [vmem:[#allocation24_spill] sm:$0xff] }
 0x234   :  { %v1523_v41 = vadd.f32 %v1203_v4, %v627_v28  ;;  %2727 = vpow2.f32 %v914_v19  ;;  %v2018_v46 = vadd.f32 %v4913_v35, %v1939_v26  ;;  %v2214_v18 = vadd.f32 %v4916_v17, %v2135_v25  ;;  %v5585_v19 = vld [vmem:[#allocation22_spill] sm:$0xff]  ;;  %v5586_v26 = vld [vmem:[#allocation23_spill] sm:$0xff] }
 0x235   :  { %v1989_v54 = vadd.f32 %v1988_v2, %v5574_v32  ;;  %v2185_v24 = vadd.f32 %v2184_v30, %v5575_v50  ;;  %v1633_v53 = vunpack.c.2.s8 %v4656_v43  ;;  %v1777_v39 = vunpack.c.2.s8 %v4664_v57  ;;  %v5013_v3 = vpop.eup %2725  ;;  %v5590_v30 = vld [vmem:[#allocation13_spill] sm:$0xff]  ;;  %v5591_v28 = vld [vmem:[#allocation10_spill] sm:$0xff] }
 0x236   :  { %v5576_v1 = vsub.f32 %v3238_v21, %v3161_v27  ;;  %v5578_v47 = vsub.f32 %v3238_v21, %v5577_v55  ;;  %v1941_v23 = vsub.f32 %v1523_v41, %v1877_v22  ;;  %v2137_v38 = vsub.f32 %v1523_v41, %v2073_v20  ;;  %v5593_v22 = vld [vmem:[#allocation11_spill] sm:$0xff]  ;;  %v5596_v41 = vld [vmem:[#allocation28_spill] sm:$0xff]  ;;  %v5600_v55 = vld [vmem:[#allocation17_spill] sm:$0xff] }
 0x237   :  { %v1458_v48 = vmul.f32 0.6931472, %v2724_v56  ;;  %v1461_v35 = vmul.f32 %v4970_v6, %v1460_v59  ;;  %vm5022_vm13 = vcmp.lt.f32.partialorder %v1462_v61, 0.0004427343  ;;  %v1465_v8 = vadd.f32 1.0, %v4990_v51 }
 0x238   :  { %v1990_v49 = vadd.f32 %v1989_v54, %v5576_v1  ;;  %v2186_v58 = vadd.f32 %v2185_v24, %v5578_v47  ;;  %v5582_v9 = vsub.f32 %v3399_v0, %v5581_v34  ;;  %v5584_v36 = vsub.f32 %v3399_v0, %v5583_v11  ;;  %v5595_v24 = vld [vmem:[#allocation32_spill] sm:$0xff]  ;;  %v5601_v47 = vld [vmem:[#allocation14_spill] sm:$0xff] }
 0x239   :  { %v2019_v5 = vadd.f32 %v2018_v46, %v1941_v23  ;;  %v2215_v60 = vadd.f32 %v2214_v18, %v2137_v38  ;;  %v1969_v44 = vsub.f32 %v4963_v62, %v4853_v14  ;;  %v1468_v6 = vmul.f32 -0.5, %v4990_v51  ;;  %v5603_v38 = vld [vmem:[#allocation15_spill] sm:$0xff]  ;;  %v5605_v34 = vld [vmem:[#allocation38_spill] sm:$0xff] }
 0x23a   :  { %v1991_v27 = vadd.f32 %v1990_v49, %v5582_v9  ;;  %v2187_v21 = vadd.f32 %v2186_v58, %v5584_v36  ;;  %v1697_v61 = vcvt.s32.f32 %v1633_v53  ;;  %v1474_v33 = vadd.f32 1.0, %v5013_v3  ;;  %v5037_v29 = vpop.eup %2727  ;;  %v5598_v53 = vld [vmem:[#allocation29_spill] sm:$0xff]  ;;  %v5608_v36 = vld [vmem:[#allocation35_spill] sm:$0xff] }
 0x23b   :  { %v5587_v25 = vsub.f32 %v5585_v19, %v5586_v26  ;;  %v5589_v0 = vsub.f32 %v5585_v19, %v5588_v52  ;;  %v5592_v59 = vsub.f32 %v5590_v30, %v5591_v28  ;;  %v5594_v20 = vsub.f32 %v5590_v30, %v5593_v22  ;;  %v5606_v9 = vld [vmem:[#allocation33_spill] sm:$0xff]  ;;  %v5611_v19 = vld [vmem:[#allocation19_spill] sm:$0xff] }
 0x23c   :  { %v1464_v32 = vsel %vm5022_vm13, %v1461_v35, %v1458_v48  ;;  %2729 = vlog2.f32 %v1465_v8  ;;  %v1471_v54 = vand.u32 2147483647, %v4990_v51  ;;  %v1841_v50 = vcvt.s32.f32 %v1777_v39 }
 0x23d   :  { %v1992_v13 = vadd.f32 %v1991_v27, %v5587_v25  ;;  %v2188_v2 = vadd.f32 %v2187_v21, %v5589_v0  ;;  %v2020_v4 = vadd.f32 %v2019_v5, %v5592_v59  ;;  %v2216_v56 = vadd.f32 %v2215_v60, %v5594_v20  ;;  %v5610_v60 = vld [vmem:[#allocation21_spill] sm:$0xff]  ;;  %v5616_v59 = vld [vmem:[#allocation44_spill] sm:$0xff] }
 0x23e   :  { %v5597_v46 = vsub.f32 %v5595_v24, %v5596_v41  ;;  %v5599_v1 = vsub.f32 %v5595_v24, %v5598_v53  ;;  %v5602_v58 = vsub.f32 %v5600_v55, %v5601_v47  ;;  %v5604_v17 = vsub.f32 %v5600_v55, %v5603_v38  ;;  %v5629_v38 = vld [vmem:[#allocation30_spill] sm:$0xff] }
 0x23f   :  { %v1469_v35 = vadd.f32 1.0, %v1468_v6  ;;  %2731 = vlog2.f32 %v1474_v33  ;;  %v1477_v39 = vmul.f32 -0.5, %v5013_v3  ;;  %v1483_v8 = vadd.f32 1.0, %v5037_v29 }
 0x240   :  { %v1993_v18 = vadd.f32 %v1992_v13, %v5597_v46  ;;  %v2189_v49 = vadd.f32 %v2188_v2, %v5599_v1  ;;  %v2021_v23 = vadd.f32 %v2020_v4, %v5602_v58  ;;  %v2217_v48 = vadd.f32 %v2216_v56, %v5604_v17  ;;  %v5613_v13 = vld [vmem:[#allocation20_spill] sm:$0xff]  ;;  %v5617_v4 = vld [vmem:[#allocation39_spill] sm:$0xff] }
 0x241   :  { %v5607_v27 = vsub.f32 %v5605_v34, %v5606_v9  ;;  %v5609_v21 = vsub.f32 %v5605_v34, %v5608_v36  ;;  %v5612_v26 = vsub.f32 %v5610_v60, %v5611_v19  ;;  %v5614_v6 = vsub.f32 %v5610_v60, %v5613_v13  ;;  %v5619_v56 = vld [vmem:[#allocation40_spill] sm:$0xff]  ;;  %v5621_v46 = vld [vmem:[#allocation27_spill] sm:$0xff]  ;;  %v5634_v36 = vld [vmem:[#allocation46_spill] sm:$0xff] }
 0x242   :  { %v2165_v52 = vsub.f32 %v4963_v62, %v4864_v15  ;;  %v5615_v0 = vmax.f32 %v4858_v12, 0.0  ;;  %v5087_v30 = vmul.f32 %v1697_v61, %v4898_v63  ;;  %v5090_v28 = vmul.f32 %v1841_v50, %v4898_v63  ;;  %v5631_v34 = vld [vmem:[#allocation31_spill] sm:$0xff]  ;;  %v5638_v13 = vld [vmem:[#allocation41_spill] sm:$0xff] }
 0x243   :  { %v1994_v11 = vadd.f32 %v1993_v18, %v5607_v27  ;;  %v2190_v5 = vadd.f32 %v2189_v49, %v5609_v21  ;;  %v2022_v25 = vadd.f32 %v2021_v23, %v5612_v26  ;;  %v2218_v33 = vadd.f32 %v2217_v48, %v5614_v6  ;;  %v5622_v18 = vld [vmem:[#allocation25_spill] sm:$0xff]  ;;  %v2730_v49 = vpop.eup %2729  ;;  %v5628_v23 = vld [vmem:[#allocation34_spill] sm:$0xff]  ;;  %v5636_v60 = vld [vmem:[#allocation47_spill] sm:$0xff] }
 0x244   :  { %v5084_v2 = vadd.f32 %v1464_v32, %v5615_v0  ;;  %v5618_v22 = vsub.f32 %v5616_v59, %v5617_v4  ;;  %v5620_v24 = vsub.f32 %v5616_v59, %v5619_v56  ;;  %v5623_v53 = vsub.f32 %v5621_v46, %v5622_v18  ;;  %v5624_v32 = vld [vmem:[#allocation26_spill] sm:$0xff]  ;;  %v5641_v0 = vld [vmem:[#allocation37_spill] sm:$0xff]  ;;  %v5643_v56 = vld [vmem:[#allocation56_spill] sm:$0xff] }
 0x245   :  { %v5625_v1 = vsub.f32 %v5621_v46, %v5624_v32  ;;  %v1470_v50 = vmul.f32 %v4990_v51, %v1469_v35  ;;  %vm5105_vm14 = vcmp.lt.f32.partialorder %v1471_v54, 0.0004427343  ;;  %v658_v47 = vmax.f32 %v4939_v45, 0.0  ;;  %v2732_v54 = vpop.eup %2731  ;;  %v5649_v32 = vld [vmem:[#allocation42_spill] sm:$0xff] }
 0x246   :  { %v1995_v20 = vadd.f32 %v1994_v11, %v5618_v22  ;;  %v2191_v41 = vadd.f32 %v2190_v5, %v5620_v24  ;;  %v2023_v12 = vadd.f32 %v2022_v25, %v5623_v53  ;;  %v1478_v58 = vadd.f32 1.0, %v1477_v39  ;;  %v5633_v11 = vld [vmem:[#allocation50_spill] sm:$0xff]  ;;  %v5644_v24 = vld [vmem:[#allocation52_spill] sm:$0xff] }
 0x247   :  { %v2219_v61 = vadd.f32 %v2218_v33, %v5625_v1  ;;  %v5630_v17 = vsub.f32 %v5628_v23, %v5629_v38  ;;  %v5632_v9 = vsub.f32 %v5628_v23, %v5631_v34  ;;  %2733 = vlog2.f32 %v1483_v8  ;;  %v5639_v8 = vld [vmem:[#allocation36_spill] sm:$0xff]  ;;  %v5651_v23 = vld [vmem:[#allocation43_spill] sm:$0xff]  ;;  %v5656_v34 = vld [vmem:[#allocation58_spill] sm:$0xff] }
 0x248   :  { %v5635_v21 = vsub.f32 %v5633_v11, %v5634_v36  ;;  %v1480_v35 = vand.u32 2147483647, %v5013_v3  ;;  %v1634_v5 = vunpack.c.3.s8 %v4622_v40  ;;  %v1486_v39 = vmul.f32 -0.5, %v5037_v29 }
 0x249   :  { %v2024_v48 = vadd.f32 %v2023_v12, %v5630_v17  ;;  %v2220_v27 = vadd.f32 %v2219_v61, %v5632_v9  ;;  %v5637_v19 = vsub.f32 %v5633_v11, %v5636_v60  ;;  %v1970_v25 = vsub.f32 %v5084_v2, %v4955_v10  ;;  %v5646_v10 = vld [vmem:[#allocation53_spill] sm:$0xff]  ;;  %v5658_v11 = vld [vmem:[#allocation59_spill] sm:$0xff] }
 0x24a   :  { %v1996_v51 = vadd.f32 %v1995_v20, %v5635_v21  ;;  %v5640_v6 = vsub.f32 %v5638_v13, %v5639_v8  ;;  %v5642_v59 = vsub.f32 %v5638_v13, %v5641_v0  ;;  %v1778_v22 = vunpack.c.3.s8 %v4627_v7  ;;  %v5648_v12 = vld [vmem:[#allocation45_spill] sm:$0xff]  ;;  %v5666_v0 = vld [vmem:[#allocation64_spill] sm:$0xff] }
 0x24b   :  { %v2192_v26 = vadd.f32 %v2191_v41, %v5637_v19  ;;  %v2166_v40 = vsub.f32 %v5084_v2, %v4966_v31  ;;  %v1467_v20 = vmul.f32 0.6931472, %v2730_v49  ;;  %v5645_v41 = vsub.f32 %v5643_v56, %v5644_v24 }
 0x24c   :  { %v2025_v33 = vadd.f32 %v2024_v48, %v5640_v6  ;;  %v2221_v4 = vadd.f32 %v2220_v27, %v5642_v59  ;;  %v5647_v18 = vsub.f32 %v5643_v56, %v5646_v10  ;;  %v5650_v1 = vsub.f32 %v5648_v12, %v5649_v32  ;;  %v5655_v48 = vld [vmem:[#allocation62_spill] sm:$0xff]  ;;  %v5670_v10 = vld [vmem:[#allocation57_spill] sm:$0xff] }
 0x24d   :  { %v1997_v46 = vadd.f32 %v1996_v51, %v5645_v41  ;;  %v5652_v38 = vsub.f32 %v5648_v12, %v5651_v23  ;;  %v1476_v17 = vmul.f32 0.6931472, %v2732_v54  ;;  %v1479_v31 = vmul.f32 %v5013_v3, %v1478_v58  ;;  %v2734_v51 = vpop.eup %2733  ;;  %v5660_v54 = vld [vmem:[#allocation51_spill] sm:$0xff] }
 0x24e   :  { %v2193_v53 = vadd.f32 %v2192_v26, %v5647_v18  ;;  %v2026_v61 = vadd.f32 %v2025_v33, %v5650_v1  ;;  %vm5149_vm15 = vcmp.lt.f32.partialorder %v1480_v35, 0.0004427343  ;;  %v1487_v49 = vadd.f32 1.0, %v1486_v39  ;;  %v5661_v26 = vld [vmem:[#allocation48_spill] sm:$0xff]  ;;  %v5663_v35 = vld [vmem:[#allocation49_spill] sm:$0xff]  ;;  %v5671_v18 = vld [vmem:[#allocation54_spill] sm:$0xff] }
 0x24f   :  { %v2222_v7 = vadd.f32 %v2221_v4, %v5652_v38  ;;  %v5657_v9 = vsub.f32 %v5655_v48, %v5656_v34  ;;  %v5659_v36 = vsub.f32 %v5655_v48, %v5658_v11  ;;  %v1698_v60 = vcvt.s32.f32 %v1634_v5  ;;  %v5665_v33 = vld [vmem:[#allocation68_spill] sm:$0xff]  ;;  %v5668_v5 = vld [vmem:[#allocation65_spill] sm:$0xff]  ;;  %v5675_v1 = vld [vmem:[#allocation74_spill] sm:$0xff] }
 0x250   :  { %v1489_v19 = vand.u32 2147483647, %v5037_v29  ;;  %v5662_v3 = vsub.f32 %v5660_v54, %v5661_v26  ;;  %v5664_v13 = vsub.f32 %v5660_v54, %v5663_v35  ;;  %v1473_v8 = vsel %vm5105_vm14, %v1470_v50, %v1467_v20  ;;  %v5673_v50 = vld [vmem:[#allocation55_spill] sm:$0xff]  ;;  %v5683_v34 = vld [vmem:[#allocation60_spill] sm:$0xff] }
 0x251   :  { %v1998_v27 = vadd.f32 %v1997_v46, %v5657_v9  ;;  %v2194_v21 = vadd.f32 %v2193_v53, %v5659_v36  ;;  %v1842_v6 = vcvt.s32.f32 %v1778_v22  ;;  %v5667_v59 = vsub.f32 %v5665_v33, %v5666_v0  ;;  %v5682_v48 = vld [vmem:[#allocation63_spill] sm:$0xff]  ;;  %v5688_v54 = vld [vmem:[#allocation76_spill] sm:$0xff] }
 0x252   :  { %v2027_v58 = vadd.f32 %v2026_v61, %v5662_v3  ;;  %v2223_v39 = vadd.f32 %v2222_v7, %v5664_v13  ;;  %v5669_v56 = vsub.f32 %v5665_v33, %v5668_v5  ;;  %v1482_v41 = vsel %vm5149_vm15, %v1479_v31, %v1476_v17  ;;  %v5676_v61 = vld [vmem:[#allocation70_spill] sm:$0xff]  ;;  %v5678_v7 = vld [vmem:[#allocation71_spill] sm:$0xff]  ;;  %v5691_v13 = vld [vmem:[#allocation69_spill] sm:$0xff] }
 0x253   :  { %v1999_v4 = vadd.f32 %v1998_v27, %v5667_v59  ;;  %v1635_v46 = vunpack.c.3.s8 %v4656_v43  ;;  %v5672_v53 = vsub.f32 %v5670_v10, %v5671_v18  ;;  %v5674_v55 = vsub.f32 %v5670_v10, %v5673_v50 }
 0x254   :  { %v2195_v24 = vadd.f32 %v2194_v21, %v5669_v56  ;;  %v1485_v20 = vmul.f32 0.6931472, %v2734_v51  ;;  %v1488_v32 = vmul.f32 %v5037_v29, %v1487_v49  ;;  %v5677_v23 = vsub.f32 %v5675_v1, %v5676_v61  ;;  %v5685_v29 = vld [vmem:[#allocation61_spill] sm:$0xff]  ;;  %v5697_v56 = vld [vmem:[#allocation80_spill] sm:$0xff] }
 0x255   :  { %v2028_v12 = vadd.f32 %v2027_v58, %v5672_v53  ;;  %v2224_v22 = vadd.f32 %v2223_v39, %v5674_v55  ;;  %v5679_v17 = vsub.f32 %v5675_v1, %v5678_v7  ;;  %vm5190_vm0 = vcmp.lt.f32.partialorder %v1489_v19, 0.0004427343  ;;  %v5692_v39 = vld [vmem:[#allocation66_spill] sm:$0xff]  ;;  %v5701_v53 = vld [vmem:[#allocation75_spill] sm:$0xff]  ;;  %v5707_v7 = vld [vmem:[#allocation77_spill] sm:$0xff] }
 0x256   :  { %v2000_v38 = vadd.f32 %v1999_v4, %v5677_v23  ;;  %v1779_v2 = vunpack.c.3.s8 %v4664_v57  ;;  %v5684_v9 = vsub.f32 %v5682_v48, %v5683_v34  ;;  %v5686_v49 = vsub.f32 %v5682_v48, %v5685_v29 }
 0x257   :  { %v2196_v31 = vadd.f32 %v2195_v24, %v5679_v17  ;;  %v1554_v36 = vadd.f32 %v1482_v41, %v658_v47  ;;  %v659_v21 = vmax.f32 %v4959_v37, 0.0  ;;  %v5687_v51 = vsub.f32 %v4799_v42, %v4692_v16  ;;  %v5694_v47 = vld [vmem:[#allocation67_spill] sm:$0xff] }
 0x258   :  { %v2029_v27 = vadd.f32 %v2028_v12, %v5684_v9  ;;  %v2225_v11 = vadd.f32 %v2224_v22, %v5686_v49  ;;  %v5689_v26 = vsub.f32 %v4799_v42, %v5688_v54  ;;  %v5690_v57 = vmax.f32 %v4898_v63, 0.0  ;;  %v5696_v42 = vld [vmem:[#allocation82_spill] sm:$0xff]  ;;  %v5702_v12 = vld [vmem:[#allocation72_spill] sm:$0xff]  ;;  %v5704_v22 = vld [vmem:[#allocation73_spill] sm:$0xff] }
 0x259   :  { %v2001_v19 = vadd.f32 %v2000_v38, %v5687_v51  ;;  %v1908_v35 = vmul.f32 %v1698_v60, %v4939_v45  ;;  %v5693_v33 = vsub.f32 %v5691_v13, %v5692_v39  ;;  %v5695_v59 = vsub.f32 %v5691_v13, %v5694_v47  ;;  %v5706_v38 = vld [vmem:[#allocation79_spill] sm:$0xff] }
 0x25a   :  { %v2197_v3 = vadd.f32 %v2196_v31, %v5689_v26  ;;  %v1553_v58 = vadd.f32 %v1473_v8, %v5690_v57  ;;  %v2104_v16 = vmul.f32 %v1842_v6, %v4939_v45  ;;  %v1491_v5 = vsel %vm5190_vm0, %v1488_v32, %v1485_v20  ;;  %v5699_v8 = vld [vmem:[#allocation81_spill] sm:$0xff] }
 0x25b   :  { %v2030_v0 = vadd.f32 %v2029_v27, %v5693_v33  ;;  %v2226_v4 = vadd.f32 %v2225_v11, %v5695_v59  ;;  %v5698_v24 = vsub.f32 %v5696_v42, %v5697_v56  ;;  %v5700_v60 = vsub.f32 %v5696_v42, %v5699_v8 }
 0x25c   :  { %v1699_v10 = vcvt.s32.f32 %v1635_v46  ;;  %v1843_v18 = vcvt.s32.f32 %v1779_v2  ;;  %v5703_v50 = vsub.f32 %v5701_v53, %v5702_v12  ;;  %v5705_v45 = vsub.f32 %v5701_v53, %v5704_v22  ;;  %v5709_v46 = vld [vmem:[#allocation78_spill] sm:$0xff] }
 0x25d   :  { %v2002_v63 = vadd.f32 %v2001_v19, %v5698_v24  ;;  %v2198_v41 = vadd.f32 %v2197_v3, %v5700_v60  ;;  %v1972_v1 = vsub.f32 %v1554_v36, %v1908_v35  ;;  %v2168_v20 = vsub.f32 %v1554_v36, %v2104_v16 }
 0x25e   :  { %v2031_v55 = vadd.f32 %v2030_v0, %v5703_v50  ;;  %v2227_v6 = vadd.f32 %v2226_v4, %v5705_v45  ;;  %v1555_v23 = vadd.f32 %v1491_v5, %v659_v21  ;;  %v5708_v17 = vsub.f32 %v5706_v38, %v5707_v7 }
 0x25f   :  { %v2003_v32 = vadd.f32 %v2002_v63, %v1970_v25  ;;  %v2199_v61 = vadd.f32 %v2198_v41, %v2166_v40  ;;  %v5710_v43 = vsub.f32 %v5706_v38, %v5709_v46  ;;  %v1971_v48 = vsub.f32 %v1553_v58, %v5087_v30 }
 0x260   :  { %v2032_v31 = vadd.f32 %v2031_v55, %v5708_v17  ;;  %v2167_v34 = vsub.f32 %v1553_v58, %v5090_v28  ;;  %v1909_v29 = vmul.f32 %v1699_v10, %v4959_v37  ;;  %v2105_v25 = vmul.f32 %v1843_v18, %v4959_v37 }
 0x261   :  { %v2228_v2 = vadd.f32 %v2227_v6, %v5710_v43  ;;  %v2004_v9 = vadd.f32 %v2003_v32, %v1972_v1  ;;  %v2200_v27 = vadd.f32 %v2199_v61, %v2168_v20 }
 0x262   :  { %v2033_v40 = vadd.f32 %v2032_v31, %v1969_v44  ;;  %v1973_v11 = vsub.f32 %v1555_v23, %v1909_v29  ;;  %v2169_v36 = vsub.f32 %v1555_v23, %v2105_v25 }
 0x263   :  { %v2229_v49 = vadd.f32 %v2228_v2, %v2165_v52  ;;  %2038 = vst [vmem:[#allocation4] sm:$0xff] %v2004_v9 }
 0x264   :  { %v2034_v21 = vadd.f32 %v2033_v40, %v1971_v48  ;;  %2234 = vst [vmem:[#allocation6] sm:$0xff] %v2200_v27 }
 0x265   :  { %v2230_v30 = vadd.f32 %v2229_v49, %v2167_v34 }
 0x266   :  { %v2035_v37 = vadd.f32 %v2034_v21, %v1973_v11 }
 0x267   :  { %v2231_v28 = vadd.f32 %v2230_v30, %v2169_v36 }
 0x268   :  { %2039 = vst [vmem:[#allocation4 + $0x8] sm:$0xff] %v2035_v37 }
 0x269   :  { %2246 = dma.vmem_to_hbm [thread:$0]  %s2242_s4, 256, %s2244_s23, [#allocation5]   ;;  %2235 = vst [vmem:[#allocation6 + $0x8] sm:$0xff] %v2231_v28 }
 0x26a   :  { %2257 = dma.vmem_to_hbm [thread:$0]  %s2253_s25, 256, %s2255_s28, [#allocation7]  }
 0x26b   :  { %2783 = dma.done.wait [#allocation5], 256  }
 0x26c   :  { %2784 = vsyncadd [#allocation5], 4294967040 }
 0x26d   :  { %2785 = dma.done.wait [#allocation7], 256  }
 0x26e   :  { %2786 = vsyncadd [#allocation7], 4294967040 }
 0x26f   :  { %2266 = vsyncpa [#allocation5], 1 }
 0x270   :  { %2267 = vsyncpa [#allocation7], 1 }

</bundles_post_ra>
